<compile_context>
chip_gen: v6e
topology: v6e:2x2x1
jax: 0.10.0
libtpu: 0.0.40
codegen_flags: <defaults>
</compile_context>

<pallas_src>
import math

import jax
import jax.numpy as jnp
from jax.experimental import pallas as pl
from jax.experimental.pallas import tpu as pltpu


# ---------------------------------------------------------------------------
# Shared epilogue: leaky-relu'd hidden -> mean/logvar, z, heads, decoder hidden
# ---------------------------------------------------------------------------
def _vae_heads_epilogue(preact, ewml_ref, ebml_ref, dw1_ref, db1_ref,
                        hw1_ref, hb1_ref, hw2_ref, hb2_ref,
                        mean_ref, logvar_ref, tissue_ref, site_ref):
    """preact: f32 (tb, h_pad) = x @ ew1 + eb1 (BN already folded)."""
    h = jnp.where(preact > 0, preact, 0.01 * preact)        # leaky_relu(0.01)
    h16 = h.astype(jnp.bfloat16)

    # mean | logvar in one wide matmul.
    ml = jnp.dot(h16, ewml_ref[...], preferred_element_type=jnp.float32)
    ml = ml + ebml_ref[...]
    l_pad = mean_ref.shape[1]
    mean = ml[:, :l_pad]
    mean_ref[...] = mean
    logvar_ref[...] = ml[:, l_pad:]

    # reparameterize (eval mode): z = mean
    z = mean.astype(jnp.bfloat16)

    # decoder fc1 (BN folded) + leaky_relu
    hd = jnp.dot(z, dw1_ref[...], preferred_element_type=jnp.float32)
    hd = hd + db1_ref[...]
    hd = jnp.where(hd > 0, hd, 0.01 * hd)

    # heads fc1: tissue|site concatenated -> one (latent, 256) matmul + ReLU
    hh = jnp.dot(z, hw1_ref[...], preferred_element_type=jnp.float32)
    hh = jnp.maximum(hh + hb1_ref[...], 0.0).astype(jnp.bfloat16)

    # heads fc2: block-diagonal (tw2 ⊕ sw2) -> single 256-deep MXU pass.
    lg = jnp.dot(hh, hw2_ref[...], preferred_element_type=jnp.float32)
    lg = lg + hb2_ref[...]                                   # pads carry -1e30
    t_pad = tissue_ref.shape[1]
    lt = lg[:, :t_pad]
    ls = lg[:, t_pad:]

    lt = lt - jnp.max(lt, axis=1, keepdims=True)
    et = jnp.exp(lt)
    tissue_ref[...] = et / jnp.sum(et, axis=1, keepdims=True)   # exact normalize

    ls = ls - jnp.max(ls, axis=1, keepdims=True)
    es = jnp.exp(ls)
    site_ref[...] = es / jnp.sum(es, axis=1, keepdims=True)

    return hd


# ---------------------------------------------------------------------------
# Kernel F: fully fused forward (everything resident in VMEM), grid=(nb,)
# ---------------------------------------------------------------------------
def premet_fused_kernel(
    x_ref, ew1_ref, eb1_ref, ewml_ref, ebml_ref,
    dw1_ref, db1_ref, hw1_ref, hb1_ref, hw2_ref, hb2_ref,
    dw2_ref, db2_ref,
    recon_ref, mean_ref, logvar_ref, tissue_ref, site_ref,
):
    x = x_ref[...].astype(jnp.bfloat16)       # in-kernel cast (x may arrive f32)
    preact = jnp.dot(x, ew1_ref[...], preferred_element_type=jnp.float32)
    preact = preact + eb1_ref[...]
    hd = _vae_heads_epilogue(preact, ewml_ref, ebml_ref, dw1_ref, db1_ref,
                             hw1_ref, hb1_ref, hw2_ref, hb2_ref,
                             mean_ref, logvar_ref, tissue_ref, site_ref)
    recon = jnp.dot(hd.astype(jnp.bfloat16), dw2_ref[...],
                    preferred_element_type=jnp.float32) + db2_ref[...]
    recon_ref[...] = recon.astype(recon_ref.dtype)


# ---------------------------------------------------------------------------
# Streamed fallback, kernel A: encoder fc1 K-streamed + epilogue on last step
# ---------------------------------------------------------------------------
def encoder_heads_kernel(
    x_ref, ew1_ref, eb1_ref, ewml_ref, ebml_ref,
    dw1_ref, db1_ref, hw1_ref, hb1_ref, hw2_ref, hb2_ref,
    mean_ref, logvar_ref, tissue_ref, site_ref, hd_ref,
    acc_ref,
):
    k = pl.program_id(1)

    @pl.when(k == 0)
    def _():
        acc_ref[...] = jnp.zeros_like(acc_ref)

    acc_ref[...] += jnp.dot(x_ref[...].astype(jnp.bfloat16), ew1_ref[...],
                            preferred_element_type=jnp.float32)

    @pl.when(k == pl.num_programs(1) - 1)
    def _():
        preact = acc_ref[...] + eb1_ref[...]
        hd = _vae_heads_epilogue(preact, ewml_ref, ebml_ref, dw1_ref, db1_ref,
                                 hw1_ref, hb1_ref, hw2_ref, hb2_ref,
                                 mean_ref, logvar_ref, tissue_ref, site_ref)
        hd_ref[...] = hd.astype(hd_ref.dtype)


# ---------------------------------------------------------------------------
# Streamed fallback, kernel B: decoder fc2, gene axis OUTER so dw2 streams once
# ---------------------------------------------------------------------------
def decoder_fc2_kernel(hd_ref, dw2_ref, db2_ref, recon_ref):
    recon = jnp.dot(hd_ref[...], dw2_ref[...],
                    preferred_element_type=jnp.float32) + db2_ref[...]
    recon_ref[...] = recon.astype(recon_ref.dtype)


# ---------------------------------------------------------------------------
# Host-side parameter construction / preparation
# ---------------------------------------------------------------------------
def _round_up(x, m):
    return ((x + m - 1) // m) * m


def _xavier_normal(key, fan_in, fan_out):
    std = math.sqrt(2.0 / (fan_in + fan_out))
    return (std * jax.random.normal(key, (fan_in, fan_out))).astype(jnp.float32)


def make_premet_params(key, gene_num, latent_size, num_tumors, num_sites,
                       hidden_size):
    """Raw PyTorch-equivalent parameters (f32, un-padded, un-folded)."""
    ks = jax.random.split(key, 9)

    def zeros(n):
        return jnp.zeros((n,), jnp.float32)

    def bn(n):
        return dict(gamma=jnp.ones((n,), jnp.float32), beta=zeros(n),
                    mean=zeros(n), var=jnp.ones((n,), jnp.float32))

    return dict(
        # encoder
        ew1=_xavier_normal(ks[0], gene_num, hidden_size), eb1=zeros(hidden_size),
        ebn=bn(hidden_size),
        ewm=_xavier_normal(ks[1], hidden_size, latent_size), ebm=zeros(latent_size),
        ewl=_xavier_normal(ks[2], hidden_size, latent_size), ebl=zeros(latent_size),
        # decoder
        dw1=_xavier_normal(ks[3], latent_size, hidden_size), db1=zeros(hidden_size),
        dbn=bn(hidden_size),
        dw2=_xavier_normal(ks[4], hidden_size, gene_num), db2=zeros(gene_num),
        # Primary_tumor_DNN
        tw1=_xavier_normal(ks[5], latent_size, 128), tb1=zeros(128),
        tbn=bn(128),
        tw2=_xavier_normal(ks[6], 128, num_tumors), tb2=zeros(num_tumors),
        # Metas_site_DNN
        sw1=_xavier_normal(ks[7], latent_size, 128), sb1=zeros(128),
        sbn=bn(128),
        sw2=_xavier_normal(ks[8], 128, num_sites), sb2=zeros(num_sites),
    )


def prepare_premet_params(p, eps=1e-5):
    """Fold eval-mode BN into weights, concat shared-input matmuls, build the
    block-diagonal head-fc2 weight, pad to lane-dense (128-multiple) shapes,
    cast weights to bf16."""
    gene_num, hidden = p["ew1"].shape
    latent = p["ewm"].shape[1]
    n_tum = p["tw2"].shape[1]
    n_site = p["sw2"].shape[1]

    if gene_num >= 16384:       # long K streams: bigger tiles, fewer grid steps
        g_mult = 1024
    elif gene_num > 512:
        g_mult = 512
    else:
        g_mult = 128
    g_pad = _round_up(gene_num, g_mult)
    h_pad = _round_up(hidden, 128)
    l_pad = _round_up(latent, 128)
    t_pad = _round_up(n_tum, 128)
    s_pad = _round_up(n_site, 128)

    def fold(w, b, bn):
        scale = bn["gamma"] / jnp.sqrt(bn["var"] + eps)
        shift = bn["beta"] - bn["mean"] * scale
        return w * scale[None, :], b * scale + shift

    def pad_w(w, r, c):
        return jnp.pad(w, ((0, r - w.shape[0]), (0, c - w.shape[1]))).astype(jnp.bfloat16)

    def pad_b(b, c, fill=0.0):
        return jnp.pad(b, (0, c - b.shape[0]),
                       constant_values=fill).reshape(1, c).astype(jnp.float32)

    ew1, eb1 = fold(p["ew1"], p["eb1"], p["ebn"])
    dw1, db1 = fold(p["dw1"], p["db1"], p["dbn"])
    tw1, tb1 = fold(p["tw1"], p["tb1"], p["tbn"])
    sw1, sb1 = fold(p["sw1"], p["sb1"], p["sbn"])

    ewm = jnp.pad(p["ewm"], ((0, 0), (0, l_pad - latent)))
    ewl = jnp.pad(p["ewl"], ((0, 0), (0, l_pad - latent)))

    # Block-diagonal head fc2: (256, t_pad + s_pad); padded classes get -1e30 bias.
    hw2 = jnp.zeros((256, t_pad + s_pad), jnp.float32)
    hw2 = hw2.at[:128, :n_tum].set(p["tw2"])
    hw2 = hw2.at[128:, t_pad:t_pad + n_site].set(p["sw2"])
    hb2 = jnp.concatenate([pad_b(p["tb2"], t_pad, fill=-1e30),
                           pad_b(p["sb2"], s_pad, fill=-1e30)], axis=1)

    return dict(
        ew1=pad_w(ew1, g_pad, h_pad), eb1=pad_b(eb1, h_pad),
        ewml=pad_w(jnp.concatenate([ewm, ewl], axis=1), h_pad, 2 * l_pad),
        ebml=jnp.concatenate([pad_b(p["ebm"], l_pad), pad_b(p["ebl"], l_pad)], axis=1),
        dw1=pad_w(dw1, l_pad, h_pad), db1=pad_b(db1, h_pad),
        hw1=pad_w(jnp.concatenate([tw1, sw1], axis=1), l_pad, 256),
        hb1=jnp.concatenate([pad_b(tb1, 128), pad_b(sb1, 128)], axis=1),
        hw2=hw2.astype(jnp.bfloat16), hb2=hb2,
        dw2=pad_w(p["dw2"], h_pad, g_pad), db2=pad_b(p["db2"], g_pad),
    )


# ---------------------------------------------------------------------------
# VMEM estimates (path / tile-size selection; conservative, double-buffered)
# ---------------------------------------------------------------------------
def _fused_vmem_bytes(tb, g_pad, h_pad, l_pad, c_pad, x_bytes, recon_bytes):
    weights = 2 * (g_pad * h_pad + h_pad * 2 * l_pad + l_pad * h_pad
                   + l_pad * 256 + 256 * c_pad + h_pad * g_pad)        # bf16
    biases = 4 * (2 * h_pad + 2 * l_pad + 256 + c_pad + g_pad)
    x_tile = tb * g_pad * x_bytes
    out_tiles = tb * (g_pad * recon_bytes + (2 * l_pad + c_pad) * 4)
    interm = tb * (g_pad + 4 * h_pad + 4 * l_pad + 2 * c_pad) * 4
    return 2 * (weights + biases + x_tile + out_tiles) + interm


def _stream_a_vmem_bytes(tb, tk, h_pad, l_pad, c_pad):
    streamed = 2 * (tb * tk * 2 + tk * h_pad * 2)                       # x, ew1
    resident = (h_pad * 2 * l_pad + l_pad * h_pad + l_pad * 256 + 256 * c_pad) * 2 \
               + (2 * h_pad + 2 * l_pad + 256 + c_pad) * 4              # Buffered(1)
    outs = 2 * tb * ((2 * l_pad + c_pad) * 4 + h_pad * 2)
    acc = tb * h_pad * 4
    interm = tb * (4 * h_pad + 4 * l_pad + 2 * c_pad) * 4
    return streamed + resident + outs + acc + interm


def _stream_b_vmem_bytes(tb, tk, h_pad, recon_bytes):
    return (2 * (tb * h_pad * 2 + h_pad * tk * 2 + tk * 4)
            + 2 * tb * tk * recon_bytes + tb * tk * 4)


# ---------------------------------------------------------------------------
# Forward pass
# ---------------------------------------------------------------------------
def make_premet_forward(gene_num, latent_size, num_tumors, num_sites,
                        recon_dtype=jnp.float32):
    t_pad = _round_up(num_tumors, 128)
    s_pad = _round_up(num_sites, 128)
    c_pad = t_pad + s_pad

    # Generation-aware VMEM budget (v7x has 64 MiB physical; v5e/v6e 128 MiB).
    try:
        phys_vmem = int(pltpu.get_tpu_info().vmem_capacity_bytes)
    except Exception:
        phys_vmem = 64 * 1024 * 1024
    vmem_limit = min(int(phys_vmem * 0.65), 100 * 1024 * 1024)
    budget = int(vmem_limit * 0.85)
    recon_bytes = jnp.dtype(recon_dtype).itemsize

    @jax.jit
    def fwd(x, prep):
        batch = x.shape[0]
        g_pad, h_pad = prep["ew1"].shape
        l_pad = prep["ewml"].shape[1] // 2
        gene_padded = (g_pad != gene_num)

        # ------------------- fused-path batch tiling -------------------
        if batch <= 256:
            tb_f, b_pad_f, nb_f = batch, batch, 1
        else:
            tb_f = 256                       # fill v6e/v7x 256-row MXU
            b_pad_f = _round_up(batch, tb_f)
            nb_f = b_pad_f // tb_f

        x_bytes_f = 2 if gene_padded else 4
        fused_fits = _fused_vmem_bytes(tb_f, g_pad, h_pad, l_pad, c_pad,
                                       x_bytes_f, recon_bytes) <= budget

        if fused_fits:
            # ------------------ FUSED FAST PATH ------------------
            if gene_padded:
                # gene pad is unavoidable -> fuse pad+cast (bf16 halves traffic)
                x_in = jnp.pad(x, ((0, b_pad_f - batch),
                                   (0, g_pad - gene_num))).astype(jnp.bfloat16)
            elif b_pad_f != batch:
                x_in = jnp.pad(x, ((0, b_pad_f - batch), (0, 0)))
            else:
                x_in = x                     # no host pad/cast; cast in-kernel

            def res(shape):                  # resident weights
                return pl.BlockSpec(shape, lambda b: (0, 0))

            recon_p, mean_p, logvar_p, tissue_p, site_p = pl.pallas_call(
                premet_fused_kernel,
                out_shape=(
                    jax.ShapeDtypeStruct((b_pad_f, g_pad), recon_dtype),
                    jax.ShapeDtypeStruct((b_pad_f, l_pad), jnp.float32),
                    jax.ShapeDtypeStruct((b_pad_f, l_pad), jnp.float32),
                    jax.ShapeDtypeStruct((b_pad_f, t_pad), jnp.float32),
                    jax.ShapeDtypeStruct((b_pad_f, s_pad), jnp.float32),
                ),
                grid_spec=pltpu.PrefetchScalarGridSpec(
                    num_scalar_prefetch=0,
                    grid=(nb_f,),
                    in_specs=[
                        pl.BlockSpec((tb_f, g_pad), lambda b: (b, 0)),   # x
                        res((g_pad, h_pad)),                             # ew1
                        res((1, h_pad)),                                 # eb1
                        res((h_pad, 2 * l_pad)),                         # ewm|ewl
                        res((1, 2 * l_pad)),                             # ebm|ebl
                        res((l_pad, h_pad)),                             # dw1
                        res((1, h_pad)),                                 # db1
                        res((l_pad, 256)),                               # tw1|sw1
                        res((1, 256)),                                   # tb1|sb1
                        res((256, c_pad)),                               # tw2⊕sw2
                        res((1, c_pad)),                                 # tb2|sb2
                        res((h_pad, g_pad)),                             # dw2
                        res((1, g_pad)),                                 # db2
                    ],
                    out_specs=(
                        pl.BlockSpec((tb_f, g_pad), lambda b: (b, 0)),
                        pl.BlockSpec((tb_f, l_pad), lambda b: (b, 0)),
                        pl.BlockSpec((tb_f, l_pad), lambda b: (b, 0)),
                        pl.BlockSpec((tb_f, t_pad), lambda b: (b, 0)),
                        pl.BlockSpec((tb_f, s_pad), lambda b: (b, 0)),
                    ),
                ),
                compiler_params=pltpu.CompilerParams(
                    dimension_semantics=("parallel",),
                    vmem_limit_bytes=vmem_limit,
                ),
            )(x_in, prep["ew1"], prep["eb1"], prep["ewml"], prep["ebml"],
              prep["dw1"], prep["db1"], prep["hw1"], prep["hb1"],
              prep["hw2"], prep["hb2"], prep["dw2"], prep["db2"])

        else:
            # ------------------ STREAMED FALLBACK ------------------
            if batch <= 256:
                tb = _round_up(batch, 8); b_pad = tb; nb = 1
            else:
                tb = 256; b_pad = _round_up(batch, tb); nb = b_pad // tb

            tk_candidates = [t for t in (2048, 1024, 512, 256, 128)
                             if g_pad % t == 0]
            tk = tk_candidates[-1]
            for t in tk_candidates:
                if max(_stream_a_vmem_bytes(tb, t, h_pad, l_pad, c_pad),
                       _stream_b_vmem_bytes(tb, t, h_pad, recon_bytes)) <= budget:
                    tk = t
                    break
            nk = g_pad // tk

            # gene pad needed for tiling -> fuse pad+cast to bf16 on the host.
            xp = jnp.pad(x, ((0, b_pad - batch),
                             (0, g_pad - gene_num))).astype(jnp.bfloat16)

            def res_a(shape):   # resident epilogue weights: single-buffered
                return pl.BlockSpec(shape, lambda b, k: (0, 0),
                                    pipeline_mode=pl.Buffered(1))

            mean_p, logvar_p, tissue_p, site_p, hd = pl.pallas_call(
                encoder_heads_kernel,
                out_shape=(
                    jax.ShapeDtypeStruct((b_pad, l_pad), jnp.float32),
                    jax.ShapeDtypeStruct((b_pad, l_pad), jnp.float32),
                    jax.ShapeDtypeStruct((b_pad, t_pad), jnp.float32),
                    jax.ShapeDtypeStruct((b_pad, s_pad), jnp.float32),
                    jax.ShapeDtypeStruct((b_pad, h_pad), jnp.bfloat16),
                ),
                grid_spec=pltpu.PrefetchScalarGridSpec(
                    num_scalar_prefetch=0,
                    grid=(nb, nk),
                    in_specs=[
                        pl.BlockSpec((tb, tk), lambda b, k: (b, k)),      # x
                        pl.BlockSpec((tk, h_pad), lambda b, k: (k, 0)),   # ew1
                        res_a((1, h_pad)),
                        res_a((h_pad, 2 * l_pad)),
                        res_a((1, 2 * l_pad)),
                        res_a((l_pad, h_pad)),
                        res_a((1, h_pad)),
                        res_a((l_pad, 256)),
                        res_a((1, 256)),
                        res_a((256, c_pad)),
                        res_a((1, c_pad)),
                    ],
                    out_specs=(
                        pl.BlockSpec((tb, l_pad), lambda b, k: (b, 0)),
                        pl.BlockSpec((tb, l_pad), lambda b, k: (b, 0)),
                        pl.BlockSpec((tb, t_pad), lambda b, k: (b, 0)),
                        pl.BlockSpec((tb, s_pad), lambda b, k: (b, 0)),
                        pl.BlockSpec((tb, h_pad), lambda b, k: (b, 0)),
                    ),
                    scratch_shapes=[pltpu.VMEM((tb, h_pad), jnp.float32)],
                ),
                compiler_params=pltpu.CompilerParams(
                    dimension_semantics=("parallel", "arbitrary"),
                    vmem_limit_bytes=vmem_limit,
                ),
            )(xp, prep["ew1"], prep["eb1"], prep["ewml"], prep["ebml"],
              prep["dw1"], prep["db1"], prep["hw1"], prep["hb1"],
              prep["hw2"], prep["hb2"])

            # Kernel B: gene axis OUTER so dw2 streams from HBM only once.
            recon_p = pl.pallas_call(
                decoder_fc2_kernel,
                out_shape=jax.ShapeDtypeStruct((b_pad, g_pad), recon_dtype),
                grid_spec=pltpu.PrefetchScalarGridSpec(
                    num_scalar_prefetch=0,
                    grid=(nk, nb),
                    in_specs=[
                        pl.BlockSpec((tb, h_pad), lambda n, b: (b, 0)),   # hd
                        pl.BlockSpec((h_pad, tk), lambda n, b: (0, n)),   # dw2
                        pl.BlockSpec((1, tk), lambda n, b: (0, n)),       # db2
                    ],
                    out_specs=pl.BlockSpec((tb, tk), lambda n, b: (b, n)),
                ),
                compiler_params=pltpu.CompilerParams(
                    dimension_semantics=("parallel", "parallel"),
                    vmem_limit_bytes=vmem_limit,
                ),
            )(hd, prep["dw2"], prep["db2"])

        recon = recon_p[:batch, :gene_num]
        mean = mean_p[:batch, :latent_size]
        logvar = logvar_p[:batch, :latent_size]
        tissue = tissue_p[:batch, :num_tumors]
        site = site_p[:batch, :num_sites]
        return recon, mean, logvar, tissue, site

    return fwd


# ---------------------------------------------------------------------------
# Pure-JAX f32 reference (eval mode) for correctness checking
# ---------------------------------------------------------------------------
def premet_reference(x, p, eps=1e-5):
    def bn(v, b):
        return (v - b["mean"]) / jnp.sqrt(b["var"] + eps) * b["gamma"] + b["beta"]

    def leaky(v):
        return jnp.where(v > 0, v, 0.01 * v)

    h = leaky(bn(x @ p["ew1"] + p["eb1"], p["ebn"]))
    mean = h @ p["ewm"] + p["ebm"]
    logvar = h @ p["ewl"] + p["ebl"]
    z = mean  # eval-mode reparameterize
    hd = leaky(bn(z @ p["dw1"] + p["db1"], p["dbn"]))
    recon = hd @ p["dw2"] + p["db2"]
    ht = jnp.maximum(bn(z @ p["tw1"] + p["tb1"], p["tbn"]), 0.0)
    tissue = jax.nn.softmax(ht @ p["tw2"] + p["tb2"], axis=1)
    hs = jnp.maximum(bn(z @ p["sw1"] + p["sb1"], p["sbn"]), 0.0)
    site = jax.nn.softmax(hs @ p["sw2"] + p["sb2"], axis=1)
    return recon, mean, logvar, tissue, site


if __name__ == "__main__":
    # Small demo config (gene axis pads 2500 -> 2560; fused fast path is taken).
    B = 20
    gene_num = 2500
    latent_size = 16
    num_tumors = 8
    num_metas_sites = 4
    hidden_size = 32

    key = jax.random.PRNGKey(0)
    kx, kp = jax.random.split(key)
    x = jax.random.normal(kx, (B, gene_num), dtype=jnp.float32)

    raw = make_premet_params(kp, gene_num, latent_size, num_tumors,
                             num_metas_sites, hidden_size)
    prep = prepare_premet_params(raw)

    fwd = make_premet_forward(gene_num, latent_size, num_tumors, num_metas_sites)
    outs = jax.block_until_ready(fwd(x, prep))

    refs = premet_reference(x, raw)
    names = ["recon", "mean", "logvar", "tissue", "site"]
    for name, o, r in zip(names, outs, refs):
        assert o.shape == r.shape and o.dtype == r.dtype, (name, o.shape, r.shape)
        max_err = float(jnp.max(jnp.abs(o - r)))
        # bf16 weights / bf16 activation recompression vs f32 reference
        assert jnp.allclose(o, r, atol=5e-2, rtol=5e-2), (
            f"{name} mismatch vs reference (max abs err {max_err})"
        )

    print("KERNEL_OK")
</pallas_src>

<mosaic_0001>
module attributes {stable_mosaic.version = 11 : i64} {
  func.func @premet_fused_kernel(%arg0: i32, %arg1: memref<20x2560xbf16, #tpu.memory_space<vmem>>, %arg2: memref<2560x128xbf16, #tpu.memory_space<vmem>>, %arg3: memref<1x128xf32, #tpu.memory_space<vmem>>, %arg4: memref<128x256xbf16, #tpu.memory_space<vmem>>, %arg5: memref<1x256xf32, #tpu.memory_space<vmem>>, %arg6: memref<128x128xbf16, #tpu.memory_space<vmem>>, %arg7: memref<1x128xf32, #tpu.memory_space<vmem>>, %arg8: memref<128x256xbf16, #tpu.memory_space<vmem>>, %arg9: memref<1x256xf32, #tpu.memory_space<vmem>>, %arg10: memref<256x256xbf16, #tpu.memory_space<vmem>>, %arg11: memref<1x256xf32, #tpu.memory_space<vmem>>, %arg12: memref<128x2560xbf16, #tpu.memory_space<vmem>>, %arg13: memref<1x2560xf32, #tpu.memory_space<vmem>>, %arg14: memref<20x2560xf32, #tpu.memory_space<vmem>>, %arg15: memref<20x128xf32, #tpu.memory_space<vmem>>, %arg16: memref<20x128xf32, #tpu.memory_space<vmem>>, %arg17: memref<20x128xf32, #tpu.memory_space<vmem>>, %arg18: memref<20x128xf32, #tpu.memory_space<vmem>>) attributes {dimension_semantics = [#tpu.dimension_semantics<parallel>], iteration_bounds = array<i64: 1>, scalar_prefetch = 0 : i64, scratch_operands = 0 : i64, tpu.core_type = #tpu.core_type<tc>, window_params = [{transform_indices = @transform_0, window_bounds = array<i64: 20, 2560>}, {pipeline_mode = #tpu.pipeline_mode<synchronous>, transform_indices = @transform_1, window_bounds = array<i64: 2560, 128>}, {pipeline_mode = #tpu.pipeline_mode<synchronous>, transform_indices = @transform_2, window_bounds = array<i64: 1, 128>}, {pipeline_mode = #tpu.pipeline_mode<synchronous>, transform_indices = @transform_3, window_bounds = array<i64: 128, 256>}, {pipeline_mode = #tpu.pipeline_mode<synchronous>, transform_indices = @transform_4, window_bounds = array<i64: 1, 256>}, {pipeline_mode = #tpu.pipeline_mode<synchronous>, transform_indices = @transform_5, window_bounds = array<i64: 128, 128>}, {pipeline_mode = #tpu.pipeline_mode<synchronous>, transform_indices = @transform_6, window_bounds = array<i64: 1, 128>}, {pipeline_mode = #tpu.pipeline_mode<synchronous>, transform_indices = @transform_7, window_bounds = array<i64: 128, 256>}, {pipeline_mode = #tpu.pipeline_mode<synchronous>, transform_indices = @transform_8, window_bounds = array<i64: 1, 256>}, {pipeline_mode = #tpu.pipeline_mode<synchronous>, transform_indices = @transform_9, window_bounds = array<i64: 256, 256>}, {pipeline_mode = #tpu.pipeline_mode<synchronous>, transform_indices = @transform_10, window_bounds = array<i64: 1, 256>}, {pipeline_mode = #tpu.pipeline_mode<synchronous>, transform_indices = @transform_11, window_bounds = array<i64: 128, 2560>}, {pipeline_mode = #tpu.pipeline_mode<synchronous>, transform_indices = @transform_12, window_bounds = array<i64: 1, 2560>}, {transform_indices = @transform_13, window_bounds = array<i64: 20, 2560>}, {transform_indices = @transform_14, window_bounds = array<i64: 20, 128>}, {transform_indices = @transform_15, window_bounds = array<i64: 20, 128>}, {transform_indices = @transform_16, window_bounds = array<i64: 20, 128>}, {transform_indices = @transform_17, window_bounds = array<i64: 20, 128>}]} {
    %c0 = arith.constant 0 : index
    %c0_0 = arith.constant 0 : index
    %0 = vector.load %arg1[%c0, %c0_0] : memref<20x2560xbf16, #tpu.memory_space<vmem>>, vector<20x2560xbf16>
    %c0_1 = arith.constant 0 : index
    %c0_2 = arith.constant 0 : index
    %1 = vector.load %arg2[%c0_1, %c0_2] : memref<2560x128xbf16, #tpu.memory_space<vmem>>, vector<2560x128xbf16>
    %cst = arith.constant dense<0.000000e+00> : vector<20x128xf32>
    %2 = tpu.matmul %0, %1, %cst {dimension_numbers = #tpu.dot_dimension_numbers<[1], [0], [0], [1], [0, 0, 1, 1], [], []>} : vector<20x2560xbf16>, vector<2560x128xbf16>, vector<20x128xf32> -> vector<20x128xf32>
    %c0_3 = arith.constant 0 : index
    %c0_4 = arith.constant 0 : index
    %3 = vector.load %arg3[%c0_3, %c0_4] : memref<1x128xf32, #tpu.memory_space<vmem>>, vector<1x128xf32>
    %4 = vector.broadcast %3 : vector<1x128xf32> to vector<20x128xf32>
    %5 = arith.addf %2, %4 : vector<20x128xf32>
    %cst_5 = arith.constant 0.000000e+00 : f32
    %6 = vector.broadcast %cst_5 : f32 to vector<20x128xf32>
    %7 = arith.cmpf ogt, %5, %6 : vector<20x128xf32>
    %cst_6 = arith.constant 0.00999999977 : f32
    %8 = vector.broadcast %cst_6 : f32 to vector<20x128xf32>
    %9 = arith.mulf %8, %5 : vector<20x128xf32>
    %10 = arith.select %7, %5, %9 : vector<20x128xi1>, vector<20x128xf32>
    %11 = arith.truncf %10 : vector<20x128xf32> to vector<20x128xbf16>
    %c0_7 = arith.constant 0 : index
    %c0_8 = arith.constant 0 : index
    %12 = vector.load %arg4[%c0_7, %c0_8] : memref<128x256xbf16, #tpu.memory_space<vmem>>, vector<128x256xbf16>
    %cst_9 = arith.constant dense<0.000000e+00> : vector<20x256xf32>
    %13 = tpu.matmul %11, %12, %cst_9 {dimension_numbers = #tpu.dot_dimension_numbers<[1], [0], [0], [1], [0, 0, 1, 1], [], []>} : vector<20x128xbf16>, vector<128x256xbf16>, vector<20x256xf32> -> vector<20x256xf32>
    %c0_10 = arith.constant 0 : index
    %c0_11 = arith.constant 0 : index
    %14 = vector.load %arg5[%c0_10, %c0_11] : memref<1x256xf32, #tpu.memory_space<vmem>>, vector<1x256xf32>
    %15 = vector.broadcast %14 : vector<1x256xf32> to vector<20x256xf32>
    %16 = arith.addf %13, %15 : vector<20x256xf32>
    %17 = vector.extract_strided_slice %16 {offsets = [0, 0], sizes = [20, 128], strides = [1, 1]} : vector<20x256xf32> to vector<20x128xf32>
    %c0_12 = arith.constant 0 : index
    %c0_13 = arith.constant 0 : index
    %18 = vector.load %arg15[%c0_12, %c0_13] : memref<20x128xf32, #tpu.memory_space<vmem>>, vector<20x128xf32>
    tpu.vector_store %arg15[%c0_12, %c0_13], %17 {strides = array<i32>} : memref<20x128xf32, #tpu.memory_space<vmem>>, vector<20x128xf32>,
    %19 = vector.extract_strided_slice %16 {offsets = [0, 128], sizes = [20, 128], strides = [1, 1]} : vector<20x256xf32> to vector<20x128xf32>
    %c0_14 = arith.constant 0 : index
    %c0_15 = arith.constant 0 : index
    %20 = vector.load %arg16[%c0_14, %c0_15] : memref<20x128xf32, #tpu.memory_space<vmem>>, vector<20x128xf32>
    tpu.vector_store %arg16[%c0_14, %c0_15], %19 {strides = array<i32>} : memref<20x128xf32, #tpu.memory_space<vmem>>, vector<20x128xf32>,
    %21 = arith.truncf %17 : vector<20x128xf32> to vector<20x128xbf16>
    %c0_16 = arith.constant 0 : index
    %c0_17 = arith.constant 0 : index
    %22 = vector.load %arg6[%c0_16, %c0_17] : memref<128x128xbf16, #tpu.memory_space<vmem>>, vector<128x128xbf16>
    %cst_18 = arith.constant dense<0.000000e+00> : vector<20x128xf32>
    %23 = tpu.matmul %21, %22, %cst_18 {dimension_numbers = #tpu.dot_dimension_numbers<[1], [0], [0], [1], [0, 0, 1, 1], [], []>} : vector<20x128xbf16>, vector<128x128xbf16>, vector<20x128xf32> -> vector<20x128xf32>
    %c0_19 = arith.constant 0 : index
    %c0_20 = arith.constant 0 : index
    %24 = vector.load %arg7[%c0_19, %c0_20] : memref<1x128xf32, #tpu.memory_space<vmem>>, vector<1x128xf32>
    %25 = vector.broadcast %24 : vector<1x128xf32> to vector<20x128xf32>
    %26 = arith.addf %23, %25 : vector<20x128xf32>
    %cst_21 = arith.constant 0.000000e+00 : f32
    %27 = vector.broadcast %cst_21 : f32 to vector<20x128xf32>
    %28 = arith.cmpf ogt, %26, %27 : vector<20x128xf32>
    %cst_22 = arith.constant 0.00999999977 : f32
    %29 = vector.broadcast %cst_22 : f32 to vector<20x128xf32>
    %30 = arith.mulf %29, %26 : vector<20x128xf32>
    %31 = arith.select %28, %26, %30 : vector<20x128xi1>, vector<20x128xf32>
    %c0_23 = arith.constant 0 : index
    %c0_24 = arith.constant 0 : index
    %32 = vector.load %arg8[%c0_23, %c0_24] : memref<128x256xbf16, #tpu.memory_space<vmem>>, vector<128x256xbf16>
    %cst_25 = arith.constant dense<0.000000e+00> : vector<20x256xf32>
    %33 = tpu.matmul %21, %32, %cst_25 {dimension_numbers = #tpu.dot_dimension_numbers<[1], [0], [0], [1], [0, 0, 1, 1], [], []>} : vector<20x128xbf16>, vector<128x256xbf16>, vector<20x256xf32> -> vector<20x256xf32>
    %c0_26 = arith.constant 0 : index
    %c0_27 = arith.constant 0 : index
    %34 = vector.load %arg9[%c0_26, %c0_27] : memref<1x256xf32, #tpu.memory_space<vmem>>, vector<1x256xf32>
    %35 = vector.broadcast %34 : vector<1x256xf32> to vector<20x256xf32>
    %36 = arith.addf %33, %35 : vector<20x256xf32>
    %cst_28 = arith.constant 0.000000e+00 : f32
    %37 = vector.broadcast %cst_28 : f32 to vector<20x256xf32>
    %38 = arith.maximumf %36, %37 : vector<20x256xf32>
    %39 = arith.truncf %38 : vector<20x256xf32> to vector<20x256xbf16>
    %c0_29 = arith.constant 0 : index
    %c0_30 = arith.constant 0 : index
    %40 = vector.load %arg10[%c0_29, %c0_30] : memref<256x256xbf16, #tpu.memory_space<vmem>>, vector<256x256xbf16>
    %cst_31 = arith.constant dense<0.000000e+00> : vector<20x256xf32>
    %41 = tpu.matmul %39, %40, %cst_31 {dimension_numbers = #tpu.dot_dimension_numbers<[1], [0], [0], [1], [0, 0, 1, 1], [], []>} : vector<20x256xbf16>, vector<256x256xbf16>, vector<20x256xf32> -> vector<20x256xf32>
    %c0_32 = arith.constant 0 : index
    %c0_33 = arith.constant 0 : index
    %42 = vector.load %arg11[%c0_32, %c0_33] : memref<1x256xf32, #tpu.memory_space<vmem>>, vector<1x256xf32>
    %43 = vector.broadcast %42 : vector<1x256xf32> to vector<20x256xf32>
    %44 = arith.addf %41, %43 : vector<20x256xf32>
    %45 = vector.extract_strided_slice %44 {offsets = [0, 0], sizes = [20, 128], strides = [1, 1]} : vector<20x256xf32> to vector<20x128xf32>
    %46 = vector.extract_strided_slice %44 {offsets = [0, 128], sizes = [20, 128], strides = [1, 1]} : vector<20x256xf32> to vector<20x128xf32>
    %cst_34 = arith.constant dense<0xFF800000> : vector<20xf32>
    %47 = vector.multi_reduction <maximumf>, %45, %cst_34 [1] : vector<20x128xf32> to vector<20xf32>
    %48 = vector.shape_cast %47 : vector<20xf32> to vector<20x1xf32>
    %49 = vector.broadcast %48 : vector<20x1xf32> to vector<20x128xf32>
    %50 = arith.subf %45, %49 : vector<20x128xf32>
    %51 = math.exp %50 : vector<20x128xf32>
    %cst_35 = arith.constant dense<0.000000e+00> : vector<20xf32>
    %52 = vector.multi_reduction <add>, %51, %cst_35 [1] : vector<20x128xf32> to vector<20xf32>
    %53 = vector.shape_cast %52 : vector<20xf32> to vector<20x1xf32>
    %54 = vector.broadcast %53 : vector<20x1xf32> to vector<20x128xf32>
    %55 = arith.divf %51, %54 : vector<20x128xf32>
    %c0_36 = arith.constant 0 : index
    %c0_37 = arith.constant 0 : index
    %56 = vector.load %arg17[%c0_36, %c0_37] : memref<20x128xf32, #tpu.memory_space<vmem>>, vector<20x128xf32>
    tpu.vector_store %arg17[%c0_36, %c0_37], %55 {strides = array<i32>} : memref<20x128xf32, #tpu.memory_space<vmem>>, vector<20x128xf32>,
    %cst_38 = arith.constant dense<0xFF800000> : vector<20xf32>
    %57 = vector.multi_reduction <maximumf>, %46, %cst_38 [1] : vector<20x128xf32> to vector<20xf32>
    %58 = vector.shape_cast %57 : vector<20xf32> to vector<20x1xf32>
    %59 = vector.broadcast %58 : vector<20x1xf32> to vector<20x128xf32>
    %60 = arith.subf %46, %59 : vector<20x128xf32>
    %61 = math.exp %60 : vector<20x128xf32>
    %cst_39 = arith.constant dense<0.000000e+00> : vector<20xf32>
    %62 = vector.multi_reduction <add>, %61, %cst_39 [1] : vector<20x128xf32> to vector<20xf32>
    %63 = vector.shape_cast %62 : vector<20xf32> to vector<20x1xf32>
    %64 = vector.broadcast %63 : vector<20x1xf32> to vector<20x128xf32>
    %65 = arith.divf %61, %64 : vector<20x128xf32>
    %c0_40 = arith.constant 0 : index
    %c0_41 = arith.constant 0 : index
    %66 = vector.load %arg18[%c0_40, %c0_41] : memref<20x128xf32, #tpu.memory_space<vmem>>, vector<20x128xf32>
    tpu.vector_store %arg18[%c0_40, %c0_41], %65 {strides = array<i32>} : memref<20x128xf32, #tpu.memory_space<vmem>>, vector<20x128xf32>,
    %67 = arith.truncf %31 : vector<20x128xf32> to vector<20x128xbf16>
    %c0_42 = arith.constant 0 : index
    %c0_43 = arith.constant 0 : index
    %68 = vector.load %arg12[%c0_42, %c0_43] : memref<128x2560xbf16, #tpu.memory_space<vmem>>, vector<128x2560xbf16>
    %cst_44 = arith.constant dense<0.000000e+00> : vector<20x2560xf32>
    %69 = tpu.matmul %67, %68, %cst_44 {dimension_numbers = #tpu.dot_dimension_numbers<[1], [0], [0], [1], [0, 0, 1, 1], [], []>} : vector<20x128xbf16>, vector<128x2560xbf16>, vector<20x2560xf32> -> vector<20x2560xf32>
    %c0_45 = arith.constant 0 : index
    %c0_46 = arith.constant 0 : index
    %70 = vector.load %arg13[%c0_45, %c0_46] : memref<1x2560xf32, #tpu.memory_space<vmem>>, vector<1x2560xf32>
    %71 = vector.broadcast %70 : vector<1x2560xf32> to vector<20x2560xf32>
    %72 = arith.addf %69, %71 : vector<20x2560xf32>
    %c0_47 = arith.constant 0 : index
    %c0_48 = arith.constant 0 : index
    %73 = vector.load %arg14[%c0_47, %c0_48] : memref<20x2560xf32, #tpu.memory_space<vmem>>, vector<20x2560xf32>
    tpu.vector_store %arg14[%c0_47, %c0_48], %72 {strides = array<i32>} : memref<20x2560xf32, #tpu.memory_space<vmem>>, vector<20x2560xf32>,
    return
  }
  func.func @transform_0(%arg0: i32) -> (i32, i32) {
    %c0_i32 = arith.constant 0 : i32
    %c0_i32_0 = arith.constant 0 : i32
    return %arg0, %c0_i32 : i32, i32
  }
  func.func @transform_1(%arg0: i32) -> (i32, i32) {
    %c0_i32 = arith.constant 0 : i32
    %c0_i32_0 = arith.constant 0 : i32
    %c0_i32_1 = arith.constant 0 : i32
    return %c0_i32, %c0_i32_0 : i32, i32
  }
  func.func @transform_2(%arg0: i32) -> (i32, i32) {
    %c0_i32 = arith.constant 0 : i32
    %c0_i32_0 = arith.constant 0 : i32
    %c0_i32_1 = arith.constant 0 : i32
    return %c0_i32, %c0_i32_0 : i32, i32
  }
  func.func @transform_3(%arg0: i32) -> (i32, i32) {
    %c0_i32 = arith.constant 0 : i32
    %c0_i32_0 = arith.constant 0 : i32
    %c0_i32_1 = arith.constant 0 : i32
    return %c0_i32, %c0_i32_0 : i32, i32
  }
  func.func @transform_4(%arg0: i32) -> (i32, i32) {
    %c0_i32 = arith.constant 0 : i32
    %c0_i32_0 = arith.constant 0 : i32
    %c0_i32_1 = arith.constant 0 : i32
    return %c0_i32, %c0_i32_0 : i32, i32
  }
  func.func @transform_5(%arg0: i32) -> (i32, i32) {
    %c0_i32 = arith.constant 0 : i32
    %c0_i32_0 = arith.constant 0 : i32
    %c0_i32_1 = arith.constant 0 : i32
    return %c0_i32, %c0_i32_0 : i32, i32
  }
  func.func @transform_6(%arg0: i32) -> (i32, i32) {
    %c0_i32 = arith.constant 0 : i32
    %c0_i32_0 = arith.constant 0 : i32
    %c0_i32_1 = arith.constant 0 : i32
    return %c0_i32, %c0_i32_0 : i32, i32
  }
  func.func @transform_7(%arg0: i32) -> (i32, i32) {
    %c0_i32 = arith.constant 0 : i32
    %c0_i32_0 = arith.constant 0 : i32
    %c0_i32_1 = arith.constant 0 : i32
    return %c0_i32, %c0_i32_0 : i32, i32
  }
  func.func @transform_8(%arg0: i32) -> (i32, i32) {
    %c0_i32 = arith.constant 0 : i32
    %c0_i32_0 = arith.constant 0 : i32
    %c0_i32_1 = arith.constant 0 : i32
    return %c0_i32, %c0_i32_0 : i32, i32
  }
  func.func @transform_9(%arg0: i32) -> (i32, i32) {
    %c0_i32 = arith.constant 0 : i32
    %c0_i32_0 = arith.constant 0 : i32
    %c0_i32_1 = arith.constant 0 : i32
    return %c0_i32, %c0_i32_0 : i32, i32
  }
  func.func @transform_10(%arg0: i32) -> (i32, i32) {
    %c0_i32 = arith.constant 0 : i32
    %c0_i32_0 = arith.constant 0 : i32
    %c0_i32_1 = arith.constant 0 : i32
    return %c0_i32, %c0_i32_0 : i32, i32
  }
  func.func @transform_11(%arg0: i32) -> (i32, i32) {
    %c0_i32 = arith.constant 0 : i32
    %c0_i32_0 = arith.constant 0 : i32
    %c0_i32_1 = arith.constant 0 : i32
    return %c0_i32, %c0_i32_0 : i32, i32
  }
  func.func @transform_12(%arg0: i32) -> (i32, i32) {
    %c0_i32 = arith.constant 0 : i32
    %c0_i32_0 = arith.constant 0 : i32
    %c0_i32_1 = arith.constant 0 : i32
    return %c0_i32, %c0_i32_0 : i32, i32
  }
  func.func @transform_13(%arg0: i32) -> (i32, i32) {
    %c0_i32 = arith.constant 0 : i32
    %c0_i32_0 = arith.constant 0 : i32
    return %arg0, %c0_i32 : i32, i32
  }
  func.func @transform_14(%arg0: i32) -> (i32, i32) {
    %c0_i32 = arith.constant 0 : i32
    %c0_i32_0 = arith.constant 0 : i32
    return %arg0, %c0_i32 : i32, i32
  }
  func.func @transform_15(%arg0: i32) -> (i32, i32) {
    %c0_i32 = arith.constant 0 : i32
    %c0_i32_0 = arith.constant 0 : i32
    return %arg0, %c0_i32 : i32, i32
  }
  func.func @transform_16(%arg0: i32) -> (i32, i32) {
    %c0_i32 = arith.constant 0 : i32
    %c0_i32_0 = arith.constant 0 : i32
    return %arg0, %c0_i32 : i32, i32
  }
  func.func @transform_17(%arg0: i32) -> (i32, i32) {
    %c0_i32 = arith.constant 0 : i32
    %c0_i32_0 = arith.constant 0 : i32
    return %arg0, %c0_i32 : i32, i32
  }
}

</mosaic_0001>

<bundles_post_ra>
// kernel: fwd.1
= control target key start
LH: loop header
LB: loop body
LE: loop exit
PB: predicated region body
PF: predicated region fallthrough
CT: control target
= control target key end

     0   :  { %s6563_s0 = inlined_call_operand.vmem [shape: bf16[20,2560], index: 0, kind: input, shape index: {}]   ;;  %s6564_s1 = inlined_call_operand.hbm [shape: bf16[2560,128], index: 1, kind: input, shape index: {}]   ;;  %s6565_s2 = inlined_call_operand.vmem [shape: f32[1,128], index: 2, kind: input, shape index: {}]   ;;  %s6566_s3 = inlined_call_operand.vmem [shape: bf16[128,256], index: 3, kind: input, shape index: {}]   ;;  %s6567_s4 = inlined_call_operand.vmem [shape: f32[1,256], index: 4, kind: input, shape index: {}]   ;;  %s6568_s5 = inlined_call_operand.vmem [shape: bf16[128,128], index: 5, kind: input, shape index: {}]   ;;  %s6569_s6 = inlined_call_operand.vmem [shape: f32[1,128], index: 6, kind: input, shape index: {}]   ;;  %s6570_s7 = inlined_call_operand.vmem [shape: bf16[128,256], index: 7, kind: input, shape index: {}]   ;;  %s6571_s8 = inlined_call_operand.vmem [shape: f32[1,256], index: 8, kind: input, shape index: {}]   ;;  %s6572_s9 = inlined_call_operand.vmem [shape: bf16[256,256], index: 9, kind: input, shape index: {}]   ;;  %s6573_s10 = inlined_call_operand.vmem [shape: f32[1,256], index: 10, kind: input, shape index: {}]   ;;  %s6574_s11 = inlined_call_operand.hbm [shape: bf16[128,2560], index: 11, kind: input, shape index: {}]   ;;  %s6575_s12 = inlined_call_operand.vmem [shape: f32[1,2560], index: 12, kind: input, shape index: {}]   ;;  %s6576_s13 = inlined_call_operand.hbm [shape: f32[20,2560], index: 13, kind: output, shape index: {0}]   ;;  %s6577_s14 = inlined_call_operand.vmem [shape: f32[20,128], index: 14, kind: output, shape index: {1}]   ;;  %s6578_s15 = inlined_call_operand.vmem [shape: f32[20,128], index: 15, kind: output, shape index: {2}]   ;;  %s6579_s16 = inlined_call_operand.vmem [shape: f32[20,128], index: 16, kind: output, shape index: {3}]   ;;  %s6580_s17 = inlined_call_operand.vmem [shape: f32[20,128], index: 17, kind: output, shape index: {4}]  }
   0x1   :  { %6582 = sst [smem:[#allocation11_spill]] %s6563_s0 }
   0x2   :  { %6583 = sst [smem:[#allocation12_spill]] %s6564_s1 }
   0x3   :  { %23 = vsyncpa [#allocation3], 0 }
   0x4   :  { %24 = vsyncpa [#allocation6], 0 }
   0x5   :  { %25 = vsyncpa [#allocation4], 0  ;;  %s5927_s24 = smov [#allocation2]  }
   0x6   :  { %s33_s25 = sshll.u32 %s5927_s24, 4  ;;  %s34_s25 = int_to_ptr.vmem [resolvable:$true] %s33_s25 }
   0x7   :  { %s5869_s26 = scalar_lea.vmem %s34_s25, 20480  ;;  %p5874_p1 = scmp.lt.s32.totalorder %s34_s25, %s34_s25 }
   0x8   :  { %p5870_p0 = scmp.ne.s32.totalorder %s34_s25, %s5869_s26  ;;  %p5875_p2 = scmp.lt.s32.totalorder %s5869_s26, %s5869_s26 }
   0xa   :  { %p5876_p3 = por %p5875_p2, %p5874_p1 }
   0xc   :  { %p5877_p4 = pnand %p5876_p3, %p5870_p0 }
   0xe   :  { %5880 = shalt.err (!%p5877_p4)
}
   0xf   :  { %s5928_s27 = smov 64   ;;  %s5929_s28 = smov 4  }
  0x10   :  { %s6584_s30 = sld [smem:[#allocation12_spill]]  ;;  %s5930_s18 = smov [#allocation5]  }
  0x11   :  { %s63_s19 = sshll.u32 %s5930_s18, 4  ;;  %s64_s19 = int_to_ptr.vmem [resolvable:$true] %s63_s19 }
  0x12   :  { %s5889_s1 = scalar_lea.vmem %s64_s19, 20480  ;;  %p5894_p6 = scmp.lt.s32.totalorder %s64_s19, %s64_s19 }
  0x13   :  { %p5890_p5 = scmp.ne.s32.totalorder %s64_s19, %s5889_s1  ;;  %p5895_p7 = scmp.lt.s32.totalorder %s5889_s1, %s5889_s1 }
  0x15   :  { %p5896_p8 = por %p5895_p7, %p5894_p6 }
  0x16   :  { %39 = dma.hbm_to_vmem [thread:$0]  %s6584_s30, 20480, %s34_s25, [#allocation3], %s5928_s27, %s5928_s27, %s5929_s28  }
  0x17   :  { %p5897_p9 = pnand %p5896_p8, %p5890_p5 }
  0x19   :  { %5900 = shalt.err (!%p5897_p9)
}
  0x1a   :  { %s5931_s20 = smov 1280   ;;  %s5932_s21 = smov 80  }
  0x1b   :  { %69 = dma.hbm_to_vmem [thread:$0]  %s6574_s11, 20480, %s64_s19, [#allocation6], %s5931_s20, %s5931_s20, %s5932_s21  }
  0x1c   :  { %5921 = dma.done.wait [#allocation3], 20480  }
  0x1d   :  { %5922 = vsyncadd [#allocation3], 4294946816 }
  0x1e   :  { %5923 = dma.done.wait [#allocation6], 20480  }
  0x1f   :  { %5924 = vsyncadd [#allocation6], 4294946816  ;;  %v5283_v0 = vld [vmem:[#allocation2 + $0x78] sm:$0xff]   ;;  %v5287_v4 = vld [vmem:[#allocation2 + $0x70] sm:$0xff]   ;;  %s6585_s25 = sld [smem:[#allocation11_spill]]  ;;  %vm2780_vm6 = vcmask 1043456  }
  0x20   :  { %v5284_v1 = vld [vmem:[#allocation2 + $0xf8] sm:$0xff]   ;;  %4947 = vmatprep.subr.bf16.mxu0 %v5283_v0  ;;  %v5288_v5 = vld [vmem:[#allocation2 + $0xf0] sm:$0xff]   ;;  %v5291_v8 = vld [vmem:[#allocation2 + $0x68] sm:$0xff]  }
  0x21   :  { %v5285_v2 = vld [vmem:[#allocation2 + $0x38] sm:$0xff]   ;;  %4975 = vmatprep.subr.bf16.mxu1 %v5284_v1  ;;  %v5289_v6 = vld [vmem:[#allocation2 + $0x30] sm:$0xff]   ;;  %v5292_v9 = vld [vmem:[#allocation2 + $0xe8] sm:$0xff]  }
  0x22   :  { %v5286_v3 = vld [vmem:[#allocation2 + $0xb8] sm:$0xff]   ;;  %4948 = vmatpush3.bf16.msra.mxu0 %v5285_v2  ;;  %v5290_v7 = vld [vmem:[#allocation2 + $0xb0] sm:$0xff]   ;;  %v5293_v10 = vld [vmem:[#allocation2 + $0x28] sm:$0xff]  }
  0x23   :  { %4976 = vmatpush3.bf16.msra.mxu1 %v5286_v3  ;;  %4949 = vmatprep.subr.bf16.mxu0 %v5287_v4  ;;  %v5294_v11 = vld [vmem:[#allocation2 + $0xa8] sm:$0xff]   ;;  %v5295_v12 = vld [vmem:[#allocation2 + $0x60] sm:$0xff]   ;;  %v5299_v16 = vld [vmem:[#allocation2 + $0x58] sm:$0xff]  }
  0x24   :  { %4977 = vmatprep.subr.bf16.mxu1 %v5288_v5  ;;  %v5296_v13 = vld [vmem:[#allocation2 + $0xe0] sm:$0xff]   ;;  %v5300_v17 = vld [vmem:[#allocation2 + $0xd8] sm:$0xff]   ;;  %v5303_v20 = vld [vmem:[#allocation2 + $0x50] sm:$0xff]  }
  0x25   :  { %v5297_v14 = vld [vmem:[#allocation2 + $0x20] sm:$0xff]   ;;  %v5301_v18 = vld [vmem:[#allocation2 + $0x18] sm:$0xff]   ;;  %v5304_v21 = vld [vmem:[#allocation2 + $0xd0] sm:$0xff]  }
  0x26   :  { %4950 = vmatpush3.bf16.msra.mxu0 %v5289_v6  ;;  %v5298_v15 = vld [vmem:[#allocation2 + $0xa0] sm:$0xff]   ;;  %v5302_v19 = vld [vmem:[#allocation2 + $0x98] sm:$0xff]   ;;  %v5305_v22 = vld [vmem:[#allocation2 + $0x10] sm:$0xff]  }
  0x27   :  { %4978 = vmatpush3.bf16.msra.mxu1 %v5290_v7  ;;  %4951 = vmatprep.subr.bf16.mxu0 %v5291_v8  ;;  %v5306_v23 = vld [vmem:[#allocation2 + $0x90] sm:$0xff]   ;;  %v5307_v24 = vld [vmem:[#allocation2 + $0x48] sm:$0xff]   ;;  %v5311_v28 = vld [vmem:[#allocation2 + $0x40] sm:$0xff]  }
  0x28   :  { %4979 = vmatprep.subr.bf16.mxu1 %v5292_v9  ;;  %v5308_v25 = vld [vmem:[#allocation2 + $0xc8] sm:$0xff]   ;;  %v5312_v29 = vld [vmem:[#allocation2 + $0xc0] sm:$0xff]   ;;  %v5321_v36 = vld [vmem:[#allocation2 + $0x178] sm:$0xff]  }
  0x29   :  { %v5309_v26 = vld [vmem:[#allocation2 + $0x8] sm:$0xff]   ;;  %v5313_v30 = vld [vmem:[#allocation2] sm:$0xff]   ;;  %v5322_v37 = vld [vmem:[#allocation2 + $0x1f8] sm:$0xff]  }
  0x2a   :  { %4952 = vmatpush3.bf16.msra.mxu0 %v5293_v10  ;;  %v5310_v27 = vld [vmem:[#allocation2 + $0x88] sm:$0xff]   ;;  %v5314_v31 = vld [vmem:[#allocation2 + $0x80] sm:$0xff]   ;;  %v5323_v38 = vld [vmem:[#allocation2 + $0x138] sm:$0xff]  }
  0x2b   :  { %4980 = vmatpush3.bf16.msra.mxu1 %v5294_v11  ;;  %4953 = vmatprep.subr.bf16.mxu0 %v5295_v12  ;;  %v5315_v32 = vld [vmem:[%s6585_s25] ss:$80 sps:$4 sm:$0xff]   ;;  %v5317_v33 = vld [vmem:[%s6585_s25 + $0x4] ss:$80 sps:$4 sm:$0xff]   ;;  %v5318_v34 = vld [vmem:[%s6585_s25 + $0x8] ss:$80 sps:$4 sm:$0xff]  }
  0x2c   :  { %4981 = vmatprep.subr.bf16.mxu1 %v5296_v13  ;;  %v5320_v35 = vld [vmem:[%s6585_s25 + $0xc] ss:$80 sps:$4 sm:$0xff]   ;;  %1598 = vmatprep.mubr.bf16.mxu0 %v5317_v33  ;;  %v5325_v40 = vld [vmem:[#allocation2 + $0x170] sm:$0xff]   ;;  %v5333_v48 = vld [vmem:[#allocation2 + $0x160] sm:$0xff]  }
  0x2d   :  { %1646 = vmatprep.mubr.bf16.mxu1 %v5320_v35  ;;  %v5324_v39 = vld [vmem:[#allocation2 + $0x1b8] sm:$0xff]   ;;  %v5326_v41 = vld [vmem:[#allocation2 + $0x1f0] sm:$0xff]   ;;  %v5329_v44 = vld [vmem:[#allocation2 + $0x168] sm:$0xff]  }
  0x2e   :  { %4954 = vmatpush3.bf16.msra.mxu0 %v5297_v14  ;;  %v5327_v42 = vld [vmem:[#allocation2 + $0x130] sm:$0xff]   ;;  %v5330_v45 = vld [vmem:[#allocation2 + $0x1e8] sm:$0xff]   ;;  %v5334_v49 = vld [vmem:[#allocation2 + $0x1e0] sm:$0xff]  }
  0x2f   :  { %4982 = vmatpush3.bf16.msra.mxu1 %v5298_v15  ;;  %4955 = vmatprep.subr.bf16.mxu0 %v5299_v16  ;;  %v5328_v43 = vld [vmem:[#allocation2 + $0x1b0] sm:$0xff]   ;;  %v5331_v46 = vld [vmem:[#allocation2 + $0x128] sm:$0xff]   ;;  %v5335_v50 = vld [vmem:[#allocation2 + $0x120] sm:$0xff]  }
  0x30   :  { %4983 = vmatprep.subr.bf16.mxu1 %v5300_v17  ;;  %v5332_v47 = vld [vmem:[#allocation2 + $0x1a8] sm:$0xff]   ;;  %v5336_v51 = vld [vmem:[#allocation2 + $0x1a0] sm:$0xff]   ;;  %v5337_v52 = vld [vmem:[#allocation2 + $0x158] sm:$0xff]  }
  0x31   :  { %v5338_v53 = vld [vmem:[#allocation2 + $0x1d8] sm:$0xff]   ;;  %v99_v56 = vld [vmem:[%s6585_s25 + $0xa0] sm:$0x33]  ;;  %v100_v59 = vld [vmem:[%s6585_s25 + $0xa8] sm:$0x33] }
  0x32   :  { %4956 = vmatpush3.bf16.msra.mxu0 %v5301_v18  ;;  %v5339_v54 = vld [vmem:[#allocation2 + $0x118] sm:$0xff]   ;;  %v4535_v57 = vcombine.high %v99_v56, %v99_v56  ;;  %v4534_v58 = vcombine.low %v99_v56, %v99_v56  ;;  %v4537_v60 = vcombine.high %v100_v59, %v100_v59  ;;  %v5344_v61 = vld [vmem:[#allocation2 + $0x150] sm:$0xff]   ;;  %v4536_v62 = vcombine.low %v100_v59, %v100_v59  ;;  %v5349_v2 = vld [vmem:[#allocation2 + $0x148] sm:$0xff]  }
  0x33   :  { %4984 = vmatpush3.bf16.msra.mxu1 %v5302_v19  ;;  %4957 = vmatprep.subr.bf16.mxu0 %v5303_v20  ;;  %v5340_v55 = vld [vmem:[#allocation2 + $0x198] sm:$0xff]   ;;  %v5345_v63 = vld [vmem:[#allocation2 + $0x1d0] sm:$0xff]   ;;  %v5350_v3 = vld [vmem:[#allocation2 + $0x1c8] sm:$0xff]  }
  0x34   :  { %4985 = vmatprep.subr.bf16.mxu1 %v5304_v21  ;;  %v5347_v0 = vld [vmem:[#allocation2 + $0x110] sm:$0xff]   ;;  %v5351_v4 = vld [vmem:[#allocation2 + $0x108] sm:$0xff]   ;;  %v5353_v6 = vld [vmem:[#allocation2 + $0x140] sm:$0xff]  }
  0x35   :  { %v5348_v1 = vld [vmem:[#allocation2 + $0x190] sm:$0xff]   ;;  %v5352_v5 = vld [vmem:[#allocation2 + $0x188] sm:$0xff]   ;;  %v5354_v7 = vld [vmem:[#allocation2 + $0x1c0] sm:$0xff]  }
  0x36   :  { %4958 = vmatpush3.bf16.msra.mxu0 %v5305_v22  ;;  %v5355_v8 = vld [vmem:[#allocation2 + $0x100] sm:$0xff]   ;;  %v5360_v12 = vld [vmem:[%s6585_s25 + $0x18] ss:$80 sps:$4 sm:$0xff]   ;;  %v5362_v13 = vld [vmem:[%s6585_s25 + $0x1c] ss:$80 sps:$4 sm:$0xff]  }
  0x37   :  { %4986 = vmatpush3.bf16.msra.mxu1 %v5306_v23  ;;  %4959 = vmatprep.subr.bf16.mxu0 %v5307_v24  ;;  %v5356_v9 = vld [vmem:[#allocation2 + $0x180] sm:$0xff]   ;;  %v5363_v14 = vld [vmem:[#allocation2 + $0x278] sm:$0xff]   ;;  %v5367_v18 = vld [vmem:[#allocation2 + $0x270] sm:$0xff]  }
  0x38   :  { %4987 = vmatprep.subr.bf16.mxu1 %v5308_v25  ;;  %v5357_v10 = vld [vmem:[%s6585_s25 + $0x10] ss:$80 sps:$4 sm:$0xff]   ;;  %v5359_v11 = vld [vmem:[%s6585_s25 + $0x14] ss:$80 sps:$4 sm:$0xff]   ;;  %v5364_v15 = vld [vmem:[#allocation2 + $0x2f8] sm:$0xff]  }
  0x39   :  { %v5365_v16 = vld [vmem:[#allocation2 + $0x238] sm:$0xff]   ;;  %v5368_v19 = vld [vmem:[#allocation2 + $0x2f0] sm:$0xff]   ;;  %v5373_v25 = vld [vmem:[#allocation2 + $0x268] sm:$0xff]  }
  0x3a   :  { %4960 = vmatpush3.bf16.msra.mxu0 %v5309_v26  ;;  %v5366_v17 = vld [vmem:[#allocation2 + $0x2b8] sm:$0xff]   ;;  %v5369_v20 = vld [vmem:[#allocation2 + $0x230] sm:$0xff]   ;;  %v5374_v26 = vld [vmem:[#allocation2 + $0x2e8] sm:$0xff]  }
  0x3b   :  { %4988 = vmatpush3.bf16.msra.mxu1 %v5310_v27  ;;  %4961 = vmatprep.subr.bf16.mxu0 %v5311_v28  ;;  %v5370_v21 = vld [vmem:[#allocation2 + $0x2b0] sm:$0xff]   ;;  %v102_v27 = vld [vmem:[%s6585_s25 + $0xb8] sm:$0x33]  ;;  %v5380_v33 = vld [vmem:[#allocation2 + $0x2e0] sm:$0xff]  }
  0x3c   :  { %4989 = vmatprep.subr.bf16.mxu1 %v5312_v29  ;;  %v101_v22 = vld [vmem:[%s6585_s25 + $0xb0] sm:$0x33]  ;;  %v4541_v28 = vcombine.high %v102_v27, %v102_v27  ;;  %v5376_v29 = vld [vmem:[#allocation2 + $0x228] sm:$0xff]   ;;  %v5382_v35 = vld [vmem:[#allocation2 + $0x2a0] sm:$0xff]  }
  0x3d   :  { %v4539_v23 = vcombine.high %v101_v22, %v101_v22  ;;  %v4538_v24 = vcombine.low %v101_v22, %v101_v22  ;;  %v5405_v56 = vld [vmem:[#allocation2 + $0x378] sm:$0xff]   ;;  %v5433_v22 = vld [vmem:[#allocation2 + $0x348] sm:$0xff]  }
  0x3e   :  { %4962 = vmatpush3.bf16.msra.mxu0 %v5313_v30  ;;  %v4540_v30 = vcombine.low %v102_v27, %v102_v27  ;;  %v5408_v59 = vld [vmem:[#allocation2 + $0x3b8] sm:$0xff]   ;;  %v5438_v27 = vld [vmem:[#allocation2 + $0x3c0] sm:$0xff]  }
  0x3f   :  { %4990 = vmatpush3.bf16.msra.mxu1 %v5314_v31  ;;  %5003 = vmatprep.subr.bf16.mxu0 %v5321_v36  ;;  %v5377_v31 = vld [vmem:[#allocation2 + $0x2a8] sm:$0xff]   ;;  %v5383_v36 = vld [vmem:[#allocation2 + $0x258] sm:$0xff]  }
  0x40   :  { %5031 = vmatprep.subr.bf16.mxu1 %v5322_v37  ;;  %v5384_v37 = vld [vmem:[#allocation2 + $0x2d8] sm:$0xff]  }
  0x41   :  { %1599 = vmatmul.mubr.bf16.vlgmr.msra.gmra.mxu0 %v5315_v32  ;;  %v5379_v32 = vld [vmem:[#allocation2 + $0x260] sm:$0xff]  }
  0x42   :  { %1647 = vmatmul.mubr.bf16.vlgmr.msra.gmra.mxu1 %v5318_v34  ;;  %5004 = vmatpush3.bf16.msra.mxu0 %v5323_v38  ;;  %v5381_v34 = vld [vmem:[#allocation2 + $0x220] sm:$0xff]   ;;  %v5385_v38 = vld [vmem:[#allocation2 + $0x218] sm:$0xff]  }
  0x43   :  { %5032 = vmatpush3.bf16.msra.mxu1 %v5324_v39  ;;  %5005 = vmatprep.subr.bf16.mxu0 %v5325_v40  ;;  %v5386_v39 = vld [vmem:[#allocation2 + $0x298] sm:$0xff]   ;;  %v5387_v40 = vld [vmem:[#allocation2 + $0x250] sm:$0xff]  }
  0x44   :  { %5033 = vmatprep.subr.bf16.mxu1 %v5326_v41  ;;  %1606 = vmatprep.mubr.bf16.mxu0 %v4535_v57  ;;  %v5388_v41 = vld [vmem:[#allocation2 + $0x2d0] sm:$0xff]   ;;  %v5406_v57 = vld [vmem:[#allocation2 + $0x3f8] sm:$0xff]  }
  0x45   :  { %1654 = vmatprep.mubr.bf16.mxu1 %v4537_v60  ;;  %v5409_v60 = vld [vmem:[#allocation2 + $0x370] sm:$0xff]  }
  0x46   :  { %5006 = vmatpush3.bf16.msra.mxu0 %v5327_v42  ;;  %v5389_v42 = vld [vmem:[#allocation2 + $0x210] sm:$0xff]  }
  0x47   :  { %5034 = vmatpush3.bf16.msra.mxu1 %v5328_v43  ;;  %5007 = vmatprep.subr.bf16.mxu0 %v5329_v44  ;;  %v5390_v43 = vld [vmem:[#allocation2 + $0x290] sm:$0xff]   ;;  %v5391_v44 = vld [vmem:[#allocation2 + $0x248] sm:$0xff]  }
  0x48   :  { %5035 = vmatprep.subr.bf16.mxu1 %v5330_v45  ;;  %v5392_v45 = vld [vmem:[#allocation2 + $0x2c8] sm:$0xff]  }
  0x49   :  { %1607 = vmatmul.mubr.bf16.gmra.mxu0 %v4534_v58  ;;  %v5407_v58 = vld [vmem:[#allocation2 + $0x338] sm:$0xff]  }
  0x4a   :  { %5008 = vmatpush3.bf16.msra.mxu0 %v5331_v46  ;;  %1655 = vmatmul.mubr.bf16.gmra.mxu1 %v4536_v62  ;;  %v5393_v46 = vld [vmem:[#allocation2 + $0x208] sm:$0xff]   ;;  %v5411_v62 = vld [vmem:[#allocation2 + $0x330] sm:$0xff]  }
  0x4b   :  { %5036 = vmatpush3.bf16.msra.mxu1 %v5332_v47  ;;  %5009 = vmatprep.subr.bf16.mxu0 %v5333_v48  ;;  %v5394_v47 = vld [vmem:[#allocation2 + $0x288] sm:$0xff]   ;;  %v5395_v48 = vld [vmem:[#allocation2 + $0x240] sm:$0xff]  }
  0x4c   :  { %5037 = vmatprep.subr.bf16.mxu1 %v5334_v49  ;;  %1694 = vmatprep.mubr.bf16.mxu0 %v5359_v11  ;;  %v5396_v49 = vld [vmem:[#allocation2 + $0x2c0] sm:$0xff]  }
  0x4d   :  { %1742 = vmatprep.mubr.bf16.mxu1 %v5362_v13  ;;  %v5422_v11 = vld [vmem:[#allocation2 + $0x3e0] sm:$0xff]  }
  0x4e   :  { %5010 = vmatpush3.bf16.msra.mxu0 %v5335_v50  ;;  %v5397_v50 = vld [vmem:[#allocation2 + $0x200] sm:$0xff]  }
  0x4f   :  { %5038 = vmatpush3.bf16.msra.mxu1 %v5336_v51  ;;  %5011 = vmatprep.subr.bf16.mxu0 %v5337_v52  ;;  %v5398_v51 = vld [vmem:[#allocation2 + $0x280] sm:$0xff]  }
  0x50   :  { %5039 = vmatprep.subr.bf16.mxu1 %v5338_v53  ;;  %v5399_v52 = vld [vmem:[%s6585_s25 + $0x20] ss:$80 sps:$4 sm:$0xff]   ;;  %v5401_v53 = vld [vmem:[%s6585_s25 + $0x24] ss:$80 sps:$4 sm:$0xff]  }
  0x51   :  { %v5424_v13 = vld [vmem:[#allocation2 + $0x3a0] sm:$0xff]  }
  0x52   :  { %5012 = vmatpush3.bf16.msra.mxu0 %v5339_v54  ;;  %v5402_v54 = vld [vmem:[%s6585_s25 + $0x28] ss:$80 sps:$4 sm:$0xff]  }
  0x53   :  { %5040 = vmatpush3.bf16.msra.mxu1 %v5340_v55  ;;  %5013 = vmatprep.subr.bf16.mxu0 %v5344_v61  ;;  %v5404_v55 = vld [vmem:[%s6585_s25 + $0x2c] ss:$80 sps:$4 sm:$0xff]   ;;  %v5410_v61 = vld [vmem:[#allocation2 + $0x3f0] sm:$0xff]  }
  0x54   :  { %5041 = vmatprep.subr.bf16.mxu1 %v5345_v63  ;;  %v5412_v63 = vld [vmem:[#allocation2 + $0x3b0] sm:$0xff]  }
  0x56   :  { %5014 = vmatpush3.bf16.msra.mxu0 %v5347_v0  ;;  %v103_v0 = vld [vmem:[%s6585_s25 + $0xc0] sm:$0x33] }
  0x57   :  { %5042 = vmatpush3.bf16.msra.mxu1 %v5348_v1  ;;  %5015 = vmatprep.subr.bf16.mxu0 %v5349_v2  ;;  %v4543_v1 = vcombine.high %v103_v0, %v103_v0  ;;  %v4542_v2 = vcombine.low %v103_v0, %v103_v0  ;;  %v5475_v0 = vld [vmem:[#allocation2 + $0x448] sm:$0xff]  }
  0x58   :  { %5043 = vmatprep.subr.bf16.mxu1 %v5350_v3  ;;  %v5415_v3 = vld [vmem:[#allocation2 + $0x368] sm:$0xff]  }
  0x5a   :  { %5016 = vmatpush3.bf16.msra.mxu0 %v5351_v4  ;;  %v5416_v4 = vld [vmem:[#allocation2 + $0x3e8] sm:$0xff]  }
  0x5b   :  { %5044 = vmatpush3.bf16.msra.mxu1 %v5352_v5  ;;  %5017 = vmatprep.subr.bf16.mxu0 %v5353_v6  ;;  %v104_v5 = vld [vmem:[%s6585_s25 + $0xc8] sm:$0x33] }
  0x5c   :  { %5045 = vmatprep.subr.bf16.mxu1 %v5354_v7  ;;  %v4545_v6 = vcombine.high %v104_v5, %v104_v5  ;;  %v5418_v7 = vld [vmem:[#allocation2 + $0x328] sm:$0xff]  }
  0x5e   :  { %5018 = vmatpush3.bf16.msra.mxu0 %v5355_v8  ;;  %v4544_v8 = vcombine.low %v104_v5, %v104_v5  ;;  %v5480_v5 = vld [vmem:[#allocation2 + $0x4c0] sm:$0xff]  }
  0x5f   :  { %5046 = vmatpush3.bf16.msra.mxu1 %v5356_v9  ;;  %5059 = vmatprep.subr.bf16.mxu0 %v5363_v14  ;;  %v5419_v9 = vld [vmem:[#allocation2 + $0x3a8] sm:$0xff]   ;;  %v5425_v14 = vld [vmem:[#allocation2 + $0x358] sm:$0xff]  }
  0x60   :  { %5087 = vmatprep.subr.bf16.mxu1 %v5364_v15  ;;  %v5426_v15 = vld [vmem:[#allocation2 + $0x3d8] sm:$0xff]  }
  0x61   :  { %1695 = vmatmul.mubr.bf16.vlgmr.msra.gmra.mxu0 %v5357_v10  ;;  %v5421_v10 = vld [vmem:[#allocation2 + $0x360] sm:$0xff]  }
  0x62   :  { %1743 = vmatmul.mubr.bf16.vlgmr.msra.gmra.mxu1 %v5360_v12  ;;  %5060 = vmatpush3.bf16.msra.mxu0 %v5365_v16  ;;  %v5423_v12 = vld [vmem:[#allocation2 + $0x320] sm:$0xff]   ;;  %v5427_v16 = vld [vmem:[#allocation2 + $0x318] sm:$0xff]  }
  0x63   :  { %5088 = vmatpush3.bf16.msra.mxu1 %v5366_v17  ;;  %5061 = vmatprep.subr.bf16.mxu0 %v5367_v18  ;;  %v5428_v17 = vld [vmem:[#allocation2 + $0x398] sm:$0xff]   ;;  %v5429_v18 = vld [vmem:[#allocation2 + $0x350] sm:$0xff]  }
  0x64   :  { %5089 = vmatprep.subr.bf16.mxu1 %v5368_v19  ;;  %1702 = vmatprep.mubr.bf16.mxu0 %v4539_v23  ;;  %v5430_v19 = vld [vmem:[#allocation2 + $0x3d0] sm:$0xff]   ;;  %v5434_v23 = vld [vmem:[#allocation2 + $0x3c8] sm:$0xff]  }
  0x65   :  { %1750 = vmatprep.mubr.bf16.mxu1 %v4541_v28  ;;  %v5439_v28 = vld [vmem:[#allocation2 + $0x300] sm:$0xff]  }
  0x66   :  { %5062 = vmatpush3.bf16.msra.mxu0 %v5369_v20  ;;  %v5431_v20 = vld [vmem:[#allocation2 + $0x310] sm:$0xff]  }
  0x67   :  { %5090 = vmatpush3.bf16.msra.mxu1 %v5370_v21  ;;  %5063 = vmatprep.subr.bf16.mxu0 %v5373_v25  ;;  %v5432_v21 = vld [vmem:[#allocation2 + $0x390] sm:$0xff]   ;;  %v5436_v25 = vld [vmem:[#allocation2 + $0x388] sm:$0xff]  }
  0x68   :  { %5091 = vmatprep.subr.bf16.mxu1 %v5374_v26  ;;  %v5437_v26 = vld [vmem:[#allocation2 + $0x340] sm:$0xff]  }
  0x69   :  { %1703 = vmatmul.mubr.bf16.gmra.mxu0 %v4538_v24  ;;  %v5435_v24 = vld [vmem:[#allocation2 + $0x308] sm:$0xff]  }
  0x6a   :  { %5064 = vmatpush3.bf16.msra.mxu0 %v5376_v29  ;;  %1751 = vmatmul.mubr.bf16.gmra.mxu1 %v4540_v30  ;;  %v5440_v29 = vld [vmem:[#allocation2 + $0x380] sm:$0xff]  }
  0x6b   :  { %5092 = vmatpush3.bf16.msra.mxu1 %v5377_v31  ;;  %5065 = vmatprep.subr.bf16.mxu0 %v5379_v32  ;;  %v5441_v30 = vld [vmem:[%s6585_s25 + $0x30] ss:$80 sps:$4 sm:$0xff]   ;;  %v5443_v31 = vld [vmem:[%s6585_s25 + $0x34] ss:$80 sps:$4 sm:$0xff]   ;;  %v5444_v32 = vld [vmem:[%s6585_s25 + $0x38] ss:$80 sps:$4 sm:$0xff]  }
  0x6c   :  { %5093 = vmatprep.subr.bf16.mxu1 %v5380_v33  ;;  %1790 = vmatprep.mubr.bf16.mxu0 %v5401_v53  ;;  %v5446_v33 = vld [vmem:[%s6585_s25 + $0x3c] ss:$80 sps:$4 sm:$0xff]   ;;  %v5464_v53 = vld [vmem:[#allocation2 + $0x4e0] sm:$0xff]  }
  0x6d   :  { %1838 = vmatprep.mubr.bf16.mxu1 %v5404_v55  ;;  %v5466_v55 = vld [vmem:[#allocation2 + $0x4a0] sm:$0xff]  }
  0x6e   :  { %5066 = vmatpush3.bf16.msra.mxu0 %v5381_v34  ;;  %v5447_v34 = vld [vmem:[#allocation2 + $0x478] sm:$0xff]  }
  0x6f   :  { %5094 = vmatpush3.bf16.msra.mxu1 %v5382_v35  ;;  %5067 = vmatprep.subr.bf16.mxu0 %v5383_v36  ;;  %v5448_v35 = vld [vmem:[#allocation2 + $0x4f8] sm:$0xff]  }
  0x70   :  { %5095 = vmatprep.subr.bf16.mxu1 %v5384_v37  ;;  %v5449_v36 = vld [vmem:[#allocation2 + $0x438] sm:$0xff]  }
  0x71   :  { %v5450_v37 = vld [vmem:[#allocation2 + $0x4b8] sm:$0xff]  }
  0x72   :  { %5068 = vmatpush3.bf16.msra.mxu0 %v5385_v38  ;;  %v5451_v38 = vld [vmem:[#allocation2 + $0x470] sm:$0xff]  }
  0x73   :  { %5096 = vmatpush3.bf16.msra.mxu1 %v5386_v39  ;;  %5069 = vmatprep.subr.bf16.mxu0 %v5387_v40  ;;  %v5452_v39 = vld [vmem:[#allocation2 + $0x4f0] sm:$0xff]  }
  0x74   :  { %5097 = vmatprep.subr.bf16.mxu1 %v5388_v41  ;;  %v5453_v40 = vld [vmem:[#allocation2 + $0x430] sm:$0xff]  }
  0x75   :  { %v5454_v41 = vld [vmem:[#allocation2 + $0x4b0] sm:$0xff]  }
  0x76   :  { %5070 = vmatpush3.bf16.msra.mxu0 %v5389_v42  ;;  %v105_v42 = vld [vmem:[%s6585_s25 + $0xd0] sm:$0x33] }
  0x77   :  { %5098 = vmatpush3.bf16.msra.mxu1 %v5390_v43  ;;  %5071 = vmatprep.subr.bf16.mxu0 %v5391_v44  ;;  %v4547_v43 = vcombine.high %v105_v42, %v105_v42  ;;  %v4546_v44 = vcombine.low %v105_v42, %v105_v42 }
  0x78   :  { %5099 = vmatprep.subr.bf16.mxu1 %v5392_v45  ;;  %v5457_v45 = vld [vmem:[#allocation2 + $0x468] sm:$0xff]  }
  0x7a   :  { %5072 = vmatpush3.bf16.msra.mxu0 %v5393_v46  ;;  %v5458_v46 = vld [vmem:[#allocation2 + $0x4e8] sm:$0xff]  }
  0x7b   :  { %5100 = vmatpush3.bf16.msra.mxu1 %v5394_v47  ;;  %5073 = vmatprep.subr.bf16.mxu0 %v5395_v48  ;;  %v106_v47 = vld [vmem:[%s6585_s25 + $0xd8] sm:$0x33] }
  0x7c   :  { %5101 = vmatprep.subr.bf16.mxu1 %v5396_v49  ;;  %v4549_v48 = vcombine.high %v106_v47, %v106_v47  ;;  %v5460_v49 = vld [vmem:[#allocation2 + $0x428] sm:$0xff]  }
  0x7e   :  { %5074 = vmatpush3.bf16.msra.mxu0 %v5397_v50  ;;  %v4548_v50 = vcombine.low %v106_v47, %v106_v47 }
  0x7f   :  { %5102 = vmatpush3.bf16.msra.mxu1 %v5398_v51  ;;  %5115 = vmatprep.subr.bf16.mxu0 %v5405_v56  ;;  %v5461_v51 = vld [vmem:[#allocation2 + $0x4a8] sm:$0xff]   ;;  %v5467_v56 = vld [vmem:[#allocation2 + $0x458] sm:$0xff]  }
  0x80   :  { %5143 = vmatprep.subr.bf16.mxu1 %v5406_v57  ;;  %v5468_v57 = vld [vmem:[#allocation2 + $0x4d8] sm:$0xff]  }
  0x81   :  { %1791 = vmatmul.mubr.bf16.vlgmr.msra.gmra.mxu0 %v5399_v52  ;;  %v5463_v52 = vld [vmem:[#allocation2 + $0x460] sm:$0xff]  }
  0x82   :  { %1839 = vmatmul.mubr.bf16.vlgmr.msra.gmra.mxu1 %v5402_v54  ;;  %5116 = vmatpush3.bf16.msra.mxu0 %v5407_v58  ;;  %v5465_v54 = vld [vmem:[#allocation2 + $0x420] sm:$0xff]   ;;  %v5469_v58 = vld [vmem:[#allocation2 + $0x418] sm:$0xff]  }
  0x83   :  { %5144 = vmatpush3.bf16.msra.mxu1 %v5408_v59  ;;  %5117 = vmatprep.subr.bf16.mxu0 %v5409_v60  ;;  %v5470_v59 = vld [vmem:[#allocation2 + $0x498] sm:$0xff]   ;;  %v5471_v60 = vld [vmem:[#allocation2 + $0x450] sm:$0xff]  }
  0x84   :  { %5145 = vmatprep.subr.bf16.mxu1 %v5410_v61  ;;  %1798 = vmatprep.mubr.bf16.mxu0 %v4543_v1  ;;  %v5472_v61 = vld [vmem:[#allocation2 + $0x4d0] sm:$0xff]   ;;  %v5476_v1 = vld [vmem:[#allocation2 + $0x4c8] sm:$0xff]  }
  0x85   :  { %1846 = vmatprep.mubr.bf16.mxu1 %v4545_v6  ;;  %v5481_v6 = vld [vmem:[#allocation2 + $0x400] sm:$0xff]  }
  0x86   :  { %5118 = vmatpush3.bf16.msra.mxu0 %v5411_v62  ;;  %v5473_v62 = vld [vmem:[#allocation2 + $0x410] sm:$0xff]  }
  0x87   :  { %5146 = vmatpush3.bf16.msra.mxu1 %v5412_v63  ;;  %5119 = vmatprep.subr.bf16.mxu0 %v5415_v3  ;;  %v5474_v63 = vld [vmem:[#allocation2 + $0x490] sm:$0xff]   ;;  %v5478_v3 = vld [vmem:[#allocation2 + $0x488] sm:$0xff]  }
  0x88   :  { %5147 = vmatprep.subr.bf16.mxu1 %v5416_v4  ;;  %v5479_v4 = vld [vmem:[#allocation2 + $0x440] sm:$0xff]  }
  0x89   :  { %1799 = vmatmul.mubr.bf16.gmra.mxu0 %v4542_v2  ;;  %v5477_v2 = vld [vmem:[#allocation2 + $0x408] sm:$0xff]  }
  0x8a   :  { %5120 = vmatpush3.bf16.msra.mxu0 %v5418_v7  ;;  %1847 = vmatmul.mubr.bf16.gmra.mxu1 %v4544_v8  ;;  %v5482_v7 = vld [vmem:[#allocation2 + $0x480] sm:$0xff]  }
  0x8b   :  { %5148 = vmatpush3.bf16.msra.mxu1 %v5419_v9  ;;  %5121 = vmatprep.subr.bf16.mxu0 %v5421_v10  ;;  %v5483_v8 = vld [vmem:[%s6585_s25 + $0x40] ss:$80 sps:$4 sm:$0xff]   ;;  %v5485_v9 = vld [vmem:[%s6585_s25 + $0x44] ss:$80 sps:$4 sm:$0xff]   ;;  %v5486_v10 = vld [vmem:[%s6585_s25 + $0x48] ss:$80 sps:$4 sm:$0xff]  }
  0x8c   :  { %5149 = vmatprep.subr.bf16.mxu1 %v5422_v11  ;;  %1886 = vmatprep.mubr.bf16.mxu0 %v5443_v31  ;;  %v5488_v11 = vld [vmem:[%s6585_s25 + $0x4c] ss:$80 sps:$4 sm:$0xff]  }
  0x8d   :  { %1934 = vmatprep.mubr.bf16.mxu1 %v5446_v33 }
  0x8e   :  { %5122 = vmatpush3.bf16.msra.mxu0 %v5423_v12  ;;  %v107_v12 = vld [vmem:[%s6585_s25 + $0xe0] sm:$0x33] }
  0x8f   :  { %5150 = vmatpush3.bf16.msra.mxu1 %v5424_v13  ;;  %5123 = vmatprep.subr.bf16.mxu0 %v5425_v14  ;;  %v108_v13 = vld [vmem:[%s6585_s25 + $0xe8] sm:$0x33]  ;;  %v4551_v14 = vcombine.high %v107_v12, %v107_v12 }
  0x90   :  { %5151 = vmatprep.subr.bf16.mxu1 %v5426_v15  ;;  %v4553_v15 = vcombine.high %v108_v13, %v108_v13 }
  0x92   :  { %5124 = vmatpush3.bf16.msra.mxu0 %v5427_v16  ;;  %v4550_v16 = vcombine.low %v107_v12, %v107_v12 }
  0x93   :  { %5152 = vmatpush3.bf16.msra.mxu1 %v5428_v17  ;;  %5125 = vmatprep.subr.bf16.mxu0 %v5429_v18  ;;  %v4552_v17 = vcombine.low %v108_v13, %v108_v13  ;;  %v5493_v18 = vld [vmem:[%s6566_s3 + $0x70] ss:$8 sps:$4 sm:$0xff]  }
  0x94   :  { %5153 = vmatprep.subr.bf16.mxu1 %v5430_v19  ;;  %v5495_v19 = vld [vmem:[%s6566_s3 + $0x74] ss:$8 sps:$4 sm:$0xff]  }
  0x96   :  { %5126 = vmatpush3.bf16.msra.mxu0 %v5431_v20  ;;  %v5498_v20 = vld [vmem:[%s6566_s3 + $0x64] ss:$8 sps:$4 sm:$0xff]  }
  0x97   :  { %5154 = vmatpush3.bf16.msra.mxu1 %v5432_v21  ;;  %5127 = vmatprep.subr.bf16.mxu0 %v5433_v22  ;;  %v5496_v21 = vld [vmem:[%s6566_s3 + $0x60] ss:$8 sps:$4 sm:$0xff]   ;;  %v5501_v22 = vld [vmem:[%s6566_s3 + $0x54] ss:$8 sps:$4 sm:$0xff]  }
  0x98   :  { %5155 = vmatprep.subr.bf16.mxu1 %v5434_v23 }
  0x9a   :  { %5128 = vmatpush3.bf16.msra.mxu0 %v5435_v24  ;;  %v4513_v24 = vld [vmem:[%s6565_s2] ss:$0 sm:$0xff] }
  0x9b   :  { %5156 = vmatpush3.bf16.msra.mxu1 %v5436_v25  ;;  %5129 = vmatprep.subr.bf16.mxu0 %v5437_v26 }
  0x9c   :  { %5157 = vmatprep.subr.bf16.mxu1 %v5438_v27  ;;  %v5499_v27 = vld [vmem:[%s6566_s3 + $0x50] ss:$8 sps:$4 sm:$0xff]  }
  0x9e   :  { %5130 = vmatpush3.bf16.msra.mxu0 %v5439_v28 }
  0x9f   :  { %5158 = vmatpush3.bf16.msra.mxu1 %v5440_v29  ;;  %5171 = vmatprep.subr.bf16.mxu0 %v5447_v34 }
  0xa0   :  { %5199 = vmatprep.subr.bf16.mxu1 %v5448_v35 }
  0xa1   :  { %1887 = vmatmul.mubr.bf16.vlgmr.msra.gmra.mxu0 %v5441_v30  ;;  %v5504_v30 = vld [vmem:[%s6566_s3 + $0x44] ss:$8 sps:$4 sm:$0xff]  }
  0xa2   :  { %1935 = vmatmul.mubr.bf16.vlgmr.msra.gmra.mxu1 %v5444_v32  ;;  %5172 = vmatpush3.bf16.msra.mxu0 %v5449_v36  ;;  %v5502_v36 = vld [vmem:[%s6566_s3 + $0x40] ss:$8 sps:$4 sm:$0xff]  }
  0xa3   :  { %5200 = vmatpush3.bf16.msra.mxu1 %v5450_v37  ;;  %5173 = vmatprep.subr.bf16.mxu0 %v5451_v38 }
  0xa4   :  { %5201 = vmatprep.subr.bf16.mxu1 %v5452_v39  ;;  %1894 = vmatprep.mubr.bf16.mxu0 %v4547_v43  ;;  %v5507_v43 = vld [vmem:[%s6566_s3 + $0x34] ss:$8 sps:$4 sm:$0xff]  }
  0xa5   :  { %1942 = vmatprep.mubr.bf16.mxu1 %v4549_v48  ;;  %v5513_v48 = vld [vmem:[%s6566_s3 + $0x14] ss:$8 sps:$4 sm:$0xff]  }
  0xa6   :  { %5174 = vmatpush3.bf16.msra.mxu0 %v5453_v40 }
  0xa7   :  { %5202 = vmatpush3.bf16.msra.mxu1 %v5454_v41  ;;  %5175 = vmatprep.subr.bf16.mxu0 %v5457_v45  ;;  %v5510_v45 = vld [vmem:[%s6566_s3 + $0x24] ss:$8 sps:$4 sm:$0xff]  }
  0xa8   :  { %5203 = vmatprep.subr.bf16.mxu1 %v5458_v46  ;;  %v5508_v46 = vld [vmem:[%s6566_s3 + $0x20] ss:$8 sps:$4 sm:$0xff]  }
  0xa9   :  { %1895 = vmatmul.mubr.bf16.gmra.mxu0 %v4546_v44  ;;  %v5505_v44 = vld [vmem:[%s6566_s3 + $0x30] ss:$8 sps:$4 sm:$0xff]  }
  0xaa   :  { %5176 = vmatpush3.bf16.msra.mxu0 %v5460_v49  ;;  %1943 = vmatmul.mubr.bf16.gmra.mxu1 %v4548_v50  ;;  %v5511_v49 = vld [vmem:[%s6566_s3 + $0x10] ss:$8 sps:$4 sm:$0xff]  }
  0xab   :  { %5204 = vmatpush3.bf16.msra.mxu1 %v5461_v51  ;;  %5177 = vmatprep.subr.bf16.mxu0 %v5463_v52 }
  0xac   :  { %5205 = vmatprep.subr.bf16.mxu1 %v5464_v53  ;;  %1982 = vmatprep.mubr.bf16.mxu0 %v5485_v9 }
  0xad   :  { %2030 = vmatprep.mubr.bf16.mxu1 %v5488_v11  ;;  %v5524_v11 = vld [vmem:[%s6568_s5 + $0x30] sm:$0xff]  }
  0xae   :  { %5178 = vmatpush3.bf16.msra.mxu0 %v5465_v54 }
  0xaf   :  { %5206 = vmatpush3.bf16.msra.mxu1 %v5466_v55  ;;  %5179 = vmatprep.subr.bf16.mxu0 %v5467_v56  ;;  %v5516_v55 = vld [vmem:[%s6566_s3 + $0x4] ss:$8 sps:$4 sm:$0xff]  }
  0xb0   :  { %5207 = vmatprep.subr.bf16.mxu1 %v5468_v57 }
  0xb2   :  { %5180 = vmatpush3.bf16.msra.mxu0 %v5469_v58  ;;  %v5514_v58 = vld [vmem:[%s6566_s3] ss:$8 sps:$4 sm:$0xff]  }
  0xb3   :  { %5208 = vmatpush3.bf16.msra.mxu1 %v5470_v59  ;;  %5181 = vmatprep.subr.bf16.mxu0 %v5471_v60 }
  0xb4   :  { %5209 = vmatprep.subr.bf16.mxu1 %v5472_v61 }
  0xb6   :  { %5182 = vmatpush3.bf16.msra.mxu0 %v5473_v62 }
  0xb7   :  { %5210 = vmatpush3.bf16.msra.mxu1 %v5474_v63  ;;  %5183 = vmatprep.subr.bf16.mxu0 %v5475_v0  ;;  %v5933_v63 = vmov 0  }
  0xb8   :  { %5211 = vmatprep.subr.bf16.mxu1 %v5476_v1 }
  0xba   :  { %5184 = vmatpush3.bf16.msra.mxu0 %v5477_v2 }
  0xbb   :  { %5212 = vmatpush3.bf16.msra.mxu1 %v5478_v3  ;;  %5185 = vmatprep.subr.bf16.mxu0 %v5479_v4 }
  0xbc   :  { %5213 = vmatprep.subr.bf16.mxu1 %v5480_v5 }
  0xbe   :  { %5186 = vmatpush3.bf16.msra.mxu0 %v5481_v6 }
  0xbf   :  { %5214 = vmatpush3.bf16.msra.mxu1 %v5482_v7  ;;  %2165 = vmatprep.subr.bf16.mxu0 %v5495_v19  ;;  %v5519_v7 = vld [vmem:[%s6570_s7 + $0x74] ss:$8 sps:$4 sm:$0xff]  }
  0xc1   :  { %1983 = vmatmul.mubr.bf16.vlgmr.msra.gmra.mxu0 %v5483_v8  ;;  %v5520_v8 = vld [vmem:[%s6568_s5 + $0x38] sm:$0xff]  }
  0xc2   :  { %2031 = vmatmul.mubr.bf16.vlgmr.msra.gmra.mxu1 %v5486_v10  ;;  %1990 = vmatprep.mubr.bf16.mxu0 %v4551_v14 }
  0xc3   :  { %2038 = vmatprep.mubr.bf16.mxu1 %v4553_v15  ;;  %2166 = vmatpush1.bf16.msra.mxu0 %v5493_v18 }
  0xc4   :  { %2167 = vmatprep.subr.bf16.mxu0 %v5498_v20  ;;  %5237 = vmatprep.subr.bf16.mxu1 %v5520_v8 }
  0xc5   :  { %5238 = vmatpush3.bf16.msra.mxu1 %v5520_v8 }
  0xc6   :  { %5239 = vmatprep.subr.bf16.mxu1 %v5524_v11 }
  0xc7   :  { %2168 = vmatpush1.bf16.msra.mxu0 %v5496_v21  ;;  %v5532_v21 = vld [vmem:[%s6568_s5 + $0x20] sm:$0xff]  }
  0xc8   :  { %2169 = vmatprep.subr.bf16.mxu0 %v5501_v22 }
  0xc9   :  { %1991 = vmatmul.mubr.bf16.gmra.mxu0 %v4550_v16  ;;  %5240 = vmatpush3.bf16.msra.mxu1 %v5524_v11 }
  0xca   :  { %2039 = vmatmul.mubr.bf16.gmra.mxu1 %v4552_v17  ;;  %2197 = vmatprep.mubr.bf16.mxu0 %v5933_v63  ;;  %v5528_v17 = vld [vmem:[%s6568_s5 + $0x28] sm:$0xff]  }
  0xcb   :  { %2170 = vmatpush1.bf16.msra.mxu0 %v5499_v27  ;;  %5241 = vmatprep.subr.bf16.mxu1 %v5528_v17 }
  0xcc   :  { %2171 = vmatprep.subr.bf16.mxu0 %v5504_v30 }
  0xcd   :  { %5242 = vmatpush3.bf16.msra.mxu1 %v5528_v17 }
  0xce   :  { %5243 = vmatprep.subr.bf16.mxu1 %v5532_v21 }
  0xcf   :  { %2172 = vmatpush1.bf16.msra.mxu0 %v5502_v36 }
  0xd0   :  { %2173 = vmatprep.subr.bf16.mxu0 %v5507_v43 }
  0xd1   :  { %5244 = vmatpush3.bf16.msra.mxu1 %v5532_v21 }
  0xd3   :  { %2174 = vmatpush1.bf16.msra.mxu0 %v5505_v44 }
  0xd4   :  { %2175 = vmatprep.subr.bf16.mxu0 %v5510_v45 }
  0xd7   :  { %2176 = vmatpush1.bf16.msra.mxu0 %v5508_v46 }
  0xd8   :  { %2177 = vmatprep.subr.bf16.mxu0 %v5513_v48 }
  0xdb   :  { %2178 = vmatpush1.bf16.msra.mxu0 %v5511_v49 }
  0xdc   :  { %2179 = vmatprep.subr.bf16.mxu0 %v5516_v55 }
  0xdf   :  { %2180 = vmatpush1.bf16.msra.mxu0 %v5514_v58 }
  0xe0   :  { %2460 = vmatprep.subr.bf16.mxu0 %v5519_v7 }
 0x101   :  { %v4963_v23 = vpop.f32.mrf.mxu0 }
 0x102   :  { %v4991_v25 = vpop.f32.mrf.mxu1 }
 0x103   :  { %v4964_v26 = vpop.f32.mrf.mxu0 }
 0x104   :  { %v4965_v28 = vadd.f32 %v4964_v26, %v4963_v23  ;;  %v4992_v29 = vpop.f32.mrf.mxu1 }
 0x105   :  { %v4993_v31 = vadd.f32 %v4992_v29, %v4991_v25  ;;  %v4966_v32 = vpop.f32.mrf.mxu0 }
 0x106   :  { %v1601_v33 = vadd.f32 %v4965_v28, %v4513_v24  ;;  %v4994_v34 = vpop.f32.mrf.mxu1  ;;  %v5536_v28 = vld [vmem:[%s6568_s5 + $0x18] sm:$0xff]  }
 0x107   :  { %v4967_v35 = vpop.f32.mrf.mxu0  ;;  %5245 = vmatprep.subr.bf16.mxu1 %v5536_v28 }
 0x108   :  { %v1649_v37 = vadd.f32 %v4993_v31, %v1601_v33  ;;  %v4968_v38 = vadd.f32 %v4967_v35, %v4966_v32  ;;  %v4995_v39 = vpop.f32.mrf.mxu1  ;;  %5246 = vmatpush3.bf16.msra.mxu1 %v5536_v28 }
 0x109   :  { %v4996_v40 = vadd.f32 %v4995_v39, %v4994_v34  ;;  %v4969_v47 = vpop.f32.mrf.mxu0 }
 0x10a   :  { %v1604_v41 = vadd.f32 %v4968_v38, %v4513_v24  ;;  %v4997_v51 = vpop.f32.mrf.mxu1 }
 0x10b   :  { %v4970_v50 = vpop.f32.mrf.mxu0 }
 0x10c   :  { %v1652_v42 = vadd.f32 %v4996_v40, %v1604_v41  ;;  %v4971_v52 = vadd.f32 %v4970_v50, %v4969_v47  ;;  %v4998_v54 = vpop.f32.mrf.mxu1 }
 0x10d   :  { %v4972_v53 = vpop.f32.mrf.mxu0  ;;  %v4999_v57 = vadd.f32 %v4998_v54, %v4997_v51 }
 0x10e   :  { %v1609_v56 = vadd.f32 %v4971_v52, %v4513_v24  ;;  %v5000_v60 = vpop.f32.mrf.mxu1 }
 0x10f   :  { %v4973_v59 = vpop.f32.mrf.mxu0 }
 0x110   :  { %v1657_v61 = vadd.f32 %v4999_v57, %v1609_v56  ;;  %v5001_v62 = vpop.f32.mrf.mxu1 }
 0x121   :  { %v5019_v0 = vpop.f32.mrf.mxu0 }
 0x122   :  { %v5047_v1 = vpop.f32.mrf.mxu1 }
 0x123   :  { %v5020_v2 = vpop.f32.mrf.mxu0 }
 0x124   :  { %v5021_v3 = vadd.f32 %v5020_v2, %v5019_v0  ;;  %v5048_v4 = vpop.f32.mrf.mxu1 }
 0x125   :  { %v5049_v5 = vadd.f32 %v5048_v4, %v5047_v1  ;;  %v5022_v6 = vpop.f32.mrf.mxu0 }
 0x126   :  { %v1697_v9 = vadd.f32 %v5021_v3, %v1649_v37  ;;  %v5050_v10 = vpop.f32.mrf.mxu1 }
 0x127   :  { %v5023_v12 = vpop.f32.mrf.mxu0 }
 0x128   :  { %v1745_v13 = vadd.f32 %v5049_v5, %v1697_v9  ;;  %v5024_v14 = vadd.f32 %v5023_v12, %v5022_v6  ;;  %v5051_v15 = vpop.f32.mrf.mxu1 }
 0x129   :  { %v5052_v16 = vadd.f32 %v5051_v15, %v5050_v10  ;;  %v5025_v20 = vpop.f32.mrf.mxu0 }
 0x12a   :  { %v1700_v18 = vadd.f32 %v5024_v14, %v1652_v42  ;;  %v5053_v24 = vpop.f32.mrf.mxu1 }
 0x12b   :  { %v5026_v22 = vpop.f32.mrf.mxu0 }
 0x12c   :  { %v6187_v19 = vadd.f32 %v5052_v16, %v1700_v18  ;;  %v5027_v23 = vadd.f32 %v5026_v22, %v5025_v20  ;;  %v5054_v27 = vpop.f32.mrf.mxu1 }
 0x12d   :  { %v5028_v25 = vpop.f32.mrf.mxu0  ;;  %v5055_v29 = vadd.f32 %v5054_v27, %v5053_v24 }
 0x12e   :  { %v1705_v26 = vadd.f32 %v5027_v23, %v1657_v61  ;;  %v5056_v31 = vpop.f32.mrf.mxu1 }
 0x12f   :  { %v5029_v30 = vpop.f32.mrf.mxu0 }
 0x130   :  { %v1753_v32 = vadd.f32 %v5055_v29, %v1705_v26  ;;  %v5057_v33 = vpop.f32.mrf.mxu1 }
 0x141   :  { %v5075_v34 = vpop.f32.mrf.mxu0 }
 0x142   :  { %v5103_v35 = vpop.f32.mrf.mxu1 }
 0x143   :  { %v5076_v36 = vpop.f32.mrf.mxu0 }
 0x144   :  { %v5077_v37 = vadd.f32 %v5076_v36, %v5075_v34  ;;  %v5104_v38 = vpop.f32.mrf.mxu1 }
 0x145   :  { %v5078_v39 = vpop.f32.mrf.mxu0  ;;  %v5105_v41 = vadd.f32 %v5104_v38, %v5103_v35 }
 0x146   :  { %v1793_v40 = vadd.f32 %v5077_v37, %v1745_v13  ;;  %v5106_v44 = vpop.f32.mrf.mxu1 }
 0x147   :  { %v5079_v43 = vpop.f32.mrf.mxu0 }
 0x148   :  { %v1841_v42 = vadd.f32 %v5105_v41, %v1793_v40  ;;  %v5107_v46 = vpop.f32.mrf.mxu1  ;;  %v5080_v11 = vadd.f32 %v5079_v43, %v5078_v39 }
 0x149   :  { %v5081_v45 = vpop.f32.mrf.mxu0  ;;  %v5108_v14 = vadd.f32 %v5107_v46, %v5106_v44 }
 0x14a   :  { %v5109_v49 = vpop.f32.mrf.mxu1  ;;  %v1796_v13 = vadd.f32 %v5080_v11, %v6187_v19  ;;  %v5540_v11 = vld [vmem:[%s6568_s5 + $0x10] sm:$0xff]  }
 0x14b   :  { %v5082_v47 = vpop.f32.mrf.mxu0  ;;  %5247 = vmatprep.subr.bf16.mxu1 %v5540_v11 }
 0x14c   :  { %v5083_v48 = vadd.f32 %v5082_v47, %v5081_v45  ;;  %v5110_v52 = vpop.f32.mrf.mxu1  ;;  %v1844_v18 = vadd.f32 %v5108_v14, %v1796_v13  ;;  %v5541_v13 = vld [vmem:[%s6570_s7 + $0x10] ss:$8 sps:$4 sm:$0xff]   ;;  %5248 = vmatpush3.bf16.msra.mxu1 %v5540_v11  ;;  %v5544_v14 = vld [vmem:[%s6568_s5 + $0x8] sm:$0xff]  }
 0x14d   :  { %v5084_v50 = vpop.f32.mrf.mxu0  ;;  %v5111_v53 = vadd.f32 %v5110_v52, %v5109_v49  ;;  %5249 = vmatprep.subr.bf16.mxu1 %v5544_v14  ;;  %v5594_v11 = vld [vmem:[%s6572_s9 + $0xb0] ss:$8 sps:$4 sm:$0xff]  }
 0x14e   :  { %v1801_v51 = vadd.f32 %v5083_v48, %v1753_v32  ;;  %v5112_v55 = vpop.f32.mrf.mxu1 }
 0x14f   :  { %v5085_v54 = vpop.f32.mrf.mxu0 }
 0x150   :  { %v1849_v56 = vadd.f32 %v5111_v53, %v1801_v51  ;;  %v5113_v57 = vpop.f32.mrf.mxu1  ;;  %5250 = vmatpush3.bf16.msra.mxu1 %v5544_v14  ;;  %v5600_v14 = vld [vmem:[%s6572_s9 + $0xa0] ss:$8 sps:$4 sm:$0xff]  }
 0x161   :  { %v5131_v58 = vpop.f32.mrf.mxu0 }
 0x162   :  { %v5159_v59 = vpop.f32.mrf.mxu1 }
 0x163   :  { %v5132_v60 = vpop.f32.mrf.mxu0 }
 0x164   :  { %v5160_v61 = vpop.f32.mrf.mxu1  ;;  %v5133_v12 = vadd.f32 %v5132_v60, %v5131_v58 }
 0x165   :  { %v5134_v62 = vpop.f32.mrf.mxu0  ;;  %v5161_v17 = vadd.f32 %v5160_v61, %v5159_v59  ;;  %v5517_v59 = vld [vmem:[%s6570_s7 + $0x70] ss:$8 sps:$4 sm:$0xff]   ;;  %v5523_v61 = vld [vmem:[%s6570_s7 + $0x64] ss:$8 sps:$4 sm:$0xff]  }
 0x166   :  { %v5162_v1 = vpop.f32.mrf.mxu1  ;;  %v1889_v16 = vadd.f32 %v5133_v12, %v1841_v42  ;;  %v5543_v12 = vld [vmem:[%s6570_s7 + $0x14] ss:$8 sps:$4 sm:$0xff]  }
 0x167   :  { %v5135_v0 = vpop.f32.mrf.mxu0 }
 0x168   :  { %v5163_v3 = vpop.f32.mrf.mxu1  ;;  %v5136_v15 = vadd.f32 %v5135_v0, %v5134_v62  ;;  %v1937_v24 = vadd.f32 %v5161_v17, %v1889_v16  ;;  %v5521_v0 = vld [vmem:[%s6570_s7 + $0x60] ss:$8 sps:$4 sm:$0xff]  }
 0x169   :  { %v5137_v2 = vpop.f32.mrf.mxu0  ;;  %v5164_v28 = vadd.f32 %v5163_v3, %v5162_v1  ;;  %v5527_v1 = vld [vmem:[%s6570_s7 + $0x54] ss:$8 sps:$4 sm:$0xff]   ;;  %v5525_v3 = vld [vmem:[%s6570_s7 + $0x50] ss:$8 sps:$4 sm:$0xff]   ;;  %v5545_v16 = vld [vmem:[%s6570_s7] ss:$8 sps:$4 sm:$0xff]  }
 0x16a   :  { %v5165_v5 = vpop.f32.mrf.mxu1  ;;  %v1892_v22 = vadd.f32 %v5136_v15, %v1844_v18  ;;  %v5547_v15 = vld [vmem:[%s6570_s7 + $0x4] ss:$8 sps:$4 sm:$0xff]   ;;  %v5551_v18 = vld [vmem:[%s6572_s9 + $0x74] ss:$8 sps:$4 sm:$0xff]  }
 0x16b   :  { %v5138_v4 = vpop.f32.mrf.mxu0  ;;  %v5548_v17 = vld [vmem:[%s6568_s5] sm:$0xff]  }
 0x16c   :  { %v5166_v7 = vpop.f32.mrf.mxu1  ;;  %v5139_v25 = vadd.f32 %v5138_v4, %v5137_v2  ;;  %v1940_v33 = vadd.f32 %v5164_v28, %v1892_v22  ;;  %5251 = vmatprep.subr.bf16.mxu1 %v5548_v17 }
 0x16d   :  { %v5140_v6 = vpop.f32.mrf.mxu0  ;;  %v5167_v35 = vadd.f32 %v5166_v7, %v5165_v5  ;;  %v5531_v5 = vld [vmem:[%s6570_s7 + $0x44] ss:$8 sps:$4 sm:$0xff]   ;;  %v5535_v7 = vld [vmem:[%s6570_s7 + $0x34] ss:$8 sps:$4 sm:$0xff]   ;;  %5252 = vmatpush3.bf16.msra.mxu1 %v5548_v17 }
 0x16e   :  { %v5168_v9 = vpop.f32.mrf.mxu1  ;;  %v1897_v34 = vadd.f32 %v5139_v25, %v1849_v56  ;;  %v5529_v6 = vld [vmem:[%s6570_s7 + $0x40] ss:$8 sps:$4 sm:$0xff]   ;;  %2725 = vmatprep.subr.bf16.mxu1 %v5551_v18  ;;  %v5611_v17 = vld [vmem:[#allocation5 + $0x144] ss:$80 sps:$4 sm:$0xff]   ;;  %v5606_v18 = vld [vmem:[%s6572_s9 + $0x90] ss:$8 sps:$4 sm:$0xff]  }
 0x16f   :  { %v5141_v8 = vpop.f32.mrf.mxu0  ;;  %v5539_v9 = vld [vmem:[%s6570_s7 + $0x24] ss:$8 sps:$4 sm:$0xff]  }
 0x170   :  { %v5169_v10 = vpop.f32.mrf.mxu1  ;;  %v1945_v44 = vadd.f32 %v5167_v35, %v1897_v34  ;;  %v5533_v8 = vld [vmem:[%s6570_s7 + $0x30] ss:$8 sps:$4 sm:$0xff]  }
 0x171   :  { %v5537_v10 = vld [vmem:[%s6570_s7 + $0x20] ss:$8 sps:$4 sm:$0xff]  }
 0x172   :  { %v5579_v34 = vld [vmem:[#allocation5 + $0x460] ss:$80 sps:$4 sm:$0xff]  }
 0x181   :  { %v5187_v20 = vpop.f32.mrf.mxu0 }
 0x182   :  { %v5215_v21 = vpop.f32.mrf.mxu1 }
 0x183   :  { %v5188_v23 = vpop.f32.mrf.mxu0 }
 0x184   :  { %v5189_v26 = vadd.f32 %v5188_v23, %v5187_v20  ;;  %v5216_v27 = vpop.f32.mrf.mxu1  ;;  %v5581_v20 = vld [vmem:[#allocation5 + $0x464] ss:$80 sps:$4 sm:$0xff]  }
 0x185   :  { %v5190_v29 = vpop.f32.mrf.mxu0  ;;  %v5217_v31 = vadd.f32 %v5216_v27, %v5215_v21  ;;  %v2075_v21 = vlaneseq }
 0x186   :  { %v1985_v30 = vadd.f32 %v5189_v26, %v1937_v24  ;;  %v5218_v32 = vpop.f32.mrf.mxu1  ;;  %v2073_v24 = vld [vmem:[%s6567_s4] sm:$0x3] }
 0x187   :  { %v5191_v19 = vpop.f32.mrf.mxu0  ;;  %v6255_v22 = vshrl.u32 %v2075_v21, 7  ;;  %v5614_v21 = vld [vmem:[%s6572_s9 + $0x84] ss:$8 sps:$4 sm:$0xff]  }
 0x188   :  { %v2033_v36 = vadd.f32 %v5217_v31, %v1985_v30  ;;  %v5192_v37 = vadd.f32 %v5191_v19, %v5190_v29  ;;  %v5219_v38 = vpop.f32.mrf.mxu1 }
 0x189   :  { %v5193_v39 = vpop.f32.mrf.mxu0  ;;  %v5220_v41 = vadd.f32 %v5219_v38, %v5218_v32  ;;  %v6258_v23 = vsub.s32 0, %v6255_v22  ;;  %v6264_v25 = vsub.s32 1, %v6255_v22 }
 0x18a   :  { %v1988_v40 = vadd.f32 %v5192_v37, %v1940_v33  ;;  %v5221_v42 = vpop.f32.mrf.mxu1  ;;  %v2049_v45 = vmul.f32 0.01, %v2033_v36  ;;  %vm2046_vm0 = vcmp.gt.f32.partialorder %v2033_v36, 0.0  ;;  %v5587_v37 = vld [vmem:[#allocation5 + $0x3c4] ss:$80 sps:$4 sm:$0xff]  }
 0x18b   :  { %v5194_v43 = vpop.f32.mrf.mxu0  ;;  %v2078_v26 = vrot.slane %v2073_v24, %v6258_v23  ;;  %v2082_v27 = vrot.slane %v2073_v24, %v6264_v25  ;;  %v5617_v24 = vld [vmem:[#allocation5 + $0xa4] ss:$80 sps:$4 sm:$0xff]  }
 0x18c   :  { %v2036_v46 = vadd.f32 %v5220_v41, %v1988_v40  ;;  %v5195_v47 = vadd.f32 %v5194_v43, %v5193_v39  ;;  %v5222_v48 = vpop.f32.mrf.mxu1  ;;  %v2052_v55 = vsel %vm2046_vm0, %v2033_v36, %v2049_v45  ;;  %v5549_v41 = vld [vmem:[%s6572_s9 + $0x70] ss:$8 sps:$4 sm:$0xff]   ;;  %v5554_v45 = vld [vmem:[%s6572_s9 + $0x64] ss:$8 sps:$4 sm:$0xff]  }
 0x18d   :  { %v5223_v49 = vadd.f32 %v5222_v48, %v5221_v42  ;;  %v5196_v50 = vpop.f32.mrf.mxu0  ;;  %v5585_v42 = vld [vmem:[#allocation5 + $0x3c0] ss:$80 sps:$4 sm:$0xff]  }
 0x18e   :  { %vm2047_vm1 = vcmp.gt.f32.partialorder %v2036_v46, 0.0  ;;  %v2050_v51 = vmul.f32 0.01, %v2036_v46  ;;  %v1993_v52 = vadd.f32 %v5195_v47, %v1945_v44  ;;  %v5224_v53 = vpop.f32.mrf.mxu1  ;;  %v5591_v50 = vld [vmem:[#allocation5 + $0x320] ss:$80 sps:$4 sm:$0xff]  }
 0x18f   :  { %v5197_v54 = vpop.f32.mrf.mxu0  ;;  %v5555_v53 = vld [vmem:[%s6572_s9 + $0x50] ss:$8 sps:$4 sm:$0xff]  }
 0x190   :  { %v2053_v56 = vsel %vm2047_vm1, %v2036_v46, %v2050_v51  ;;  %v2041_v57 = vadd.f32 %v5223_v49, %v1993_v52  ;;  %v5225_v58 = vpop.f32.mrf.mxu1  ;;  %v5593_v46 = vld [vmem:[#allocation5 + $0x324] ss:$80 sps:$4 sm:$0xff]   ;;  %v5552_v49 = vld [vmem:[%s6572_s9 + $0x60] ss:$8 sps:$4 sm:$0xff]  }
 0x191   :  { %v2055_v60 = vpack.c.bf16 %v2053_v56, %v2052_v55  ;;  %v5557_v51 = vld [vmem:[%s6572_s9 + $0x54] ss:$8 sps:$4 sm:$0xff]   ;;  %v5597_v54 = vld [vmem:[#allocation5 + $0x280] ss:$80 sps:$4 sm:$0xff]   ;;  %v5560_v55 = vld [vmem:[%s6572_s9 + $0x44] ss:$8 sps:$4 sm:$0xff]  }
 0x192   :  { %v2051_v62 = vmul.f32 0.01, %v2041_v57  ;;  %vm2048_vm2 = vcmp.gt.f32.partialorder %v2041_v57, 0.0  ;;  %v5599_v52 = vld [vmem:[#allocation5 + $0x284] ss:$80 sps:$4 sm:$0xff]  }
 0x193   :  { %2198 = vmatmul.mubr.bf16.vlgmr.msra.gmra.mxu0 %v2055_v60  ;;  %v5558_v56 = vld [vmem:[%s6572_s9 + $0x40] ss:$8 sps:$4 sm:$0xff]   ;;  %v5561_v58 = vld [vmem:[%s6572_s9 + $0x30] ss:$8 sps:$4 sm:$0xff]  }
 0x194   :  { %2207 = vmatprep.mubr.bf16.mxu0 %v5933_v63  ;;  %2461 = vmatpush1.bf16.msra.mxu0 %v5517_v59  ;;  %v2054_v2 = vsel %vm2048_vm2, %v2041_v57, %v2051_v62  ;;  %v5563_v57 = vld [vmem:[%s6572_s9 + $0x34] ss:$8 sps:$4 sm:$0xff]   ;;  %v5566_v59 = vld [vmem:[%s6572_s9 + $0x24] ss:$8 sps:$4 sm:$0xff]   ;;  %v5564_v60 = vld [vmem:[%s6572_s9 + $0x20] ss:$8 sps:$4 sm:$0xff]  }
 0x195   :  { %2462 = vmatprep.subr.bf16.mxu0 %v5523_v61  ;;  %v2056_v4 = vpack.c.bf16 %v2054_v2, %v2054_v2  ;;  %v5569_v61 = vld [vmem:[%s6572_s9 + $0x14] ss:$8 sps:$4 sm:$0xff]   ;;  %v5567_v62 = vld [vmem:[%s6572_s9 + $0x10] ss:$8 sps:$4 sm:$0xff]  }
 0x196   :  { %v5575_v2 = vld [vmem:[%s6572_s9 + $0xf4] ss:$8 sps:$4 sm:$0xff]  }
 0x198   :  { %2463 = vmatpush1.bf16.msra.mxu0 %v5521_v0  ;;  %v5572_v0 = vld [vmem:[%s6572_s9 + $0x4] ss:$8 sps:$4 sm:$0xff]  }
 0x199   :  { %2464 = vmatprep.subr.bf16.mxu0 %v5527_v1  ;;  %v5570_v1 = vld [vmem:[%s6572_s9] ss:$8 sps:$4 sm:$0xff]  }
 0x19b   :  { %2208 = vmatmul.mubr.bf16.gmra.mxu0 %v2056_v4  ;;  %v5578_v4 = vld [vmem:[%s6572_s9 + $0xe4] ss:$8 sps:$4 sm:$0xff]  }
 0x19c   :  { %2465 = vmatpush1.bf16.msra.mxu0 %v5525_v3  ;;  %2492 = vmatprep.mubr.bf16.mxu0 %v5933_v63  ;;  %v5573_v3 = vld [vmem:[%s6572_s9 + $0xf0] ss:$8 sps:$4 sm:$0xff]  }
 0x19d   :  { %2466 = vmatprep.subr.bf16.mxu0 %v5531_v5  ;;  %v5576_v5 = vld [vmem:[%s6572_s9 + $0xe0] ss:$8 sps:$4 sm:$0xff]  }
 0x1a0   :  { %2467 = vmatpush1.bf16.msra.mxu0 %v5529_v6  ;;  %v5584_v6 = vld [vmem:[%s6572_s9 + $0xd4] ss:$8 sps:$4 sm:$0xff]  }
 0x1a1   :  { %2468 = vmatprep.subr.bf16.mxu0 %v5535_v7  ;;  %v5582_v7 = vld [vmem:[%s6572_s9 + $0xd0] ss:$8 sps:$4 sm:$0xff]  }
 0x1a4   :  { %2469 = vmatpush1.bf16.msra.mxu0 %v5533_v8  ;;  %v5590_v8 = vld [vmem:[%s6572_s9 + $0xc4] ss:$8 sps:$4 sm:$0xff]  }
 0x1a5   :  { %2470 = vmatprep.subr.bf16.mxu0 %v5539_v9  ;;  %v5588_v9 = vld [vmem:[%s6572_s9 + $0xc0] ss:$8 sps:$4 sm:$0xff]  }
 0x1a8   :  { %2471 = vmatpush1.bf16.msra.mxu0 %v5537_v10  ;;  %v5596_v10 = vld [vmem:[%s6572_s9 + $0xb4] ss:$8 sps:$4 sm:$0xff]  }
 0x1a9   :  { %2472 = vmatprep.subr.bf16.mxu0 %v5543_v12  ;;  %v5602_v12 = vld [vmem:[%s6572_s9 + $0xa4] ss:$8 sps:$4 sm:$0xff]  }
 0x1ac   :  { %2473 = vmatpush1.bf16.msra.mxu0 %v5541_v13  ;;  %v5605_v13 = vld [vmem:[#allocation5 + $0x1e4] ss:$80 sps:$4 sm:$0xff]  }
 0x1ad   :  { %2474 = vmatprep.subr.bf16.mxu0 %v5547_v15  ;;  %v5603_v15 = vld [vmem:[#allocation5 + $0x1e0] ss:$80 sps:$4 sm:$0xff]  }
 0x1b0   :  { %2475 = vmatpush1.bf16.msra.mxu0 %v5545_v16  ;;  %v5608_v16 = vld [vmem:[%s6572_s9 + $0x94] ss:$8 sps:$4 sm:$0xff]  }
 0x1b1   :  { %3909 = vmatprep.subr.bf16.mxu0 %v5581_v20  ;;  %v5609_v20 = vld [vmem:[#allocation5 + $0x140] ss:$80 sps:$4 sm:$0xff]  }
 0x253   :  { %v2199_v28 = vpop.f32.mrf.mxu0 }
 0x254   :  { %v2200_v29 = vadd.f32 %v2199_v28, %v2078_v26  ;;  %v5620_v28 = vld [vmem:[#allocation5 + $0x4] ss:$80 sps:$4 sm:$0xff]  }
 0x255   :  { %v2201_v30 = vpop.f32.mrf.mxu0 }
 0x256   :  { %2216 = vst [vmem:[%s6577_s14] sm:$0xff] %v2200_v29  ;;  %v2202_v31 = vadd.f32 %v2201_v30, %v2082_v27  ;;  %v5618_v30 = vld [vmem:[#allocation5] ss:$80 sps:$4 sm:$0xff]  }
 0x257   :  { %v2203_v32 = vpop.f32.mrf.mxu0 }
 0x258   :  { %2219 = vst [vmem:[%s6578_s15] sm:$0xff] %v2202_v31  ;;  %v2204_v33 = vadd.f32 %v2203_v32, %v2078_v26  ;;  %v5626_v31 = vld [vmem:[#allocation5 + $0x46c] ss:$80 sps:$4 sm:$0xff]   ;;  %v2368_v32 = vld [vmem:[%s6571_s8] sm:$0x3] }
 0x259   :  { %v2205_v19 = vpop.f32.mrf.mxu0 }
 0x25a   :  { %2217 = vst [vmem:[%s6577_s14 + $0x8] sm:$0xff] %v2204_v33  ;;  %v2222_v35 = vpack.c.bf16 %v2204_v33, %v2200_v29  ;;  %v2206_v36 = vadd.f32 %v2205_v19, %v2082_v27  ;;  %v5623_v29 = vld [vmem:[#allocation5 + $0x474] ss:$80 sps:$4 sm:$0xff]   ;;  %v2373_v19 = vrot.slane %v2368_v32, %v6258_v23 }
 0x25b   :  { %v2209_v38 = vpop.f32.mrf.mxu0 }
 0x25c   :  { %2220 = vst [vmem:[%s6578_s15 + $0x8] sm:$0xff] %v2206_v36  ;;  %v2210_v39 = vadd.f32 %v2209_v38, %v2078_v26  ;;  %5253 = vmatprep.mubr.bf16.mxu1 %v2222_v35  ;;  %2493 = vmatmul.mubr.bf16.vlgmr.msra.gmra.mxu0 %v2222_v35  ;;  %v5612_v26 = vld [vmem:[%s6572_s9 + $0x80] ss:$8 sps:$4 sm:$0xff]  }
 0x25d   :  { %v2211_v40 = vpop.f32.mrf.mxu0  ;;  %2502 = vmatprep.mubr.bf16.mxu0 %v5933_v63  ;;  %3910 = vmatpush1.bf16.msra.mxu0 %v5579_v34  ;;  %v2377_v34 = vrot.slane %v2368_v32, %v6264_v25  ;;  %v5653_v32 = vld [vmem:[#allocation5 + $0x154] ss:$80 sps:$4 sm:$0xff]  }
 0x25e   :  { %2218 = vst [vmem:[%s6577_s14 + $0x10] sm:$0xf] %v2210_v39  ;;  %v2223_v43 = vpack.c.bf16 %v2210_v39, %v2210_v39  ;;  %v2212_v44 = vadd.f32 %v2211_v40, %v2082_v27  ;;  %3911 = vmatprep.subr.bf16.mxu0 %v5587_v37  ;;  %v5615_v27 = vld [vmem:[#allocation5 + $0xa0] ss:$80 sps:$4 sm:$0xff]  }
 0x25f   :  { %v2213_v47 = vpop.f32.mrf.mxu0 }
 0x260   :  { %2221 = vst [vmem:[%s6578_s15 + $0x10] sm:$0xf] %v2212_v44  ;;  %5254 = vmatmul.mubr.bf16.vlgmr.msra.gmra.mxu1 %v2223_v43 }
 0x261   :  { %v2214_v48 = vpop.f32.mrf.mxu0  ;;  %2726 = vmatpush1.bf16.msra.mxu1 %v5549_v41  ;;  %3912 = vmatpush1.bf16.msra.mxu0 %v5585_v42  ;;  %v4730_v41 = vld [vmem:[%s6569_s6] ss:$0 sm:$0xff] }
 0x262   :  { %2727 = vmatprep.subr.bf16.mxu1 %v5554_v45  ;;  %3913 = vmatprep.subr.bf16.mxu0 %v5593_v46 }
 0x264   :  { %2503 = vmatmul.mubr.bf16.gmra.mxu0 %v2223_v43 }
 0x265   :  { %2728 = vmatpush1.bf16.msra.mxu1 %v5552_v49  ;;  %3914 = vmatpush1.bf16.msra.mxu0 %v5591_v50 }
 0x266   :  { %2729 = vmatprep.subr.bf16.mxu1 %v5557_v51  ;;  %3915 = vmatprep.subr.bf16.mxu0 %v5599_v52 }
 0x267   :  { %3941 = vmatprep.mubr.bf16.mxu0 %v5933_v63 }
 0x269   :  { %2730 = vmatpush1.bf16.msra.mxu1 %v5555_v53  ;;  %3916 = vmatpush1.bf16.msra.mxu0 %v5597_v54 }
 0x26a   :  { %2731 = vmatprep.subr.bf16.mxu1 %v5560_v55  ;;  %3917 = vmatprep.subr.bf16.mxu0 %v5605_v13  ;;  %v5635_v13 = vld [vmem:[#allocation5 + $0x334] ss:$80 sps:$4 sm:$0xff]  }
 0x26d   :  { %2732 = vmatpush1.bf16.msra.mxu1 %v5558_v56  ;;  %3918 = vmatpush1.bf16.msra.mxu0 %v5603_v15  ;;  %v5633_v15 = vld [vmem:[#allocation5 + $0x330] ss:$80 sps:$4 sm:$0xff]  }
 0x26e   :  { %2733 = vmatprep.subr.bf16.mxu1 %v5563_v57  ;;  %3919 = vmatprep.subr.bf16.mxu0 %v5611_v17 }
 0x271   :  { %2734 = vmatpush1.bf16.msra.mxu1 %v5561_v58  ;;  %3920 = vmatpush1.bf16.msra.mxu0 %v5609_v20  ;;  %v5641_v20 = vld [vmem:[#allocation5 + $0x294] ss:$80 sps:$4 sm:$0xff]  }
 0x272   :  { %2735 = vmatprep.subr.bf16.mxu1 %v5566_v59  ;;  %3921 = vmatprep.subr.bf16.mxu0 %v5617_v24 }
 0x275   :  { %2736 = vmatpush1.bf16.msra.mxu1 %v5564_v60  ;;  %3922 = vmatpush1.bf16.msra.mxu0 %v5615_v27  ;;  %v5644_v27 = vld [vmem:[#allocation5 + $0x28c] ss:$80 sps:$4 sm:$0xff]  }
 0x276   :  { %2737 = vmatprep.subr.bf16.mxu1 %v5569_v61  ;;  %3923 = vmatprep.subr.bf16.mxu0 %v5620_v28  ;;  %v5621_v61 = vld [vmem:[#allocation5 + $0x470] ss:$80 sps:$4 sm:$0xff]   ;;  %v5647_v28 = vld [vmem:[#allocation5 + $0x1f4] ss:$80 sps:$4 sm:$0xff]  }
 0x279   :  { %2738 = vmatpush1.bf16.msra.mxu1 %v5567_v62  ;;  %3924 = vmatpush1.bf16.msra.mxu0 %v5618_v30  ;;  %v5645_v30 = vld [vmem:[#allocation5 + $0x1f0] ss:$80 sps:$4 sm:$0xff]  }
 0x27a   :  { %2739 = vmatprep.subr.bf16.mxu1 %v5572_v0  ;;  %3960 = vmatprep.subr.bf16.mxu0 %v5626_v31  ;;  %v5650_v31 = vld [vmem:[#allocation5 + $0x1ec] ss:$80 sps:$4 sm:$0xff]  }
 0x27d   :  { %2740 = vmatpush1.bf16.msra.mxu1 %v5570_v1 }
 0x27e   :  { %2741 = vmatprep.subr.bf16.mxu1 %v5575_v2  ;;  %v5629_v2 = vld [vmem:[#allocation5 + $0x3d4] ss:$80 sps:$4 sm:$0xff]  }
 0x281   :  { %2742 = vmatpush2.bf16.msra.mxu1 %v5573_v3 }
 0x282   :  { %2743 = vmatprep.subr.bf16.mxu1 %v5578_v4 }
 0x285   :  { %2744 = vmatpush2.bf16.msra.mxu1 %v5576_v5 }
 0x286   :  { %2745 = vmatprep.subr.bf16.mxu1 %v5584_v6 }
 0x289   :  { %2746 = vmatpush2.bf16.msra.mxu1 %v5582_v7  ;;  %v5624_v7 = vld [vmem:[#allocation5 + $0x468] ss:$80 sps:$4 sm:$0xff]  }
 0x28a   :  { %2747 = vmatprep.subr.bf16.mxu1 %v5590_v8 }
 0x28d   :  { %2748 = vmatpush2.bf16.msra.mxu1 %v5588_v9  ;;  %v5627_v9 = vld [vmem:[#allocation5 + $0x3d0] ss:$80 sps:$4 sm:$0xff]  }
 0x28e   :  { %2749 = vmatprep.subr.bf16.mxu1 %v5596_v10  ;;  %v5632_v10 = vld [vmem:[#allocation5 + $0x3cc] ss:$80 sps:$4 sm:$0xff]  }
 0x291   :  { %2750 = vmatpush2.bf16.msra.mxu1 %v5594_v11 }
 0x292   :  { %2751 = vmatprep.subr.bf16.mxu1 %v5602_v12 }
 0x295   :  { %2752 = vmatpush2.bf16.msra.mxu1 %v5600_v14  ;;  %v5630_v14 = vld [vmem:[#allocation5 + $0x3c8] ss:$80 sps:$4 sm:$0xff]  }
 0x296   :  { %2753 = vmatprep.subr.bf16.mxu1 %v5608_v16  ;;  %v5638_v16 = vld [vmem:[#allocation5 + $0x32c] ss:$80 sps:$4 sm:$0xff]  }
 0x299   :  { %2754 = vmatpush2.bf16.msra.mxu1 %v5606_v18 }
 0x29a   :  { %2755 = vmatprep.subr.bf16.mxu1 %v5614_v21  ;;  %v5636_v21 = vld [vmem:[#allocation5 + $0x328] ss:$80 sps:$4 sm:$0xff]  }
 0x29d   :  { %2756 = vmatpush2.bf16.msra.mxu1 %v5612_v26  ;;  %v5639_v26 = vld [vmem:[#allocation5 + $0x290] ss:$80 sps:$4 sm:$0xff]  }
 0x29e   :  { %4011 = vmatprep.subr.bf16.mxu1 %v5623_v29  ;;  %v5642_v29 = vld [vmem:[#allocation5 + $0x288] ss:$80 sps:$4 sm:$0xff]  }
 0x31c   :  { %v2494_v33 = vpop.f32.mrf.mxu0 }
 0x31d   :  { %v2495_v39 = vadd.f32 %v2494_v33, %v2373_v19  ;;  %v5648_v33 = vld [vmem:[#allocation5 + $0x1e8] ss:$80 sps:$4 sm:$0xff]  }
 0x31e   :  { %v2496_v35 = vpop.f32.mrf.mxu0 }
 0x31f   :  { %v2497_v40 = vadd.f32 %v2496_v35, %v2377_v34  ;;  %v2511_v49 = vmax.f32 %v2495_v39, 0.0  ;;  %v5659_v35 = vld [vmem:[#allocation5 + $0xb4] ss:$80 sps:$4 sm:$0xff]  }
 0x320   :  { %v5255_v36 = vpop.f32.mrf.mxu1  ;;  %v2498_v37 = vpop.f32.mrf.mxu0  ;;  %v5665_v39 = vld [vmem:[#allocation5 + $0x14] ss:$80 sps:$4 sm:$0xff]  }
 0x321   :  { %v2499_v38 = vadd.f32 %v2498_v37, %v2373_v19  ;;  %v2512_v50 = vmax.f32 %v2497_v40, 0.0  ;;  %v2338_v57 = vadd.f32 %v5255_v36, %v4730_v41  ;;  %v5654_v36 = vld [vmem:[#allocation5 + $0x148] ss:$80 sps:$4 sm:$0xff]   ;;  %v5657_v37 = vld [vmem:[#allocation5 + $0xb0] ss:$80 sps:$4 sm:$0xff]  }
 0x322   :  { %v2329_v42 = vpop.f32.mrf.mxu1  ;;  %v2500_v43 = vpop.f32.mrf.mxu0  ;;  %v5660_v40 = vld [vmem:[#allocation5 + $0xa8] ss:$80 sps:$4 sm:$0xff]  }
 0x323   :  { %v2330_v44 = vadd.f32 %v4730_v41, %v2329_v42  ;;  %v2513_v45 = vmax.f32 %v2499_v38, 0.0  ;;  %v2501_v46 = vadd.f32 %v2500_v43, %v2377_v34  ;;  %v2348_v11 = vmul.f32 0.01, %v2338_v57  ;;  %v5662_v38 = vld [vmem:[#allocation5 + $0xac] ss:$80 sps:$4 sm:$0xff]  }
 0x324   :  { %v5256_v47 = vpop.f32.mrf.mxu1  ;;  %v2504_v48 = vpop.f32.mrf.mxu0  ;;  %vm2345_vm5 = vcmp.gt.f32.partialorder %v2338_v57, 0.0  ;;  %v5668_v42 = vld [vmem:[#allocation5 + $0xc] ss:$80 sps:$4 sm:$0xff]   ;;  %v5671_v43 = vld [vmem:[#allocation5 + $0x484] ss:$80 sps:$4 sm:$0xff]  }
 0x325   :  { %v2514_v51 = vmax.f32 %v2501_v46, 0.0  ;;  %v2346_v54 = vmul.f32 0.01, %v2330_v44  ;;  %v2517_v58 = vpack.c.bf16 %v2513_v45, %v2511_v49  ;;  %vm2343_vm3 = vcmp.gt.f32.partialorder %v2330_v44, 0.0  ;;  %v5669_v45 = vld [vmem:[#allocation5 + $0x480] ss:$80 sps:$4 sm:$0xff]  }
 0x326   :  { %v2332_v52 = vpop.f32.mrf.mxu1  ;;  %v2506_v53 = vpop.f32.mrf.mxu0  ;;  %v2505_v62 = vadd.f32 %v2504_v48, %v2373_v19  ;;  %v2351_v17 = vsel %vm2345_vm5, %v2338_v57, %v2348_v11  ;;  %v5651_v19 = vld [vmem:[#allocation5 + $0x150] ss:$80 sps:$4 sm:$0xff]   ;;  %v5674_v46 = vld [vmem:[#allocation5 + $0x47c] ss:$80 sps:$4 sm:$0xff]   ;;  %v5677_v47 = vld [vmem:[#allocation5 + $0x3e4] ss:$80 sps:$4 sm:$0xff]  }
 0x327   :  { %v2333_v55 = vadd.f32 %v4730_v41, %v2332_v52  ;;  %v2507_v56 = vadd.f32 %v2506_v53, %v2377_v34  ;;  %v2518_v59 = vpack.c.bf16 %v2514_v51, %v2512_v50  ;;  %v2349_v4 = vsel %vm2343_vm3, %v2330_v44, %v2346_v54  ;;  %v5656_v34 = vld [vmem:[#allocation5 + $0x14c] ss:$80 sps:$4 sm:$0xff]   ;;  %v5663_v41 = vld [vmem:[#allocation5 + $0x10] ss:$80 sps:$4 sm:$0xff]   ;;  %v5666_v44 = vld [vmem:[#allocation5 + $0x8] ss:$80 sps:$4 sm:$0xff]  }
 0x328   :  { %v2508_v60 = vpop.f32.mrf.mxu0  ;;  %v2515_v12 = vmax.f32 %v2505_v62, 0.0  ;;  %v6393_v24 = vpack.c.bf16 %v2351_v17, %v2351_v17  ;;  %v5672_v48 = vld [vmem:[#allocation5 + $0x478] ss:$80 sps:$4 sm:$0xff]   ;;  %v5675_v49 = vld [vmem:[#allocation5 + $0x3e0] ss:$80 sps:$4 sm:$0xff]  }
 0x329   :  { %vm2344_vm4 = vcmp.gt.f32.partialorder %v2333_v55, 0.0  ;;  %v2347_v0 = vmul.f32 0.01, %v2333_v55  ;;  %v2516_v1 = vmax.f32 %v2507_v56, 0.0  ;;  %2757 = vmatprep.mubr.bf16.mxu1 %v2518_v59  ;;  %v5680_v50 = vld [vmem:[#allocation5 + $0x3dc] ss:$80 sps:$4 sm:$0xff]  }
 0x32a   :  { %v2509_v3 = vpop.f32.mrf.mxu0  ;;  %2758 = vmatmul.mubr.bf16.vlgmr.msra.gmra.mxu1 %v2517_v58  ;;  %v2519_v18 = vpack.c.bf16 %v2515_v12, %v2515_v12  ;;  %v5683_v51 = vld [vmem:[#allocation5 + $0x344] ss:$80 sps:$4 sm:$0xff]   ;;  %v5678_v52 = vld [vmem:[#allocation5 + $0x3d8] ss:$80 sps:$4 sm:$0xff]   ;;  %v5681_v53 = vld [vmem:[#allocation5 + $0x340] ss:$80 sps:$4 sm:$0xff]  }
 0x32b   :  { %v2350_v5 = vsel %vm2344_vm4, %v2333_v55, %v2347_v0  ;;  %v2520_v6 = vpack.c.bf16 %v2516_v1, %v2516_v1  ;;  %4012 = vmatpush1.bf16.msra.mxu1 %v5621_v61  ;;  %v5686_v54 = vld [vmem:[#allocation5 + $0x33c] ss:$80 sps:$4 sm:$0xff]   ;;  %v5689_v55 = vld [vmem:[#allocation5 + $0x2a4] ss:$80 sps:$4 sm:$0xff]   ;;  %v5684_v56 = vld [vmem:[#allocation5 + $0x338] ss:$80 sps:$4 sm:$0xff]  }
 0x32c   :  { %v6389_v8 = vpack.c.bf16 %v2350_v5, %v2349_v4  ;;  %4013 = vmatprep.subr.bf16.mxu1 %v5629_v2  ;;  %v5687_v57 = vld [vmem:[#allocation5 + $0x2a0] ss:$80 sps:$4 sm:$0xff]   ;;  %v5692_v58 = vld [vmem:[#allocation5 + $0x29c] ss:$80 sps:$4 sm:$0xff]   ;;  %v5695_v59 = vld [vmem:[#allocation5 + $0x204] ss:$80 sps:$4 sm:$0xff]  }
 0x32d   :  { %2767 = vmatprep.mubr.bf16.mxu1 %v2520_v6  ;;  %v5690_v60 = vld [vmem:[#allocation5 + $0x298] ss:$80 sps:$4 sm:$0xff]   ;;  %v5693_v61 = vld [vmem:[#allocation5 + $0x200] ss:$80 sps:$4 sm:$0xff]   ;;  %v5698_v62 = vld [vmem:[#allocation5 + $0x1fc] ss:$80 sps:$4 sm:$0xff]  }
 0x32e   :  { %3942 = vmatmul.mubr.bf16.vlgmr.msra.gmra.mxu0 %v6389_v8  ;;  %v5701_v0 = vld [vmem:[#allocation5 + $0x164] ss:$80 sps:$4 sm:$0xff]   ;;  %v5696_v1 = vld [vmem:[#allocation5 + $0x1f8] ss:$80 sps:$4 sm:$0xff]   ;;  %v5699_v2 = vld [vmem:[#allocation5 + $0x160] ss:$80 sps:$4 sm:$0xff]  }
 0x32f   :  { %3961 = vmatpush1.bf16.msra.mxu0 %v5624_v7  ;;  %3951 = vmatprep.mubr.bf16.mxu0 %v5933_v63  ;;  %v5704_v3 = vld [vmem:[#allocation5 + $0x15c] ss:$80 sps:$4 sm:$0xff]   ;;  %v5707_v4 = vld [vmem:[#allocation5 + $0xc4] ss:$80 sps:$4 sm:$0xff]   ;;  %v5702_v5 = vld [vmem:[#allocation5 + $0x158] ss:$80 sps:$4 sm:$0xff]  }
 0x330   :  { %4014 = vmatpush1.bf16.msra.mxu1 %v5627_v9  ;;  %3962 = vmatprep.subr.bf16.mxu0 %v5632_v10  ;;  %v5705_v6 = vld [vmem:[#allocation5 + $0xc0] ss:$80 sps:$4 sm:$0xff]   ;;  %v5710_v7 = vld [vmem:[#allocation5 + $0xbc] ss:$80 sps:$4 sm:$0xff]   ;;  %v5713_v9 = vld [vmem:[#allocation5 + $0x24] ss:$80 sps:$4 sm:$0xff]  }
 0x331   :  { %4015 = vmatprep.subr.bf16.mxu1 %v5635_v13  ;;  %v5708_v10 = vld [vmem:[#allocation5 + $0xb8] ss:$80 sps:$4 sm:$0xff]   ;;  %v5711_v11 = vld [vmem:[#allocation5 + $0x20] ss:$80 sps:$4 sm:$0xff]   ;;  %v5716_v12 = vld [vmem:[#allocation5 + $0x1c] ss:$80 sps:$4 sm:$0xff]  }
 0x332   :  { %2768 = vmatmul.mubr.bf16.gmra.mxu1 %v2519_v18  ;;  %v5719_v13 = vld [vmem:[#allocation5 + $0x494] ss:$80 sps:$4 sm:$0xff]   ;;  %v5720_v18 = vld [vmem:[#allocation5 + $0x488] ss:$80 sps:$4 sm:$0xff]  }
 0x333   :  { %3963 = vmatpush1.bf16.msra.mxu0 %v5630_v14  ;;  %4043 = vmatprep.mubr.bf16.mxu1 %v5933_v63  ;;  %v5714_v14 = vld [vmem:[#allocation5 + $0x18] ss:$80 sps:$4 sm:$0xff]   ;;  %v5725_v17 = vld [vmem:[#allocation5 + $0x3f4] ss:$80 sps:$4 sm:$0xff]  }
 0x334   :  { %4016 = vmatpush1.bf16.msra.mxu1 %v5633_v15  ;;  %3964 = vmatprep.subr.bf16.mxu0 %v5638_v16  ;;  %v5717_v15 = vld [vmem:[#allocation5 + $0x490] ss:$80 sps:$4 sm:$0xff]   ;;  %v5722_v16 = vld [vmem:[#allocation5 + $0x48c] ss:$80 sps:$4 sm:$0xff]  }
 0x335   :  { %4017 = vmatprep.subr.bf16.mxu1 %v5641_v20  ;;  %v5723_v20 = vld [vmem:[#allocation5 + $0x3f0] ss:$80 sps:$4 sm:$0xff]  }
 0x336   :  { %3952 = vmatmul.mubr.bf16.gmra.mxu0 %v6393_v24 }
 0x337   :  { %3965 = vmatpush1.bf16.msra.mxu0 %v5636_v21  ;;  %3992 = vmatprep.mubr.bf16.mxu0 %v5933_v63  ;;  %v5728_v21 = vld [vmem:[#allocation5 + $0x3ec] ss:$80 sps:$4 sm:$0xff]  }
 0x338   :  { %4018 = vmatpush1.bf16.msra.mxu1 %v5639_v26  ;;  %3966 = vmatprep.subr.bf16.mxu0 %v5644_v27  ;;  %v5731_v26 = vld [vmem:[#allocation5 + $0x354] ss:$80 sps:$4 sm:$0xff]   ;;  %v5726_v27 = vld [vmem:[#allocation5 + $0x3e8] ss:$80 sps:$4 sm:$0xff]  }
 0x339   :  { %4019 = vmatprep.subr.bf16.mxu1 %v5647_v28  ;;  %v5729_v28 = vld [vmem:[#allocation5 + $0x350] ss:$80 sps:$4 sm:$0xff]  }
 0x33b   :  { %3967 = vmatpush1.bf16.msra.mxu0 %v5642_v29  ;;  %v5734_v29 = vld [vmem:[#allocation5 + $0x34c] ss:$80 sps:$4 sm:$0xff]  }
 0x33c   :  { %4020 = vmatpush1.bf16.msra.mxu1 %v5645_v30  ;;  %3968 = vmatprep.subr.bf16.mxu0 %v5650_v31  ;;  %v5737_v30 = vld [vmem:[#allocation5 + $0x2b4] ss:$80 sps:$4 sm:$0xff]   ;;  %v5732_v31 = vld [vmem:[#allocation5 + $0x348] ss:$80 sps:$4 sm:$0xff]  }
 0x33d   :  { %4021 = vmatprep.subr.bf16.mxu1 %v5653_v32  ;;  %v5735_v32 = vld [vmem:[#allocation5 + $0x2b0] ss:$80 sps:$4 sm:$0xff]  }
 0x33f   :  { %3969 = vmatpush1.bf16.msra.mxu0 %v5648_v33  ;;  %v5740_v33 = vld [vmem:[#allocation5 + $0x2ac] ss:$80 sps:$4 sm:$0xff]  }
 0x340   :  { %4022 = vmatpush1.bf16.msra.mxu1 %v5651_v19  ;;  %3970 = vmatprep.subr.bf16.mxu0 %v5656_v34  ;;  %v5743_v19 = vld [vmem:[#allocation5 + $0x214] ss:$80 sps:$4 sm:$0xff]   ;;  %v5738_v34 = vld [vmem:[#allocation5 + $0x2a8] ss:$80 sps:$4 sm:$0xff]  }
 0x341   :  { %4023 = vmatprep.subr.bf16.mxu1 %v5659_v35  ;;  %v5741_v35 = vld [vmem:[#allocation5 + $0x210] ss:$80 sps:$4 sm:$0xff]  }
 0x343   :  { %3971 = vmatpush1.bf16.msra.mxu0 %v5654_v36  ;;  %v5746_v36 = vld [vmem:[#allocation5 + $0x20c] ss:$80 sps:$4 sm:$0xff]  }
 0x344   :  { %4024 = vmatpush1.bf16.msra.mxu1 %v5657_v37  ;;  %3972 = vmatprep.subr.bf16.mxu0 %v5662_v38  ;;  %v5749_v37 = vld [vmem:[#allocation5 + $0x174] ss:$80 sps:$4 sm:$0xff]   ;;  %v5744_v38 = vld [vmem:[#allocation5 + $0x208] ss:$80 sps:$4 sm:$0xff]  }
 0x345   :  { %4025 = vmatprep.subr.bf16.mxu1 %v5665_v39  ;;  %v5747_v39 = vld [vmem:[#allocation5 + $0x170] ss:$80 sps:$4 sm:$0xff]  }
 0x347   :  { %3973 = vmatpush1.bf16.msra.mxu0 %v5660_v40  ;;  %v5752_v40 = vld [vmem:[#allocation5 + $0x16c] ss:$80 sps:$4 sm:$0xff]  }
 0x348   :  { %4026 = vmatpush1.bf16.msra.mxu1 %v5663_v41  ;;  %3974 = vmatprep.subr.bf16.mxu0 %v5668_v42  ;;  %v5755_v41 = vld [vmem:[#allocation5 + $0xd4] ss:$80 sps:$4 sm:$0xff]   ;;  %v5750_v42 = vld [vmem:[#allocation5 + $0x168] ss:$80 sps:$4 sm:$0xff]  }
 0x349   :  { %4113 = vmatprep.subr.bf16.mxu1 %v5671_v43  ;;  %v5753_v43 = vld [vmem:[#allocation5 + $0xd0] ss:$80 sps:$4 sm:$0xff]  }
 0x34b   :  { %4044 = vmatmul.mubr.bf16.vlgmr.msra.gmra.mxu1 %v6389_v8  ;;  %3975 = vmatpush1.bf16.msra.mxu0 %v5666_v44  ;;  %v5758_v44 = vld [vmem:[#allocation5 + $0xcc] ss:$80 sps:$4 sm:$0xff]  }
 0x34c   :  { %4114 = vmatpush1.bf16.msra.mxu1 %v5669_v45  ;;  %4062 = vmatprep.subr.bf16.mxu0 %v5674_v46  ;;  %v5761_v45 = vld [vmem:[#allocation5 + $0x34] ss:$80 sps:$4 sm:$0xff]   ;;  %v5756_v46 = vld [vmem:[#allocation5 + $0xc8] ss:$80 sps:$4 sm:$0xff]  }
 0x34d   :  { %4115 = vmatprep.subr.bf16.mxu1 %v5677_v47  ;;  %4053 = vmatprep.mubr.bf16.mxu1 %v5933_v63  ;;  %v5759_v47 = vld [vmem:[#allocation5 + $0x30] ss:$80 sps:$4 sm:$0xff]  }
 0x34e   :  { %3993 = vmatmul.mubr.bf16.vlgmr.msra.gmra.mxu0 %v6389_v8 }
 0x34f   :  { %4063 = vmatpush1.bf16.msra.mxu0 %v5672_v48  ;;  %4002 = vmatprep.mubr.bf16.mxu0 %v5933_v63  ;;  %v5764_v48 = vld [vmem:[#allocation5 + $0x2c] ss:$80 sps:$4 sm:$0xff]  }
 0x350   :  { %4116 = vmatpush1.bf16.msra.mxu1 %v5675_v49  ;;  %4064 = vmatprep.subr.bf16.mxu0 %v5680_v50  ;;  %v5767_v49 = vld [vmem:[#allocation5 + $0x4a4] ss:$80 sps:$4 sm:$0xff]   ;;  %v5762_v50 = vld [vmem:[#allocation5 + $0x28] ss:$80 sps:$4 sm:$0xff]  }
 0x351   :  { %4117 = vmatprep.subr.bf16.mxu1 %v5683_v51  ;;  %v5765_v51 = vld [vmem:[#allocation5 + $0x4a0] ss:$80 sps:$4 sm:$0xff]  }
 0x353   :  { %4054 = vmatmul.mubr.bf16.gmra.mxu1 %v6393_v24  ;;  %4065 = vmatpush1.bf16.msra.mxu0 %v5678_v52  ;;  %v5770_v52 = vld [vmem:[#allocation5 + $0x49c] ss:$80 sps:$4 sm:$0xff]  }
 0x354   :  { %4118 = vmatpush1.bf16.msra.mxu1 %v5681_v53  ;;  %4066 = vmatprep.subr.bf16.mxu0 %v5686_v54  ;;  %v5773_v53 = vld [vmem:[#allocation5 + $0x404] ss:$80 sps:$4 sm:$0xff]   ;;  %v5768_v54 = vld [vmem:[#allocation5 + $0x498] ss:$80 sps:$4 sm:$0xff]  }
 0x355   :  { %4119 = vmatprep.subr.bf16.mxu1 %v5689_v55  ;;  %4145 = vmatprep.mubr.bf16.mxu1 %v5933_v63  ;;  %v5771_v55 = vld [vmem:[#allocation5 + $0x400] ss:$80 sps:$4 sm:$0xff]  }
 0x356   :  { %4003 = vmatmul.mubr.bf16.gmra.mxu0 %v6393_v24 }
 0x357   :  { %4067 = vmatpush1.bf16.msra.mxu0 %v5684_v56  ;;  %4094 = vmatprep.mubr.bf16.mxu0 %v5933_v63  ;;  %v5776_v56 = vld [vmem:[#allocation5 + $0x3fc] ss:$80 sps:$4 sm:$0xff]  }
 0x358   :  { %4120 = vmatpush1.bf16.msra.mxu1 %v5687_v57  ;;  %4068 = vmatprep.subr.bf16.mxu0 %v5692_v58  ;;  %v5779_v57 = vld [vmem:[#allocation5 + $0x364] ss:$80 sps:$4 sm:$0xff]   ;;  %v5774_v58 = vld [vmem:[#allocation5 + $0x3f8] ss:$80 sps:$4 sm:$0xff]  }
 0x359   :  { %4121 = vmatprep.subr.bf16.mxu1 %v5695_v59  ;;  %v5777_v59 = vld [vmem:[#allocation5 + $0x360] ss:$80 sps:$4 sm:$0xff]  }
 0x35b   :  { %4069 = vmatpush1.bf16.msra.mxu0 %v5690_v60  ;;  %v5782_v60 = vld [vmem:[#allocation5 + $0x35c] ss:$80 sps:$4 sm:$0xff]  }
 0x35c   :  { %4122 = vmatpush1.bf16.msra.mxu1 %v5693_v61  ;;  %4070 = vmatprep.subr.bf16.mxu0 %v5698_v62  ;;  %v5785_v61 = vld [vmem:[#allocation5 + $0x2c4] ss:$80 sps:$4 sm:$0xff]   ;;  %v5780_v62 = vld [vmem:[#allocation5 + $0x358] ss:$80 sps:$4 sm:$0xff]  }
 0x35d   :  { %4123 = vmatprep.subr.bf16.mxu1 %v5701_v0  ;;  %v5783_v0 = vld [vmem:[#allocation5 + $0x2c0] ss:$80 sps:$4 sm:$0xff]  }
 0x35f   :  { %4071 = vmatpush1.bf16.msra.mxu0 %v5696_v1  ;;  %v5788_v1 = vld [vmem:[#allocation5 + $0x2bc] ss:$80 sps:$4 sm:$0xff]  }
 0x360   :  { %4124 = vmatpush1.bf16.msra.mxu1 %v5699_v2  ;;  %4072 = vmatprep.subr.bf16.mxu0 %v5704_v3  ;;  %v5791_v2 = vld [vmem:[#allocation5 + $0x224] ss:$80 sps:$4 sm:$0xff]   ;;  %v5786_v3 = vld [vmem:[#allocation5 + $0x2b8] ss:$80 sps:$4 sm:$0xff]  }
 0x361   :  { %4125 = vmatprep.subr.bf16.mxu1 %v5707_v4  ;;  %v5789_v4 = vld [vmem:[#allocation5 + $0x220] ss:$80 sps:$4 sm:$0xff]  }
 0x363   :  { %4073 = vmatpush1.bf16.msra.mxu0 %v5702_v5  ;;  %v5794_v5 = vld [vmem:[#allocation5 + $0x21c] ss:$80 sps:$4 sm:$0xff]  }
 0x364   :  { %4126 = vmatpush1.bf16.msra.mxu1 %v5705_v6  ;;  %4074 = vmatprep.subr.bf16.mxu0 %v5710_v7  ;;  %v5797_v6 = vld [vmem:[#allocation5 + $0x184] ss:$80 sps:$4 sm:$0xff]   ;;  %v5792_v7 = vld [vmem:[#allocation5 + $0x218] ss:$80 sps:$4 sm:$0xff]  }
 0x365   :  { %4127 = vmatprep.subr.bf16.mxu1 %v5713_v9  ;;  %v5795_v9 = vld [vmem:[#allocation5 + $0x180] ss:$80 sps:$4 sm:$0xff]  }
 0x367   :  { %4075 = vmatpush1.bf16.msra.mxu0 %v5708_v10  ;;  %v5800_v10 = vld [vmem:[#allocation5 + $0x17c] ss:$80 sps:$4 sm:$0xff]  }
 0x368   :  { %4128 = vmatpush1.bf16.msra.mxu1 %v5711_v11  ;;  %4076 = vmatprep.subr.bf16.mxu0 %v5716_v12  ;;  %v5803_v11 = vld [vmem:[#allocation5 + $0xe4] ss:$80 sps:$4 sm:$0xff]   ;;  %v5798_v12 = vld [vmem:[#allocation5 + $0x178] ss:$80 sps:$4 sm:$0xff]  }
 0x369   :  { %4215 = vmatprep.subr.bf16.mxu1 %v5719_v13  ;;  %v5801_v13 = vld [vmem:[#allocation5 + $0xe0] ss:$80 sps:$4 sm:$0xff]  }
 0x36b   :  { %4146 = vmatmul.mubr.bf16.vlgmr.msra.gmra.mxu1 %v6389_v8  ;;  %4077 = vmatpush1.bf16.msra.mxu0 %v5714_v14  ;;  %v5806_v14 = vld [vmem:[#allocation5 + $0xdc] ss:$80 sps:$4 sm:$0xff]  }
 0x36c   :  { %4216 = vmatpush1.bf16.msra.mxu1 %v5717_v15  ;;  %4164 = vmatprep.subr.bf16.mxu0 %v5722_v16  ;;  %v5809_v15 = vld [vmem:[#allocation5 + $0x44] ss:$80 sps:$4 sm:$0xff]   ;;  %v5804_v16 = vld [vmem:[#allocation5 + $0xd8] ss:$80 sps:$4 sm:$0xff]  }
 0x36d   :  { %4217 = vmatprep.subr.bf16.mxu1 %v5725_v17  ;;  %4155 = vmatprep.mubr.bf16.mxu1 %v5933_v63  ;;  %v5807_v17 = vld [vmem:[#allocation5 + $0x40] ss:$80 sps:$4 sm:$0xff]  }
 0x36e   :  { %4095 = vmatmul.mubr.bf16.vlgmr.msra.gmra.mxu0 %v6389_v8 }
 0x36f   :  { %4165 = vmatpush1.bf16.msra.mxu0 %v5720_v18  ;;  %4104 = vmatprep.mubr.bf16.mxu0 %v5933_v63  ;;  %v5812_v18 = vld [vmem:[#allocation5 + $0x3c] ss:$80 sps:$4 sm:$0xff]  }
 0x370   :  { %4218 = vmatpush1.bf16.msra.mxu1 %v5723_v20  ;;  %4166 = vmatprep.subr.bf16.mxu0 %v5728_v21  ;;  %v5815_v20 = vld [vmem:[#allocation5 + $0x4ac] ss:$80 sps:$4 sm:$0xff]   ;;  %v5810_v21 = vld [vmem:[#allocation5 + $0x38] ss:$80 sps:$4 sm:$0xff]  }
 0x371   :  { %4219 = vmatprep.subr.bf16.mxu1 %v5731_v26  ;;  %v5813_v26 = vld [vmem:[#allocation5 + $0x4a8] ss:$80 sps:$4 sm:$0xff]  }
 0x373   :  { %4156 = vmatmul.mubr.bf16.gmra.mxu1 %v6393_v24  ;;  %4167 = vmatpush1.bf16.msra.mxu0 %v5726_v27  ;;  %v5818_v27 = vld [vmem:[#allocation5 + $0x40c] ss:$80 sps:$4 sm:$0xff]  }
 0x374   :  { %4220 = vmatpush1.bf16.msra.mxu1 %v5729_v28  ;;  %4168 = vmatprep.subr.bf16.mxu0 %v5734_v29  ;;  %v5816_v28 = vld [vmem:[#allocation5 + $0x408] ss:$80 sps:$4 sm:$0xff]   ;;  %v5821_v29 = vld [vmem:[#allocation5 + $0x36c] ss:$80 sps:$4 sm:$0xff]  }
 0x375   :  { %4221 = vmatprep.subr.bf16.mxu1 %v5737_v30  ;;  %4247 = vmatprep.mubr.bf16.mxu1 %v5933_v63  ;;  %v5819_v30 = vld [vmem:[#allocation5 + $0x368] ss:$80 sps:$4 sm:$0xff]  }
 0x376   :  { %4105 = vmatmul.mubr.bf16.gmra.mxu0 %v6393_v24 }
 0x377   :  { %4169 = vmatpush1.bf16.msra.mxu0 %v5732_v31  ;;  %4196 = vmatprep.mubr.bf16.mxu0 %v5933_v63  ;;  %v5824_v31 = vld [vmem:[#allocation5 + $0x2cc] ss:$80 sps:$4 sm:$0xff]  }
 0x378   :  { %4222 = vmatpush1.bf16.msra.mxu1 %v5735_v32  ;;  %4170 = vmatprep.subr.bf16.mxu0 %v5740_v33  ;;  %v5822_v32 = vld [vmem:[#allocation5 + $0x2c8] ss:$80 sps:$4 sm:$0xff]   ;;  %v5827_v33 = vld [vmem:[#allocation5 + $0x22c] ss:$80 sps:$4 sm:$0xff]  }
 0x379   :  { %4223 = vmatprep.subr.bf16.mxu1 %v5743_v19  ;;  %v5825_v19 = vld [vmem:[#allocation5 + $0x228] ss:$80 sps:$4 sm:$0xff]  }
 0x37b   :  { %4171 = vmatpush1.bf16.msra.mxu0 %v5738_v34  ;;  %v5830_v34 = vld [vmem:[#allocation5 + $0x18c] ss:$80 sps:$4 sm:$0xff]  }
 0x37c   :  { %4224 = vmatpush1.bf16.msra.mxu1 %v5741_v35  ;;  %4172 = vmatprep.subr.bf16.mxu0 %v5746_v36  ;;  %v5828_v35 = vld [vmem:[#allocation5 + $0x188] ss:$80 sps:$4 sm:$0xff]   ;;  %v5833_v36 = vld [vmem:[#allocation5 + $0xec] ss:$80 sps:$4 sm:$0xff]  }
 0x37d   :  { %4225 = vmatprep.subr.bf16.mxu1 %v5749_v37  ;;  %v5831_v37 = vld [vmem:[#allocation5 + $0xe8] ss:$80 sps:$4 sm:$0xff]  }
 0x37f   :  { %4173 = vmatpush1.bf16.msra.mxu0 %v5744_v38  ;;  %v5836_v38 = vld [vmem:[#allocation5 + $0x4c] ss:$80 sps:$4 sm:$0xff]  }
 0x380   :  { %4226 = vmatpush1.bf16.msra.mxu1 %v5747_v39  ;;  %4174 = vmatprep.subr.bf16.mxu0 %v5752_v40  ;;  %v2553_v39 = vld [vmem:[%s6573_s10] sm:$0x3] }
 0x381   :  { %4227 = vmatprep.subr.bf16.mxu1 %v5755_v41  ;;  %v2558_v40 = vrot.slane %v2553_v39, %v6258_v23  ;;  %v6439_v41 = vld [vmem:[%s6575_s12] sm:$0xff] }
 0x383   :  { %4175 = vmatpush1.bf16.msra.mxu0 %v5750_v42 }
 0x384   :  { %4228 = vmatpush1.bf16.msra.mxu1 %v5753_v43  ;;  %4176 = vmatprep.subr.bf16.mxu0 %v5758_v44  ;;  %v3012_v43 = vrot.slane %v6439_v41, %v6258_v23 }
 0x385   :  { %4229 = vmatprep.subr.bf16.mxu1 %v5761_v45 }
 0x387   :  { %4177 = vmatpush1.bf16.msra.mxu0 %v5756_v46 }
 0x388   :  { %4230 = vmatpush1.bf16.msra.mxu1 %v5759_v47  ;;  %4178 = vmatprep.subr.bf16.mxu0 %v5764_v48 }
 0x389   :  { %4317 = vmatprep.subr.bf16.mxu1 %v5767_v49 }
 0x38b   :  { %4248 = vmatmul.mubr.bf16.vlgmr.msra.gmra.mxu1 %v6389_v8  ;;  %4179 = vmatpush1.bf16.msra.mxu0 %v5762_v50 }
 0x38c   :  { %4318 = vmatpush1.bf16.msra.mxu1 %v5765_v51  ;;  %4266 = vmatprep.subr.bf16.mxu0 %v5770_v52  ;;  %v2562_v52 = vrot.slane %v2553_v39, %v6264_v25 }
 0x38d   :  { %4319 = vmatprep.subr.bf16.mxu1 %v5773_v53  ;;  %4257 = vmatprep.mubr.bf16.mxu1 %v5933_v63 }
 0x38e   :  { %4197 = vmatmul.mubr.bf16.vlgmr.msra.gmra.mxu0 %v6389_v8 }
 0x38f   :  { %4267 = vmatpush1.bf16.msra.mxu0 %v5768_v54  ;;  %4206 = vmatprep.mubr.bf16.mxu0 %v5933_v63 }
 0x390   :  { %4320 = vmatpush1.bf16.msra.mxu1 %v5771_v55  ;;  %4268 = vmatprep.subr.bf16.mxu0 %v5776_v56 }
 0x391   :  { %4321 = vmatprep.subr.bf16.mxu1 %v5779_v57 }
 0x393   :  { %4258 = vmatmul.mubr.bf16.gmra.mxu1 %v6393_v24  ;;  %4269 = vmatpush1.bf16.msra.mxu0 %v5774_v58 }
 0x394   :  { %4322 = vmatpush1.bf16.msra.mxu1 %v5777_v59  ;;  %4270 = vmatprep.subr.bf16.mxu0 %v5782_v60 }
 0x395   :  { %4323 = vmatprep.subr.bf16.mxu1 %v5785_v61  ;;  %4349 = vmatprep.mubr.bf16.mxu1 %v5933_v63 }
 0x396   :  { %4207 = vmatmul.mubr.bf16.gmra.mxu0 %v6393_v24 }
 0x397   :  { %4271 = vmatpush1.bf16.msra.mxu0 %v5780_v62  ;;  %4298 = vmatprep.mubr.bf16.mxu0 %v5933_v63 }
 0x398   :  { %4324 = vmatpush1.bf16.msra.mxu1 %v5783_v0  ;;  %4272 = vmatprep.subr.bf16.mxu0 %v5788_v1 }
 0x399   :  { %4325 = vmatprep.subr.bf16.mxu1 %v5791_v2 }
 0x39b   :  { %4273 = vmatpush1.bf16.msra.mxu0 %v5786_v3 }
 0x39c   :  { %4326 = vmatpush1.bf16.msra.mxu1 %v5789_v4  ;;  %4274 = vmatprep.subr.bf16.mxu0 %v5794_v5 }
 0x39d   :  { %4327 = vmatprep.subr.bf16.mxu1 %v5797_v6 }
 0x39f   :  { %4275 = vmatpush1.bf16.msra.mxu0 %v5792_v7 }
 0x3a0   :  { %4328 = vmatpush1.bf16.msra.mxu1 %v5795_v9  ;;  %4276 = vmatprep.subr.bf16.mxu0 %v5800_v10 }
 0x3a1   :  { %4329 = vmatprep.subr.bf16.mxu1 %v5803_v11  ;;  %v3027_v11 = vsub.s32 4, %v6255_v22 }
 0x3a3   :  { %4277 = vmatpush1.bf16.msra.mxu0 %v5798_v12  ;;  %v3031_v12 = vsub.s32 5, %v6255_v22 }
 0x3a4   :  { %4330 = vmatpush1.bf16.msra.mxu1 %v5801_v13  ;;  %4278 = vmatprep.subr.bf16.mxu0 %v5806_v14  ;;  %v6469_v13 = vsub.s32 2, %v6255_v22  ;;  %v3028_v14 = vrot.slane %v6439_v41, %v3027_v11 }
 0x3a5   :  { %4331 = vmatprep.subr.bf16.mxu1 %v5809_v15  ;;  %v6475_v15 = vsub.s32 3, %v6255_v22 }
 0x3a7   :  { %4279 = vmatpush1.bf16.msra.mxu0 %v5804_v16  ;;  %v3032_v16 = vrot.slane %v6439_v41, %v3031_v12 }
 0x3a8   :  { %4332 = vmatpush1.bf16.msra.mxu1 %v5807_v17  ;;  %4280 = vmatprep.subr.bf16.mxu0 %v5812_v18  ;;  %v3020_v18 = vrot.slane %v6439_v41, %v6469_v13 }
 0x3a9   :  { %5257 = vmatprep.subr.bf16.mxu1 %v5815_v20 }
 0x3ab   :  { %4350 = vmatmul.mubr.bf16.vlgmr.msra.gmra.mxu1 %v6389_v8  ;;  %4281 = vmatpush1.bf16.msra.mxu0 %v5810_v21 }
 0x3ac   :  { %5265 = vmatpush1.bf16.msra.mxu1 %v5813_v26  ;;  %4368 = vmatprep.subr.bf16.mxu0 %v5815_v20 }
 0x3ad   :  { %5258 = vmatprep.subr.bf16.mxu1 %v5818_v27  ;;  %4359 = vmatprep.mubr.bf16.mxu1 %v5933_v63 }
 0x3ae   :  { %4299 = vmatmul.mubr.bf16.vlgmr.msra.gmra.mxu0 %v6389_v8 }
 0x3af   :  { %4369 = vmatpush1.bf16.msra.mxu0 %v5813_v26  ;;  %4308 = vmatprep.mubr.bf16.mxu0 %v5933_v63  ;;  %v3024_v26 = vrot.slane %v6439_v41, %v6475_v15 }
 0x3b0   :  { %5266 = vmatpush1.bf16.msra.mxu1 %v5816_v28  ;;  %4370 = vmatprep.subr.bf16.mxu0 %v5818_v27 }
 0x3b1   :  { %5259 = vmatprep.subr.bf16.mxu1 %v5821_v29 }
 0x3b3   :  { %4360 = vmatmul.mubr.bf16.gmra.mxu1 %v6393_v24  ;;  %4371 = vmatpush1.bf16.msra.mxu0 %v5816_v28 }
 0x3b4   :  { %5267 = vmatpush1.bf16.msra.mxu1 %v5819_v30  ;;  %4372 = vmatprep.subr.bf16.mxu0 %v5821_v29 }
 0x3b5   :  { %5260 = vmatprep.subr.bf16.mxu1 %v5824_v31  ;;  %4410 = vmatprep.mubr.bf16.mxu1 %v5933_v63 }
 0x3b6   :  { %4309 = vmatmul.mubr.bf16.gmra.mxu0 %v6393_v24 }
 0x3b7   :  { %4373 = vmatpush1.bf16.msra.mxu0 %v5819_v30  ;;  %4400 = vmatprep.mubr.bf16.mxu0 %v5933_v63  ;;  %v5834_v63 = vld [vmem:[#allocation5 + $0x48] ss:$80 sps:$4 sm:$0xff]  }
 0x3b8   :  { %5268 = vmatpush1.bf16.msra.mxu1 %v5822_v32  ;;  %4374 = vmatprep.subr.bf16.mxu0 %v5824_v31 }
 0x3b9   :  { %5261 = vmatprep.subr.bf16.mxu1 %v5827_v33 }
 0x3bb   :  { %4375 = vmatpush1.bf16.msra.mxu0 %v5822_v32 }
 0x3bc   :  { %5269 = vmatpush1.bf16.msra.mxu1 %v5825_v19  ;;  %4376 = vmatprep.subr.bf16.mxu0 %v5827_v33 }
 0x3bd   :  { %5262 = vmatprep.subr.bf16.mxu1 %v5830_v34 }
 0x3bf   :  { %4377 = vmatpush1.bf16.msra.mxu0 %v5825_v19 }
 0x3c0   :  { %5270 = vmatpush1.bf16.msra.mxu1 %v5828_v35  ;;  %4378 = vmatprep.subr.bf16.mxu0 %v5830_v34 }
 0x3c1   :  { %5263 = vmatprep.subr.bf16.mxu1 %v5833_v36 }
 0x3c3   :  { %4379 = vmatpush1.bf16.msra.mxu0 %v5828_v35 }
 0x3c4   :  { %5271 = vmatpush1.bf16.msra.mxu1 %v5831_v37  ;;  %4380 = vmatprep.subr.bf16.mxu0 %v5833_v36 }
 0x3c5   :  { %5264 = vmatprep.subr.bf16.mxu1 %v5836_v38 }
 0x3c7   :  { %4381 = vmatpush1.bf16.msra.mxu0 %v5831_v37 }
 0x3c8   :  { %5272 = vmatpush1.bf16.msra.mxu1 %v5834_v63  ;;  %4382 = vmatprep.subr.bf16.mxu0 %v5836_v38 }
 0x3cb   :  { %4411 = vmatmul.mubr.bf16.vlgmr.msra.gmra.mxu1 %v6393_v24  ;;  %4383 = vmatpush1.bf16.msra.mxu0 %v5834_v63 }
 0x3ce   :  { %4401 = vmatmul.mubr.bf16.vlgmr.msra.gmra.mxu0 %v6389_v8  ;;  %v3016_v8 = vrot.slane %v6439_v41, %v6264_v25 }
 0x3ea   :  { %v2759_v42 = vpop.f32.mrf.mxu1 }
 0x3eb   :  { %v6443_v44 = vadd.f32 %v2759_v42, %v2558_v40 }
 0x3ec   :  { %v2761_v24 = vpop.f32.mrf.mxu1 }
 0x3ed   :  { %2776 = vmax.xlane.f32.xlu1 %v6443_v44  ;;  %v6463_v10 = vadd.f32 %v2761_v24, %v2562_v52 }
 0x3ee   :  { %v3943_v45 = vpop.f32.mrf.mxu0  ;;  %v2763_v46 = vpop.f32.mrf.mxu1 }
 0x3ef   :  { %v3944_v47 = vadd.f32 %v3943_v45, %v3012_v43  ;;  %v6448_v48 = vadd.f32 %v2763_v46, %v2558_v40 }
 0x3f0   :  { %v3945_v49 = vpop.f32.mrf.mxu0  ;;  %v2765_v50 = vpop.f32.mrf.mxu1 }
 0x3f1   :  { %4419 = vst [vmem:[#allocation7] sm:$0xff] %v3944_v47  ;;  %v3946_v51 = vadd.f32 %v3945_v49, %v3016_v8  ;;  %2778 = vmax.xlane.f32.xlu1 %v6448_v48  ;;  %v6452_v56 = vadd.f32 %v2765_v50, %v2562_v52 }
 0x3f2   :  { %v3947_v53 = vpop.f32.mrf.mxu0  ;;  %v2769_v54 = vpop.f32.mrf.mxu1 }
 0x3f3   :  { %4420 = vst [vmem:[#allocation7 + $0x8] sm:$0xff] %v3946_v51  ;;  %v3948_v55 = vadd.f32 %v3947_v53, %v3012_v43  ;;  %v6454_v57 = vadd.f32 %v2769_v54, %v2558_v40  ;;  %v6487_v51 = vld [vmem:[%s6575_s12 + $0x8] sm:$0xff]  ;;  %v3039_v54 = vsub.s32 7, %v6255_v22 }
 0x3f4   :  { %v3949_v58 = vpop.f32.mrf.mxu0  ;;  %v2771_v59 = vpop.f32.mrf.mxu1  ;;  %v3044_v53 = vrot.slane %v6487_v51, %v6258_v23 }
 0x3f5   :  { %4439 = vst [vmem:[#allocation7 + $0xa0] sm:$0xff] %v3948_v55  ;;  %v3950_v60 = vadd.f32 %v3949_v58, %v3016_v8  ;;  %v6456_v61 = vadd.f32 %v2771_v59, %v2562_v52  ;;  %2811 = vmax.xlane.f32.xlu1 %v6452_v56  ;;  %v2781_v62 = vsel %vm2780_vm6, %v6454_v57, -inf  ;;  %v3035_v52 = vsub.s32 6, %v6255_v22 }
 0x3f6   :  { %v3953_v0 = vpop.f32.mrf.mxu0  ;;  %v2773_v1 = vpop.f32.mrf.mxu1  ;;  %2782 = vmax.xlane.f32.xlu0 %v2781_v62  ;;  %v3048_v55 = vrot.slane %v6487_v51, %v6264_v25 }
 0x3f7   :  { %4440 = vst [vmem:[#allocation7 + $0xa8] sm:$0xff] %v3950_v60  ;;  %v3954_v2 = vadd.f32 %v3953_v0, %v3012_v43  ;;  %v2813_v6 = vsel %vm2780_vm6, %v6456_v61, -inf  ;;  %v3036_v59 = vrot.slane %v6439_v41, %v3035_v52  ;;  %v3040_v0 = vrot.slane %v6439_v41, %v3039_v54 }
 0x3f8   :  { %v3955_v3 = vpop.f32.mrf.mxu0  ;;  %v2774_v4 = vpop.f32.mrf.mxu1 }
 0x3f9   :  { %4459 = vst [vmem:[#allocation7 + $0x140] sm:$0xf] %v3954_v2  ;;  %v3956_v5 = vadd.f32 %v3955_v3, %v3016_v8 }
 0x3fa   :  { %v3957_v7 = vpop.f32.mrf.mxu0  ;;  %2814 = vmax.xlane.f32.xlu0 %v2813_v6 }
 0x3fb   :  { %4460 = vst [vmem:[#allocation7 + $0x148] sm:$0xf] %v3956_v5 }
 0x3fc   :  { %v3958_v9 = vpop.f32.mrf.mxu0 }
 0x3fe   :  { %2809 = vmax.xlane.f32.xlu0 %v6463_v10 }
 0x40b   :  { %v4045_v17 = vpop.f32.mrf.mxu1 }
 0x40c   :  { %v4046_v20 = vadd.f32 %v4045_v17, %v3028_v14 }
 0x40d   :  { %v4047_v21 = vpop.f32.mrf.mxu1 }
 0x40e   :  { %4423 = vst [vmem:[#allocation7 + $0x20] sm:$0xff] %v4046_v20  ;;  %v4048_v27 = vadd.f32 %v4047_v21, %v3032_v16  ;;  %v3994_v28 = vpop.f32.mrf.mxu0 }
 0x40f   :  { %v3995_v29 = vadd.f32 %v3994_v28, %v3020_v18  ;;  %v4049_v30 = vpop.f32.mrf.mxu1 }
 0x410   :  { %4424 = vst [vmem:[#allocation7 + $0x28] sm:$0xff] %v4048_v27  ;;  %v4050_v31 = vadd.f32 %v4049_v30, %v3028_v14  ;;  %v3996_v32 = vpop.f32.mrf.mxu0 }
 0x411   :  { %4421 = vst [vmem:[#allocation7 + $0x10] sm:$0xff] %v3995_v29  ;;  %v3997_v33 = vadd.f32 %v3996_v32, %v3024_v26  ;;  %v4051_v19 = vpop.f32.mrf.mxu1 }
 0x412   :  { %4443 = vst [vmem:[#allocation7 + $0xc0] sm:$0xff] %v4050_v31  ;;  %v4052_v34 = vadd.f32 %v4051_v19, %v3032_v16  ;;  %v3998_v35 = vpop.f32.mrf.mxu0 }
 0x413   :  { %4422 = vst [vmem:[#allocation7 + $0x18] sm:$0xff] %v3997_v33  ;;  %v3999_v36 = vadd.f32 %v3998_v35, %v3020_v18  ;;  %v4055_v37 = vpop.f32.mrf.mxu1  ;;  %v3060_v35 = vrot.slane %v6487_v51, %v3027_v11 }
 0x414   :  { %4444 = vst [vmem:[#allocation7 + $0xc8] sm:$0xff] %v4052_v34  ;;  %v4056_v38 = vadd.f32 %v4055_v37, %v3028_v14  ;;  %v4000_v63 = vpop.f32.mrf.mxu0 }
 0x415   :  { %4441 = vst [vmem:[#allocation7 + $0xb0] sm:$0xff] %v3999_v36  ;;  %v4001_v39 = vadd.f32 %v4000_v63, %v3024_v26  ;;  %v4057_v40 = vpop.f32.mrf.mxu1  ;;  %v3064_v36 = vrot.slane %v6487_v51, %v3031_v12 }
 0x416   :  { %4463 = vst [vmem:[#allocation7 + $0x160] sm:$0xf] %v4056_v38  ;;  %v4058_v42 = vadd.f32 %v4057_v40, %v3032_v16  ;;  %v4004_v43 = vpop.f32.mrf.mxu0  ;;  %v3052_v38 = vrot.slane %v6487_v51, %v6469_v13  ;;  %v3056_v40 = vrot.slane %v6487_v51, %v6475_v15 }
 0x417   :  { %4442 = vst [vmem:[#allocation7 + $0xb8] sm:$0xff] %v4001_v39  ;;  %v4005_v24 = vadd.f32 %v4004_v43, %v3020_v18  ;;  %v4059_v8 = vpop.f32.mrf.mxu1 }
 0x418   :  { %4464 = vst [vmem:[#allocation7 + $0x168] sm:$0xf] %v4058_v42  ;;  %v4006_v45 = vpop.f32.mrf.mxu0 }
 0x419   :  { %4461 = vst [vmem:[#allocation7 + $0x150] sm:$0xf] %v4005_v24  ;;  %v4007_v46 = vadd.f32 %v4006_v45, %v3024_v26  ;;  %v4060_v47 = vpop.f32.mrf.mxu1 }
 0x41a   :  { %v4008_v49 = vpop.f32.mrf.mxu0 }
 0x41b   :  { %4462 = vst [vmem:[#allocation7 + $0x158] sm:$0xf] %v4007_v46 }
 0x41c   :  { %v4009_v50 = vpop.f32.mrf.mxu0 }
 0x42b   :  { %v4147_v58 = vpop.f32.mrf.mxu1 }
 0x42c   :  { %v4148_v60 = vadd.f32 %v4147_v58, %v3044_v53 }
 0x42d   :  { %v4149_v62 = vpop.f32.mrf.mxu1 }
 0x42e   :  { %4427 = vst [vmem:[#allocation7 + $0x40] sm:$0xff] %v4148_v60  ;;  %v4150_v1 = vadd.f32 %v4149_v62, %v3048_v55  ;;  %v4096_v2 = vpop.f32.mrf.mxu0 }
 0x42f   :  { %v4097_v3 = vadd.f32 %v4096_v2, %v3036_v59  ;;  %v4151_v4 = vpop.f32.mrf.mxu1 }
 0x430   :  { %4428 = vst [vmem:[#allocation7 + $0x48] sm:$0xff] %v4150_v1  ;;  %v4152_v5 = vadd.f32 %v4151_v4, %v3044_v53  ;;  %v4098_v6 = vpop.f32.mrf.mxu0 }
 0x431   :  { %4425 = vst [vmem:[#allocation7 + $0x30] sm:$0xff] %v4097_v3  ;;  %v4099_v7 = vadd.f32 %v4098_v6, %v3040_v0  ;;  %v4153_v9 = vpop.f32.mrf.mxu1 }
 0x432   :  { %4447 = vst [vmem:[#allocation7 + $0xe0] sm:$0xff] %v4152_v5  ;;  %v4154_v14 = vadd.f32 %v4153_v9, %v3048_v55  ;;  %v4100_v16 = vpop.f32.mrf.mxu0  ;;  %v6514_v9 = vld [vmem:[%s6575_s12 + $0x10] sm:$0xf]  ;;  %s5934_s12 = smov [#allocation7]  }
 0x433   :  { %4426 = vst [vmem:[#allocation7 + $0x38] sm:$0xff] %v4099_v7  ;;  %v4101_v17 = vadd.f32 %v4100_v16, %v3036_v59  ;;  %v4157_v18 = vpop.f32.mrf.mxu1  ;;  %v3080_v16 = vrot.slane %v6514_v9, %v6264_v25  ;;  %s4484_s0 = sshll.u32 %s5934_s12, 4  ;;  %s4485_s0 = int_to_ptr.vmem [resolvable:$true] %s4484_s0 }
 0x434   :  { %4448 = vst [vmem:[#allocation7 + $0xe8] sm:$0xff] %v4154_v14  ;;  %v4158_v20 = vadd.f32 %v4157_v18, %v3044_v53  ;;  %v4102_v41 = vpop.f32.mrf.mxu0  ;;  %v3076_v14 = vrot.slane %v6514_v9, %v6258_v23  ;;  %v3068_v18 = vrot.slane %v6487_v51, %v3035_v52  ;;  %s5901_s30 = scalar_lea.vmem %s4485_s0, 7680  ;;  %p5906_p11 = scmp.lt.s32.totalorder %s4485_s0, %s4485_s0 }
 0x435   :  { %4445 = vst [vmem:[#allocation7 + $0xd0] sm:$0xff] %v4101_v17  ;;  %v4103_v21 = vadd.f32 %v4102_v41, %v3040_v0  ;;  %v4159_v26 = vpop.f32.mrf.mxu1  ;;  %p5902_p10 = scmp.ne.s32.totalorder %s4485_s0, %s5901_s30  ;;  %p5907_p12 = scmp.lt.s32.totalorder %s5901_s30, %s5901_s30 }
 0x436   :  { %4467 = vst [vmem:[#allocation7 + $0x180] sm:$0xf] %v4158_v20  ;;  %v4160_v27 = vadd.f32 %v4159_v26, %v3048_v55  ;;  %v4106_v28 = vpop.f32.mrf.mxu0 }
 0x437   :  { %4446 = vst [vmem:[#allocation7 + $0xd8] sm:$0xff] %v4103_v21  ;;  %v4107_v29 = vadd.f32 %v4106_v28, %v3036_v59  ;;  %v4161_v30 = vpop.f32.mrf.mxu1  ;;  %v3072_v21 = vrot.slane %v6487_v51, %v3039_v54  ;;  %p5908_p13 = por %p5907_p12, %p5906_p11 }
 0x438   :  { %4468 = vst [vmem:[#allocation7 + $0x188] sm:$0xf] %v4160_v27  ;;  %v4108_v31 = vpop.f32.mrf.mxu0 }
 0x439   :  { %4465 = vst [vmem:[#allocation7 + $0x170] sm:$0xf] %v4107_v29  ;;  %v4109_v32 = vadd.f32 %v4108_v31, %v3040_v0  ;;  %v4162_v33 = vpop.f32.mrf.mxu1  ;;  %p5909_p0 = pnand %p5908_p13, %p5902_p10 }
 0x43a   :  { %v4110_v19 = vpop.f32.mrf.mxu0 }
 0x43b   :  { %4466 = vst [vmem:[#allocation7 + $0x178] sm:$0xf] %v4109_v32 }
 0x43c   :  { %v4111_v34 = vpop.f32.mrf.mxu0 }
 0x44b   :  { %v4249_v37 = vpop.f32.mrf.mxu1 }
 0x44c   :  { %v4250_v63 = vadd.f32 %v4249_v37, %v3060_v35 }
 0x44d   :  { %v4251_v39 = vpop.f32.mrf.mxu1 }
 0x44e   :  { %4431 = vst [vmem:[#allocation7 + $0x60] sm:$0xff] %v4250_v63  ;;  %v4252_v42 = vadd.f32 %v4251_v39, %v3064_v36  ;;  %v4198_v43 = vpop.f32.mrf.mxu0 }
 0x44f   :  { %v4199_v24 = vadd.f32 %v4198_v43, %v3052_v38  ;;  %v4253_v8 = vpop.f32.mrf.mxu1 }
 0x450   :  { %4432 = vst [vmem:[#allocation7 + $0x68] sm:$0xff] %v4252_v42  ;;  %v4254_v11 = vadd.f32 %v4253_v8, %v3060_v35  ;;  %v4200_v45 = vpop.f32.mrf.mxu0 }
 0x451   :  { %4429 = vst [vmem:[#allocation7 + $0x50] sm:$0xff] %v4199_v24  ;;  %v4201_v46 = vadd.f32 %v4200_v45, %v3056_v40  ;;  %v4255_v12 = vpop.f32.mrf.mxu1 }
 0x452   :  { %4451 = vst [vmem:[#allocation7 + $0x100] sm:$0xff] %v4254_v11  ;;  %v4256_v47 = vadd.f32 %v4255_v12, %v3064_v36  ;;  %v4202_v49 = vpop.f32.mrf.mxu0 }
 0x453   :  { %4430 = vst [vmem:[#allocation7 + $0x58] sm:$0xff] %v4201_v46  ;;  %v4203_v50 = vadd.f32 %v4202_v49, %v3052_v38  ;;  %v4259_v53 = vpop.f32.mrf.mxu1 }
 0x454   :  { %4452 = vst [vmem:[#allocation7 + $0x108] sm:$0xff] %v4256_v47  ;;  %v4260_v55 = vadd.f32 %v4259_v53, %v3060_v35  ;;  %v4204_v58 = vpop.f32.mrf.mxu0 }
 0x455   :  { %4449 = vst [vmem:[#allocation7 + $0xf0] sm:$0xff] %v4203_v50  ;;  %v4205_v59 = vadd.f32 %v4204_v58, %v3056_v40  ;;  %v4261_v60 = vpop.f32.mrf.mxu1  ;;  %v3084_v58 = vrot.slane %v6514_v9, %v6469_v13 }
 0x456   :  { %4471 = vst [vmem:[#allocation7 + $0x1a0] sm:$0xf] %v4260_v55  ;;  %v4262_v62 = vadd.f32 %v4261_v60, %v3064_v36  ;;  %v4208_v0 = vpop.f32.mrf.mxu0 }
 0x457   :  { %4450 = vst [vmem:[#allocation7 + $0xf8] sm:$0xff] %v4205_v59  ;;  %v4209_v1 = vadd.f32 %v4208_v0, %v3052_v38  ;;  %v4263_v2 = vpop.f32.mrf.mxu1 }
 0x458   :  { %4472 = vst [vmem:[#allocation7 + $0x1a8] sm:$0xf] %v4262_v62  ;;  %v4210_v3 = vpop.f32.mrf.mxu0 }
 0x459   :  { %4469 = vst [vmem:[#allocation7 + $0x190] sm:$0xf] %v4209_v1  ;;  %v4211_v4 = vadd.f32 %v4210_v3, %v3056_v40  ;;  %v4264_v5 = vpop.f32.mrf.mxu1 }
 0x45a   :  { %v4212_v6 = vpop.f32.mrf.mxu0 }
 0x45b   :  { %4470 = vst [vmem:[#allocation7 + $0x198] sm:$0xf] %v4211_v4 }
 0x45c   :  { %v4213_v7 = vpop.f32.mrf.mxu0 }
 0x46b   :  { %v4351_v17 = vpop.f32.mrf.mxu1 }
 0x46c   :  { %v4352_v20 = vadd.f32 %v4351_v17, %v3076_v14 }
 0x46d   :  { %v4353_v41 = vpop.f32.mrf.mxu1 }
 0x46e   :  { %4435 = vst [vmem:[#allocation7 + $0x80] sm:$0xff] %v4352_v20  ;;  %v4354_v26 = vadd.f32 %v4353_v41, %v3080_v16  ;;  %v4300_v27 = vpop.f32.mrf.mxu0 }
 0x46f   :  { %v4301_v28 = vadd.f32 %v4300_v27, %v3068_v18  ;;  %v4355_v29 = vpop.f32.mrf.mxu1 }
 0x470   :  { %4436 = vst [vmem:[#allocation7 + $0x88] sm:$0xff] %v4354_v26  ;;  %v4356_v23 = vadd.f32 %v4355_v29, %v3076_v14  ;;  %v4302_v30 = vpop.f32.mrf.mxu0 }
 0x471   :  { %4433 = vst [vmem:[#allocation7 + $0x70] sm:$0xff] %v4301_v28  ;;  %v4303_v25 = vadd.f32 %v4302_v30, %v3072_v21  ;;  %v4357_v31 = vpop.f32.mrf.mxu1 }
 0x472   :  { %4455 = vst [vmem:[#allocation7 + $0x120] sm:$0xff] %v4356_v23  ;;  %v4358_v32 = vadd.f32 %v4357_v31, %v3080_v16  ;;  %v4304_v52 = vpop.f32.mrf.mxu0 }
 0x473   :  { %4434 = vst [vmem:[#allocation7 + $0x78] sm:$0xff] %v4303_v25  ;;  %v4305_v33 = vadd.f32 %v4304_v52, %v3068_v18  ;;  %v4361_v19 = vpop.f32.mrf.mxu1 }
 0x474   :  { %4456 = vst [vmem:[#allocation7 + $0x128] sm:$0xff] %v4358_v32  ;;  %v4362_v22 = vadd.f32 %v4361_v19, %v3076_v14  ;;  %v4306_v51 = vpop.f32.mrf.mxu0 }
 0x475   :  { %4453 = vst [vmem:[#allocation7 + $0x110] sm:$0xff] %v4305_v33  ;;  %v4307_v54 = vadd.f32 %v4306_v51, %v3072_v21  ;;  %v4363_v34 = vpop.f32.mrf.mxu1 }
 0x476   :  { %4475 = vst [vmem:[#allocation7 + $0x1c0] sm:$0xf] %v4362_v22  ;;  %v4364_v35 = vadd.f32 %v4363_v34, %v3080_v16  ;;  %v4310_v36 = vpop.f32.mrf.mxu0  ;;  %v2777_v63 = vpop.xlane.xlu1 %2776 }
 0x477   :  { %4454 = vst [vmem:[#allocation7 + $0x118] sm:$0xff] %v4307_v54  ;;  %v4311_v37 = vadd.f32 %v4310_v36, %v3068_v18  ;;  %v4365_v38 = vpop.f32.mrf.mxu1  ;;  %v2784_v39 = vsub.f32 %v6443_v44, %v2777_v63 }
 0x478   :  { %4476 = vst [vmem:[#allocation7 + $0x1c8] sm:$0xf] %v4364_v35  ;;  %v4312_v40 = vpop.f32.mrf.mxu0 }
 0x479   :  { %4473 = vst [vmem:[#allocation7 + $0x1b0] sm:$0xf] %v4311_v37  ;;  %v4313_v42 = vadd.f32 %v4312_v40, %v3072_v21  ;;  %v4366_v43 = vpop.f32.mrf.mxu1  ;;  %v2787_v24 = vmul.f32 1.442695, %v2784_v39 }
 0x47a   :  { %v4314_v8 = vpop.f32.mrf.mxu0  ;;  %v2779_v11 = vpop.xlane.xlu1 %2778 }
 0x47b   :  { %4474 = vst [vmem:[#allocation7 + $0x1b8] sm:$0xf] %v4313_v42  ;;  %5837 = vpow2.f32 %v2787_v24  ;;  %v2785_v60 = vsub.f32 %v6448_v48, %v2779_v11 }
 0x47c   :  { %v4315_v45 = vpop.f32.mrf.mxu0 }
 0x47d   :  { %v2789_v3 = vmul.f32 1.442695, %v2785_v60 }
 0x47e   :  { %v2812_v46 = vpop.xlane.xlu1 %2811 }
 0x47f   :  { %v2783_v12 = vpop.xlane.xlu0 %2782  ;;  %v2817_v49 = vsub.f32 %v6452_v56, %v2812_v46  ;;  %v3088_v56 = vrot.slane %v6514_v9, %v6475_v15 }
 0x480   :  { %v2786_v47 = vsub.f32 %v6454_v57, %v2783_v12 }
 0x481   :  { %v2821_v44 = vmul.f32 1.442695, %v2817_v49 }
 0x482   :  { %v2791_v50 = vmul.f32 1.442695, %v2786_v47 }
 0x483   :  { %v2815_v53 = vpop.xlane.xlu0 %2814 }
 0x484   :  { %5839 = vpow2.f32 %v2791_v50  ;;  %v2818_v0 = vsub.f32 %v6456_v61, %v2815_v53 }
 0x485   :  { %5841 = vpow2.f32 %v2821_v44 }
 0x486   :  { %v2823_v4 = vmul.f32 1.442695, %v2818_v0 }
 0x487   :  { %v2810_v55 = vpop.xlane.xlu0 %2809 }
 0x488   :  { %v6531_v59 = vpop.eup %5837  ;;  %v2816_v62 = vsub.f32 %v6463_v10, %v2810_v55 }
 0x489   :  { %2793 = vadd.xlane.f32.xlu0 %v6531_v59 }
 0x48a   :  { %v2819_v57 = vmul.f32 1.442695, %v2816_v62 }
 0x48b   :  { %v4412_v1 = vpop.f32.mrf.mxu1 }
 0x48c   :  { %v4413_v2 = vadd.f32 %v4412_v1, %v3084_v58  ;;  %5843 = vpow2.f32 %v2819_v57 }
 0x48d   :  { %v4414_v13 = vpop.f32.mrf.mxu1  ;;  %5845 = vpow2.f32 %v2789_v3 }
 0x48e   :  { %4477 = vst [vmem:[#allocation7 + $0x1d0] sm:$0xf] %v4413_v2  ;;  %v4415_v5 = vadd.f32 %v4414_v13, %v3088_v56  ;;  %v4402_v48 = vpop.f32.mrf.mxu0  ;;  %5847 = vpow2.f32 %v2823_v4 }
 0x48f   :  { %v4403_v6 = vadd.f32 %v4402_v48, %v3084_v58  ;;  %v4416_v10 = vpop.f32.mrf.mxu1 }
 0x490   :  { %4478 = vst [vmem:[#allocation7 + $0x1d8] sm:$0xf] %v4415_v5  ;;  %v4404_v7 = vpop.f32.mrf.mxu0 }
 0x491   :  { %4437 = vst [vmem:[#allocation7 + $0x90] sm:$0xff] %v4403_v6  ;;  %v4405_v61 = vadd.f32 %v4404_v7, %v3088_v56  ;;  %v4417_v14 = vpop.f32.mrf.mxu1  ;;  %v5840_v16 = vpop.eup %5839 }
 0x492   :  { %v4406_v15 = vpop.f32.mrf.mxu0  ;;  %v2797_v17 = vsel %vm2780_vm6, %v5840_v16, 0.0  ;;  %v5842_v41 = vpop.eup %5841 }
 0x493   :  { %4438 = vst [vmem:[#allocation7 + $0x98] sm:$0xff] %v4405_v61  ;;  %v4407_v9 = vadd.f32 %v4406_v15, %v3084_v58  ;;  %2798 = vadd.xlane.f32.xlu0 %v2797_v17 }
 0x494   :  { %v4408_v18 = vpop.f32.mrf.mxu0 }
 0x495   :  { %4457 = vst [vmem:[#allocation7 + $0x130] sm:$0xff] %v4407_v9  ;;  %v4409_v20 = vadd.f32 %v4408_v18, %v3088_v56 }
 0x497   :  { %4458 = vst [vmem:[#allocation7 + $0x138] sm:$0xff] %v4409_v20  ;;  %2827 = vadd.xlane.f32.xlu0 %v5842_v41 }
 0x499   :  { %v5844_v21 = vpop.eup %5843 }
 0x49a   :  { %2825 = vadd.xlane.f32.xlu1 %v5844_v21  ;;  %v5846_v26 = vpop.eup %5845 }
 0x49b   :  { %v5848_v27 = vpop.eup %5847 }
 0x49c   :  { %v2829_v28 = vsel %vm2780_vm6, %v5848_v27, 0.0 }
 0x49e   :  { %2795 = vadd.xlane.f32.xlu1 %v5846_v26 }
 0x4a2   :  { %2830 = vadd.xlane.f32.xlu1 %v2829_v28 }
 0x4a3   :  { %5912 = shalt.err (!%p5909_p0)
}
 0x4a4   :  { %s5935_s18 = smov 2560   ;;  %s5936_s19 = smov 160  }
 0x4a5   :  { %4490 = dma.vmem_to_hbm [thread:$0]  %s4485_s0, 7680, %s6576_s13, [#allocation4], %s5935_s18, %s5935_s18, %s5936_s19  }
 0x512   :  { %v2794_v29 = vpop.xlane.xlu0 %2793 }
 0x513   :  { %5849 = vrcp.f32 %v2794_v29 }
 0x51c   :  { %v2799_v23 = vpop.xlane.xlu0 %2798 }
 0x51d   :  { %5851 = vrcp.f32 %v2799_v23 }
 0x520   :  { %v5850_v30 = vpop.eup %5849  ;;  %v2828_v25 = vpop.xlane.xlu0 %2827 }
 0x521   :  { %v2801_v31 = vmul.f32 %v5850_v30, %v6531_v59  ;;  %5853 = vrcp.f32 %v2828_v25 }
 0x523   :  { %2806 = vst [vmem:[%s6579_s16] sm:$0xff] %v2801_v31  ;;  %v2826_v32 = vpop.xlane.xlu1 %2825 }
 0x524   :  { %5855 = vrcp.f32 %v2826_v32 }
 0x527   :  { %v2796_v52 = vpop.xlane.xlu1 %2795 }
 0x528   :  { %5857 = vrcp.f32 %v2796_v52 }
 0x52a   :  { %v5852_v33 = vpop.eup %5851 }
 0x52b   :  { %v2805_v19 = vmul.f32 %v5852_v33, %v5840_v16  ;;  %v2831_v22 = vpop.xlane.xlu1 %2830 }
 0x52c   :  { %5859 = vrcp.f32 %v2831_v22 }
 0x52d   :  { %2808 = vst [vmem:[%s6579_s16 + $0x10] sm:$0xf] %v2805_v19 }
 0x52e   :  { %v5854_v51 = vpop.eup %5853 }
 0x52f   :  { %v2835_v54 = vmul.f32 %v5854_v51, %v5842_v41 }
 0x531   :  { %v5856_v34 = vpop.eup %5855  ;;  %2839 = vst [vmem:[%s6580_s17 + $0x8] sm:$0xff] %v2835_v54 }
 0x532   :  { %v2833_v35 = vmul.f32 %v5856_v34, %v5844_v21 }
 0x534   :  { %2838 = vst [vmem:[%s6580_s17] sm:$0xff] %v2833_v35 }
 0x535   :  { %v5858_v36 = vpop.eup %5857 }
 0x536   :  { %v2803_v37 = vmul.f32 %v5858_v36, %v5846_v26 }
 0x538   :  { %2807 = vst [vmem:[%s6579_s16 + $0x8] sm:$0xff] %v2803_v37 }
 0x539   :  { %v5860_v38 = vpop.eup %5859 }
 0x53a   :  { %v2837_v63 = vmul.f32 %v5860_v38, %v5848_v27 }
 0x53c   :  { %2840 = vst [vmem:[%s6580_s17 + $0x10] sm:$0xf] %v2837_v63 }
 0x53d   :  { %5925 = dma.done.wait [#allocation4], 7680  }
 0x53e   :  { %5926 = vsyncadd [#allocation4], 4294959616 }
 0x53f   :  { %4510 = vsyncpa [#allocation3], 1 }
 0x540   :  { %4511 = vsyncpa [#allocation6], 1 }
 0x541   :  { %4512 = vsyncpa [#allocation4], 1 }

</bundles_post_ra>
